<compile_context>
chip_gen: v7x
topology: tpu7x:2x2x1
jax: 0.10.0
libtpu: 0.0.40
codegen_flags: <defaults>
</compile_context>

<pallas_src>
import functools
import numpy as np
import jax
import jax.numpy as jnp
from jax.experimental import pallas as pl
from jax.experimental.pallas import tpu as pltpu

_VMEM_LIMIT = 32 * 1024 * 1024  # safe on v5e/v6e (128 MiB) and v7x (64 MiB)


# ---------------------------------------------------------------------------
# shared math helpers (used inside kernels and in the pure-JAX reference)
# ---------------------------------------------------------------------------
def _gelu(x):
    # exact (erf-based) GELU, matching torch.nn.functional.gelu default
    return 0.5 * x * (1.0 + jax.lax.erf(x / jnp.float32(np.sqrt(2.0))))


def _layernorm(x, w, b, eps=1e-5):
    mu = jnp.mean(x, axis=-1, keepdims=True)
    var = jnp.mean(jnp.square(x - mu), axis=-1, keepdims=True)
    return (x - mu) * jax.lax.rsqrt(var + eps) * w + b


def sinusoidal_encoding(seq_len, dim, max_timescale=10000):
    # exact replica of the PyTorch helper (including its operator precedence)
    PE = np.empty((seq_len, dim))
    pos = np.arange(seq_len).reshape(-1, 1)
    i = np.arange(dim).reshape(1, -1)
    inv = max_timescale ** (2 / dim * i // 2)
    PE[:, ::2] = np.sin(pos / inv[:, ::2])
    PE[:, 1::2] = np.cos(pos / inv[:, 1::2])
    return jnp.asarray(PE, dtype=jnp.float32)


def _fit(dim, target, align=8):
    """Largest divisor of `dim` <= target, preferring multiples of `align`.

    Never silently falls back to the full dimension (unless dim <= target),
    which previously blew the VMEM budget at real Whisper sequence lengths.
    """
    t = min(target, dim)
    for c in range(t, 0, -1):
        if dim % c == 0 and c % align == 0:
            return c
    for c in range(t, 0, -1):
        if dim % c == 0:
            return c
    return dim


# ---------------------------------------------------------------------------
# Kernel 1: Conv1d (k=3, pad=1) + GELU (+ fused positional add)
#   wrapper-side im2col -> one aligned (bt, 3*Cin) @ (3*Cin, Cout) matmul
# ---------------------------------------------------------------------------
def conv1d_gelu_kernel(x_ref, w_ref, b_ref, *rest, add_pos):
    if add_pos:
        pos_ref, o_ref = rest
    else:
        (o_ref,) = rest
    acc = jnp.dot(x_ref[0], w_ref[...], preferred_element_type=jnp.float32)
    y = _gelu(acc + b_ref[...])
    if add_pos:
        y = y + pos_ref[...]
    o_ref[0] = y


def conv1d_gelu(x_btc, w_flat, b_1c, pos=None, *, block_t=128):
    """x_btc: (B, T, Cin) f32; w_flat: (3*Cin, Cout) bf16; b_1c: (1, Cout) f32."""
    B, T, Cin = x_btc.shape
    KCin, Cout = w_flat.shape
    bt = _fit(T, block_t)

    # im2col in the wrapper: keeps kernel VMEM bounded at O(bt * 3*Cin) (no
    # full padded time axis resident) and every kernel load tile-aligned.
    xp = jnp.pad(x_btc, ((0, 0), (1, 1), (0, 0)))
    x_cat = jnp.concatenate([xp[:, 0:T], xp[:, 1:T + 1], xp[:, 2:T + 2]],
                            axis=-1).astype(jnp.bfloat16)           # (B, T, 3*Cin)

    in_specs = [
        pl.BlockSpec((1, bt, KCin), lambda b, t: (b, t, 0)),
        pl.BlockSpec((KCin, Cout), lambda b, t: (0, 0)),
        pl.BlockSpec((1, Cout), lambda b, t: (0, 0)),
    ]
    args = [x_cat, w_flat, b_1c]
    if pos is not None:
        assert pos.shape == (T, Cout)
        in_specs.append(pl.BlockSpec((bt, Cout), lambda b, t: (t, 0)))
        args.append(pos)

    kernel = functools.partial(conv1d_gelu_kernel, add_pos=pos is not None)
    return pl.pallas_call(
        kernel,
        out_shape=jax.ShapeDtypeStruct((B, T, Cout), jnp.float32),
        grid=(B, T // bt),
        in_specs=in_specs,
        out_specs=pl.BlockSpec((1, bt, Cout), lambda b, t: (b, t, 0)),
        compiler_params=pltpu.CompilerParams(
            dimension_semantics=("parallel", "parallel"),
            vmem_limit_bytes=_VMEM_LIMIT),
        cost_estimate=pl.CostEstimate(
            flops=int(2 * B * T * KCin * Cout),
            transcendentals=int(B * T * Cout),
            bytes_accessed=int(B * T * KCin * 2 + KCin * Cout * 2
                               + B * T * Cout * 4
                               + (T * Cout * 4 if pos is not None else 0))),
    )(*args)


# ---------------------------------------------------------------------------
# Kernel 2: LayerNorm + fused QKV projection
#   one (bs, D) @ (D, 3D) bf16 matmul; scale pre-folded; head-major outputs
# ---------------------------------------------------------------------------
def ln_qkv_kernel(x_ref, lnw_ref, lnb_ref, w_ref, b_ref, q_ref, k_ref, v_ref,
                  *, num_heads):
    D = x_ref.shape[-1]
    Dh = D // num_heads
    h = _layernorm(x_ref[0], lnw_ref[...], lnb_ref[...]).astype(jnp.bfloat16)
    qkv = (jnp.dot(h, w_ref[...], preferred_element_type=jnp.float32)
           + b_ref[...]).astype(jnp.bfloat16)                        # (bs, 3D)
    for hd in range(num_heads):
        q_ref[0, hd] = qkv[:, hd * Dh:(hd + 1) * Dh]
        k_ref[0, hd] = qkv[:, D + hd * Dh:D + (hd + 1) * Dh]
        v_ref[0, hd] = qkv[:, 2 * D + hd * Dh:2 * D + (hd + 1) * Dh]


def ln_qkv(x, ln_w, ln_b, w_qkv, b_qkv, *, num_heads, block_s=256):
    B, S, D = x.shape
    Dh = D // num_heads
    bs = _fit(S, block_s)

    qkv_shape = jax.ShapeDtypeStruct((B, num_heads, S, Dh), jnp.bfloat16)
    out_spec = pl.BlockSpec((1, num_heads, bs, Dh), lambda b, s: (b, 0, s, 0))

    return pl.pallas_call(
        functools.partial(ln_qkv_kernel, num_heads=num_heads),
        out_shape=(qkv_shape, qkv_shape, qkv_shape),
        grid=(B, S // bs),
        in_specs=[
            pl.BlockSpec((1, bs, D), lambda b, s: (b, s, 0)),
            pl.BlockSpec((1, D), lambda b, s: (0, 0)),
            pl.BlockSpec((1, D), lambda b, s: (0, 0)),
            pl.BlockSpec((D, 3 * D), lambda b, s: (0, 0)),
            pl.BlockSpec((1, 3 * D), lambda b, s: (0, 0)),
        ],
        out_specs=(out_spec, out_spec, out_spec),
        compiler_params=pltpu.CompilerParams(
            dimension_semantics=("parallel", "parallel"),
            vmem_limit_bytes=_VMEM_LIMIT),
        cost_estimate=pl.CostEstimate(
            flops=int(6 * B * S * D * D),
            transcendentals=0,
            bytes_accessed=int(B * S * D * 4 + 3 * D * D * 2 + 3 * B * S * D * 2)),
    )(x, ln_w, ln_b, w_qkv, b_qkv)


# ---------------------------------------------------------------------------
# Kernel 3: flash attention — all heads per grid step via batched einsum
# ---------------------------------------------------------------------------
def flash_attn_kernel(q_ref, k_ref, v_ref, o_ref, m_sc, l_sc, acc_sc):
    kv = pl.program_id(2)

    @pl.when(kv == 0)
    def _():
        m_sc[...] = jnp.full_like(m_sc, -jnp.inf)
        l_sc[...] = jnp.zeros_like(l_sc)
        acc_sc[...] = jnp.zeros_like(acc_sc)

    q = q_ref[0]                         # (H, bq, Dh) bf16, 1/sqrt(Dh) pre-folded
    k = k_ref[0]                         # (H, bkv, Dh) bf16
    v = v_ref[0]                         # (H, bkv, Dh) bf16
    s = jnp.einsum('hqd,hkd->hqk', q, k,
                   preferred_element_type=jnp.float32)               # (H, bq, bkv)
    m_prev = m_sc[...]
    m_new = jnp.maximum(m_prev, jnp.max(s, axis=-1, keepdims=True))
    alpha = jnp.exp(m_prev - m_new)
    # TODO(synk): compute the exponentials in bf16 on v6e/v7x (EUP-bound at small Dh).
    p = jnp.exp(s - m_new)
    l_sc[...] = alpha * l_sc[...] + jnp.sum(p, axis=-1, keepdims=True)
    acc_sc[...] = alpha * acc_sc[...] + jnp.einsum(
        'hqk,hkd->hqd', p.astype(jnp.bfloat16), v,
        preferred_element_type=jnp.float32)
    m_sc[...] = m_new

    @pl.when(kv == pl.num_programs(2) - 1)
    def _():
        inv = pl.reciprocal(l_sc[...], approx=True)
        o_ref[0] = (acc_sc[...] * inv).astype(o_ref.dtype)


def flash_attention(q, k, v, *, block_q=256, block_kv=512):
    B, H, S, Dh = q.shape
    bq = _fit(S, block_q)
    bkv = _fit(S, block_kv)
    n_qt = S // bq
    return pl.pallas_call(
        flash_attn_kernel,
        out_shape=jax.ShapeDtypeStruct((B, H, S, Dh), jnp.bfloat16),
        grid=(B, n_qt, S // bkv),
        in_specs=[
            pl.BlockSpec((1, H, bq, Dh), lambda b, qi, kv: (b, 0, qi, 0)),
            pl.BlockSpec((1, H, bkv, Dh), lambda b, qi, kv: (b, 0, kv, 0)),
            pl.BlockSpec((1, H, bkv, Dh), lambda b, qi, kv: (b, 0, kv, 0)),
        ],
        out_specs=pl.BlockSpec((1, H, bq, Dh), lambda b, qi, kv: (b, 0, qi, 0)),
        scratch_shapes=[
            pltpu.VMEM((H, bq, 1), jnp.float32),     # running max
            pltpu.VMEM((H, bq, 1), jnp.float32),     # running sum
            pltpu.VMEM((H, bq, Dh), jnp.float32),    # output accumulator
        ],
        compiler_params=pltpu.CompilerParams(
            dimension_semantics=("parallel", "parallel", "arbitrary"),
            vmem_limit_bytes=_VMEM_LIMIT),
        cost_estimate=pl.CostEstimate(
            flops=int(4 * B * H * S * S * Dh),
            transcendentals=int(B * H * S * S),
            bytes_accessed=int(B * H * S * Dh * 2 * (2 + 2 * n_qt))),
    )(q, k, v)


# ---------------------------------------------------------------------------
# Kernel 4: out-projection + residual + LayerNorm + MLP + residual (fused)
#   hidden-dim reduction grid axis; LN output cached in bf16 VMEM scratch
# ---------------------------------------------------------------------------
def attn_out_ln_mlp_kernel(x_ref, vals_ref, wo_ref, bo_ref, lnw_ref, lnb_ref,
                           w1_ref, b1_ref, w2_ref, b2_ref, o_ref,
                           acc_ref, x2bf_ref):
    n = pl.program_id(2)

    @pl.when(n == 0)
    def _():
        attn = jnp.dot(vals_ref[0], wo_ref[...],
                       preferred_element_type=jnp.float32)           # (bs, D)
        x2 = _layernorm(x_ref[0] + attn + bo_ref[...], lnw_ref[...], lnb_ref[...])
        acc_ref[...] = x2 + b2_ref[...]
        x2bf_ref[...] = x2.astype(jnp.bfloat16)

    h = jnp.dot(x2bf_ref[...], w1_ref[...],
                preferred_element_type=jnp.float32) + b1_ref[...]
    h = _gelu(h)
    acc_ref[...] += jnp.dot(h.astype(jnp.bfloat16), w2_ref[...],
                            preferred_element_type=jnp.float32)

    @pl.when(n == pl.num_programs(2) - 1)
    def _():
        o_ref[0] = acc_ref[...]


def attn_out_ln_mlp(x, vals, wo, bo, ln_w, ln_b, w1, b1, w2, b2,
                    *, block_s=256, block_n=512):
    B, S, D = x.shape
    N = w1.shape[1]                      # 4*D
    bs = _fit(S, block_s)
    bn = _fit(N, block_n)
    return pl.pallas_call(
        attn_out_ln_mlp_kernel,
        out_shape=jax.ShapeDtypeStruct((B, S, D), jnp.float32),
        grid=(B, S // bs, N // bn),
        in_specs=[
            pl.BlockSpec((1, bs, D), lambda b, s, n: (b, s, 0)),     # residual x
            pl.BlockSpec((1, bs, D), lambda b, s, n: (b, s, 0)),     # attn values
            pl.BlockSpec((D, D), lambda b, s, n: (0, 0)),            # wo
            pl.BlockSpec((1, D), lambda b, s, n: (0, 0)),            # bo
            pl.BlockSpec((1, D), lambda b, s, n: (0, 0)),            # ln w
            pl.BlockSpec((1, D), lambda b, s, n: (0, 0)),            # ln b
            pl.BlockSpec((D, bn), lambda b, s, n: (0, n)),           # w1
            pl.BlockSpec((1, bn), lambda b, s, n: (0, n)),           # b1
            pl.BlockSpec((bn, D), lambda b, s, n: (n, 0)),           # w2
            pl.BlockSpec((1, D), lambda b, s, n: (0, 0)),            # b2
        ],
        out_specs=pl.BlockSpec((1, bs, D), lambda b, s, n: (b, s, 0)),
        scratch_shapes=[pltpu.VMEM((bs, D), jnp.float32),            # MLP accumulator
                        pltpu.VMEM((bs, D), jnp.bfloat16)],          # cached LN output
        compiler_params=pltpu.CompilerParams(
            dimension_semantics=("parallel", "parallel", "arbitrary"),
            vmem_limit_bytes=_VMEM_LIMIT),
        cost_estimate=pl.CostEstimate(
            flops=int(2 * B * S * D * D + 4 * B * S * D * N),
            transcendentals=int(B * S * N),
            bytes_accessed=int((D * D + 2 * D * N) * 2
                               + B * S * D * (4 + 2 + 4))),
    )(x, vals, wo, bo, ln_w, ln_b, w1, b1, w2, b2)


# ---------------------------------------------------------------------------
# Kernel 5: final LayerNorm
# ---------------------------------------------------------------------------
def layernorm_kernel(x_ref, w_ref, b_ref, o_ref):
    o_ref[0] = _layernorm(x_ref[0], w_ref[...], b_ref[...])


def layernorm(x, w, b, *, block_s=256):
    B, S, D = x.shape
    bs = _fit(S, block_s)
    return pl.pallas_call(
        layernorm_kernel,
        out_shape=jax.ShapeDtypeStruct((B, S, D), jnp.float32),
        grid=(B, S // bs),
        in_specs=[
            pl.BlockSpec((1, bs, D), lambda b, s: (b, s, 0)),
            pl.BlockSpec((1, D), lambda b, s: (0, 0)),
            pl.BlockSpec((1, D), lambda b, s: (0, 0)),
        ],
        out_specs=pl.BlockSpec((1, bs, D), lambda b, s: (b, s, 0)),
        compiler_params=pltpu.CompilerParams(
            dimension_semantics=("parallel", "parallel"),
            vmem_limit_bytes=_VMEM_LIMIT),
    )(x, w, b)


# ---------------------------------------------------------------------------
# Parameter construction and kernel-layout packing
# ---------------------------------------------------------------------------
def init_params(key, num_mels, D, seq_len, num_blocks):
    ks = iter(jax.random.split(key, 8 + 20 * num_blocks))
    nrm = lambda shape, s=0.05: (s * jax.random.normal(next(ks), shape)).astype(jnp.float32)
    params = {
        "conv1_w": nrm((D, num_mels, 3)), "conv1_b": nrm((D,)),
        "conv2_w": nrm((D, D, 3)), "conv2_b": nrm((D,)),
        "pos": sinusoidal_encoding(seq_len, D),
        "lnf_w": 1.0 + nrm((1, D), 0.1), "lnf_b": nrm((1, D), 0.1),
        "blocks": [],
    }
    for _ in range(num_blocks):
        params["blocks"].append({
            "ln1_w": 1.0 + nrm((1, D), 0.1), "ln1_b": nrm((1, D), 0.1),
            "wq": nrm((D, D)), "bq": nrm((1, D)),
            "wk": nrm((D, D)),
            "wv": nrm((D, D)), "bv": nrm((1, D)),
            "wo": nrm((D, D)), "bo": nrm((1, D)),
            "lnf_w": 1.0 + nrm((1, D), 0.1), "lnf_b": nrm((1, D), 0.1),
            "w1": nrm((D, 4 * D)), "b1": nrm((1, 4 * D)),
            "w2": nrm((4 * D, D)), "b2": nrm((1, D)),
        })
    return params


def pack_params(params, num_heads):
    """Cast matmul weights to bf16 and pre-pack kernel-friendly layouts.

    * conv weights -> (3*Cin, Cout) for the im2col matmul,
    * per-block q/k/v -> one fused (D, 3D) W_qkv with 1/sqrt(Dh) folded into
      the q columns/bias (k has no bias -> zeros),
    * wo stays a single (D, D) matrix (attention values arrive lane-dense
      head-major, matching the PyTorch head-concat order).
    """
    D = params["conv2_w"].shape[0]
    Dh = D // num_heads
    scale = 1.0 / float(np.sqrt(Dh))
    bf = lambda a: a.astype(jnp.bfloat16)

    def conv_flat(w):  # (Cout, Cin, 3) -> (3*Cin, Cout), tap-major rows
        Cout, Cin, K = w.shape
        return bf(jnp.transpose(w, (2, 1, 0)).reshape(K * Cin, Cout))

    packed = {
        "conv1_w": conv_flat(params["conv1_w"]),
        "conv1_b": params["conv1_b"].reshape(1, -1),
        "conv2_w": conv_flat(params["conv2_w"]),
        "conv2_b": params["conv2_b"].reshape(1, -1),
        "pos": params["pos"],
        "lnf_w": params["lnf_w"], "lnf_b": params["lnf_b"],
        "blocks": [],
    }
    for p in params["blocks"]:
        w_qkv = jnp.concatenate([p["wq"] * scale, p["wk"], p["wv"]], axis=1)
        b_qkv = jnp.concatenate([p["bq"] * scale, jnp.zeros_like(p["bq"]), p["bv"]],
                                axis=1)
        packed["blocks"].append({
            "ln1_w": p["ln1_w"], "ln1_b": p["ln1_b"],
            "w_qkv": bf(w_qkv), "b_qkv": b_qkv,
            "wo": bf(p["wo"]), "bo": p["bo"],
            "lnf_w": p["lnf_w"], "lnf_b": p["lnf_b"],
            "w1": bf(p["w1"]), "b1": p["b1"],
            "w2": bf(p["w2"]), "b2": p["b2"],
        })
    return packed


# ---------------------------------------------------------------------------
# Full AudioEncoder forward (Pallas)
# ---------------------------------------------------------------------------
def audio_encoder_forward(x_ncw, params, num_heads, *, block_t=128, block_s=256,
                          block_q=256, block_kv=512, block_n=512):
    kp = pack_params(params, num_heads)
    x = jnp.transpose(x_ncw, (0, 2, 1))                       # (B, T, num_mels)
    x = conv1d_gelu(x, kp["conv1_w"], kp["conv1_b"], block_t=block_t)
    # conv2 with the positional-encoding add fused into its epilogue
    x = conv1d_gelu(x, kp["conv2_w"], kp["conv2_b"], pos=kp["pos"], block_t=block_t)

    B, S, D = x.shape
    for bp in kp["blocks"]:
        q, k, v = ln_qkv(x, bp["ln1_w"], bp["ln1_b"], bp["w_qkv"], bp["b_qkv"],
                         num_heads=num_heads, block_s=block_s)
        vals = flash_attention(q, k, v, block_q=block_q, block_kv=block_kv)
        # layout plumbing: head-major (B,H,S,Dh) -> lane-dense (B,S,D) so the
        # out-projection below is one full-width matmul.
        vals = jnp.transpose(vals, (0, 2, 1, 3)).reshape(B, S, D)
        x = attn_out_ln_mlp(x, vals, bp["wo"], bp["bo"], bp["lnf_w"], bp["lnf_b"],
                            bp["w1"], bp["b1"], bp["w2"], bp["b2"],
                            block_s=block_s, block_n=block_n)

    return layernorm(x, kp["lnf_w"], kp["lnf_b"], block_s=block_s)


# ---------------------------------------------------------------------------
# Pure-JAX reference (mirrors the PyTorch module semantics, f32 throughout)
# ---------------------------------------------------------------------------
def ref_forward(x_ncw, params, num_heads):
    with jax.default_matmul_precision("highest"):
        x = jnp.transpose(x_ncw, (0, 2, 1))

        def conv(x, W, b):
            T = x.shape[1]
            xp = jnp.pad(x, ((0, 0), (1, 1), (0, 0)))
            out = b[None, None, :]
            for k in range(3):
                out = out + jnp.einsum("btc,oc->bto", xp[:, k:k + T, :], W[:, :, k])
            return out

        x = _gelu(conv(x, params["conv1_w"], params["conv1_b"]))
        x = _gelu(conv(x, params["conv2_w"], params["conv2_b"]))
        x = x + params["pos"][None]

        B, S, D = x.shape
        Dh = D // num_heads
        for p in params["blocks"]:
            h = _layernorm(x, p["ln1_w"], p["ln1_b"])
            q = h @ p["wq"] + p["bq"]
            k = h @ p["wk"]
            v = h @ p["wv"] + p["bv"]
            q = q.reshape(B, S, num_heads, Dh).transpose(0, 2, 1, 3)
            k = k.reshape(B, S, num_heads, Dh).transpose(0, 2, 1, 3)
            v = v.reshape(B, S, num_heads, Dh).transpose(0, 2, 1, 3)
            s = jnp.einsum("bhqd,bhkd->bhqk", q, k) / np.sqrt(Dh)
            pr = jax.nn.softmax(s, axis=-1)
            av = jnp.einsum("bhqk,bhkd->bhqd", pr, v).transpose(0, 2, 1, 3).reshape(B, S, D)
            x = x + (av @ p["wo"] + p["bo"])
            x = _layernorm(x, p["lnf_w"], p["lnf_b"])
            x = x + (_gelu(x @ p["w1"] + p["b1"]) @ p["w2"] + p["b2"])
        return _layernorm(x, params["lnf_w"], params["lnf_b"])


# ---------------------------------------------------------------------------
if __name__ == "__main__":
    # Small but tile-aligned shapes: D multiple of 128 (lane dim), S multiple
    # of the row tiles so the multi-tile / reduction grid paths get exercised.
    B, NUM_MELS, D, NUM_HEADS, SEQ_LEN, NUM_BLOCKS = 2, 16, 128, 4, 64, 2

    key = jax.random.PRNGKey(0)
    k_x, k_p = jax.random.split(key)
    x = jax.random.normal(k_x, (B, NUM_MELS, SEQ_LEN), dtype=jnp.float32)
    params = init_params(k_p, NUM_MELS, D, SEQ_LEN, NUM_BLOCKS)

    fwd = jax.jit(functools.partial(
        audio_encoder_forward, num_heads=NUM_HEADS,
        block_t=32, block_s=32, block_q=32, block_kv=32, block_n=256))

    out = jax.block_until_ready(fwd(x, params))
    ref = jax.block_until_ready(ref_forward(x, params, NUM_HEADS))

    # bf16 matmul operands (f32 accumulation) vs an all-f32 reference
    np.testing.assert_allclose(np.asarray(out), np.asarray(ref), rtol=5e-2, atol=5e-2)

    print("KERNEL_OK")
</pallas_src>

<mosaic_0001>
module attributes {stable_mosaic.version = 11 : i64} {
  func.func @conv1d_gelu_kernel(%arg0: i32, %arg1: i32, %arg2: memref<1x32x48xbf16, #tpu.memory_space<vmem>>, %arg3: memref<48x128xbf16, #tpu.memory_space<vmem>>, %arg4: memref<1x128xf32, #tpu.memory_space<vmem>>, %arg5: memref<1x32x128xf32, #tpu.memory_space<vmem>>) attributes {dimension_semantics = [#tpu.dimension_semantics<parallel>, #tpu.dimension_semantics<parallel>], iteration_bounds = array<i64: 2, 2>, scalar_prefetch = 0 : i64, scratch_operands = 0 : i64, tpu.core_type = #tpu.core_type<tc>, window_params = [{transform_indices = @transform_0, window_bounds = array<i64: 1, 32, 48>}, {pipeline_mode = #tpu.pipeline_mode<synchronous>, transform_indices = @transform_1, window_bounds = array<i64: 48, 128>}, {pipeline_mode = #tpu.pipeline_mode<synchronous>, transform_indices = @transform_2, window_bounds = array<i64: 1, 128>}, {transform_indices = @transform_3, window_bounds = array<i64: 1, 32, 128>}]} {
    %c0 = arith.constant 0 : index
    %c0_0 = arith.constant 0 : index
    %c0_1 = arith.constant 0 : index
    %0 = vector.load %arg2[%c0, %c0_0, %c0_1] : memref<1x32x48xbf16, #tpu.memory_space<vmem>>, vector<1x32x48xbf16>
    %1 = vector.shape_cast %0 : vector<1x32x48xbf16> to vector<32x48xbf16>
    %c0_2 = arith.constant 0 : index
    %c0_3 = arith.constant 0 : index
    %2 = vector.load %arg3[%c0_2, %c0_3] : memref<48x128xbf16, #tpu.memory_space<vmem>>, vector<48x128xbf16>
    %cst = arith.constant dense<0.000000e+00> : vector<32x128xf32>
    %3 = tpu.matmul %1, %2, %cst {dimension_numbers = #tpu.dot_dimension_numbers<[1], [0], [0], [1], [0, 0, 1, 1], [], []>} : vector<32x48xbf16>, vector<48x128xbf16>, vector<32x128xf32> -> vector<32x128xf32>
    %c0_4 = arith.constant 0 : index
    %c0_5 = arith.constant 0 : index
    %4 = vector.load %arg4[%c0_4, %c0_5] : memref<1x128xf32, #tpu.memory_space<vmem>>, vector<1x128xf32>
    %5 = vector.broadcast %4 : vector<1x128xf32> to vector<32x128xf32>
    %6 = arith.addf %3, %5 : vector<32x128xf32>
    %cst_6 = arith.constant 5.000000e-01 : f32
    %7 = vector.broadcast %cst_6 : f32 to vector<32x128xf32>
    %8 = arith.mulf %7, %6 : vector<32x128xf32>
    %cst_7 = arith.constant 1.41421354 : f32
    %9 = vector.broadcast %cst_7 : f32 to vector<32x128xf32>
    %10 = arith.divf %6, %9 : vector<32x128xf32>
    %11 = math.erf %10 : vector<32x128xf32>
    %cst_8 = arith.constant 1.000000e+00 : f32
    %12 = vector.broadcast %cst_8 : f32 to vector<32x128xf32>
    %13 = arith.addf %12, %11 : vector<32x128xf32>
    %14 = arith.mulf %8, %13 : vector<32x128xf32>
    %c0_9 = arith.constant 0 : index
    %c0_10 = arith.constant 0 : index
    %c0_11 = arith.constant 0 : index
    %15 = vector.load %arg5[%c0_9, %c0_10, %c0_11] : memref<1x32x128xf32, #tpu.memory_space<vmem>>, vector<1x32x128xf32>
    %16 = vector.shape_cast %15 : vector<1x32x128xf32> to vector<32x128xf32>
    %17 = vector.shape_cast %14 : vector<32x128xf32> to vector<1x32x128xf32>
    tpu.vector_store %arg5[%c0_9, %c0_10, %c0_11], %17 {strides = array<i32>} : memref<1x32x128xf32, #tpu.memory_space<vmem>>, vector<1x32x128xf32>,
    return
  }
  func.func @transform_0(%arg0: i32, %arg1: i32) -> (i32, i32, i32) {
    %c0_i32 = arith.constant 0 : i32
    %c0_i32_0 = arith.constant 0 : i32
    return %arg0, %arg1, %c0_i32 : i32, i32, i32
  }
  func.func @transform_1(%arg0: i32, %arg1: i32) -> (i32, i32) {
    %c0_i32 = arith.constant 0 : i32
    %c0_i32_0 = arith.constant 0 : i32
    %c0_i32_1 = arith.constant 0 : i32
    return %c0_i32, %c0_i32_0 : i32, i32
  }
  func.func @transform_2(%arg0: i32, %arg1: i32) -> (i32, i32) {
    %c0_i32 = arith.constant 0 : i32
    %c0_i32_0 = arith.constant 0 : i32
    %c0_i32_1 = arith.constant 0 : i32
    return %c0_i32, %c0_i32_0 : i32, i32
  }
  func.func @transform_3(%arg0: i32, %arg1: i32) -> (i32, i32, i32) {
    %c0_i32 = arith.constant 0 : i32
    %c0_i32_0 = arith.constant 0 : i32
    return %arg0, %arg1, %c0_i32 : i32, i32, i32
  }
}

module attributes {stable_mosaic.version = 11 : i64} {
  func.func @conv1d_gelu_kernel(%arg0: i32, %arg1: i32, %arg2: memref<1x32x384xbf16, #tpu.memory_space<vmem>>, %arg3: memref<384x128xbf16, #tpu.memory_space<vmem>>, %arg4: memref<1x128xf32, #tpu.memory_space<vmem>>, %arg5: memref<32x128xf32, #tpu.memory_space<vmem>>, %arg6: memref<1x32x128xf32, #tpu.memory_space<vmem>>) attributes {dimension_semantics = [#tpu.dimension_semantics<parallel>, #tpu.dimension_semantics<parallel>], iteration_bounds = array<i64: 2, 2>, scalar_prefetch = 0 : i64, scratch_operands = 0 : i64, tpu.core_type = #tpu.core_type<tc>, window_params = [{transform_indices = @transform_0, window_bounds = array<i64: 1, 32, 384>}, {pipeline_mode = #tpu.pipeline_mode<synchronous>, transform_indices = @transform_1, window_bounds = array<i64: 384, 128>}, {pipeline_mode = #tpu.pipeline_mode<synchronous>, transform_indices = @transform_2, window_bounds = array<i64: 1, 128>}, {transform_indices = @transform_3, window_bounds = array<i64: 32, 128>}, {transform_indices = @transform_4, window_bounds = array<i64: 1, 32, 128>}]} {
    %c0 = arith.constant 0 : index
    %c0_0 = arith.constant 0 : index
    %c0_1 = arith.constant 0 : index
    %0 = vector.load %arg2[%c0, %c0_0, %c0_1] : memref<1x32x384xbf16, #tpu.memory_space<vmem>>, vector<1x32x384xbf16>
    %1 = vector.shape_cast %0 : vector<1x32x384xbf16> to vector<32x384xbf16>
    %c0_2 = arith.constant 0 : index
    %c0_3 = arith.constant 0 : index
    %2 = vector.load %arg3[%c0_2, %c0_3] : memref<384x128xbf16, #tpu.memory_space<vmem>>, vector<384x128xbf16>
    %cst = arith.constant dense<0.000000e+00> : vector<32x128xf32>
    %3 = tpu.matmul %1, %2, %cst {dimension_numbers = #tpu.dot_dimension_numbers<[1], [0], [0], [1], [0, 0, 1, 1], [], []>} : vector<32x384xbf16>, vector<384x128xbf16>, vector<32x128xf32> -> vector<32x128xf32>
    %c0_4 = arith.constant 0 : index
    %c0_5 = arith.constant 0 : index
    %4 = vector.load %arg4[%c0_4, %c0_5] : memref<1x128xf32, #tpu.memory_space<vmem>>, vector<1x128xf32>
    %5 = vector.broadcast %4 : vector<1x128xf32> to vector<32x128xf32>
    %6 = arith.addf %3, %5 : vector<32x128xf32>
    %cst_6 = arith.constant 5.000000e-01 : f32
    %7 = vector.broadcast %cst_6 : f32 to vector<32x128xf32>
    %8 = arith.mulf %7, %6 : vector<32x128xf32>
    %cst_7 = arith.constant 1.41421354 : f32
    %9 = vector.broadcast %cst_7 : f32 to vector<32x128xf32>
    %10 = arith.divf %6, %9 : vector<32x128xf32>
    %11 = math.erf %10 : vector<32x128xf32>
    %cst_8 = arith.constant 1.000000e+00 : f32
    %12 = vector.broadcast %cst_8 : f32 to vector<32x128xf32>
    %13 = arith.addf %12, %11 : vector<32x128xf32>
    %14 = arith.mulf %8, %13 : vector<32x128xf32>
    %c0_9 = arith.constant 0 : index
    %c0_10 = arith.constant 0 : index
    %15 = vector.load %arg5[%c0_9, %c0_10] : memref<32x128xf32, #tpu.memory_space<vmem>>, vector<32x128xf32>
    %16 = arith.addf %14, %15 : vector<32x128xf32>
    %c0_11 = arith.constant 0 : index
    %c0_12 = arith.constant 0 : index
    %c0_13 = arith.constant 0 : index
    %17 = vector.load %arg6[%c0_11, %c0_12, %c0_13] : memref<1x32x128xf32, #tpu.memory_space<vmem>>, vector<1x32x128xf32>
    %18 = vector.shape_cast %17 : vector<1x32x128xf32> to vector<32x128xf32>
    %19 = vector.shape_cast %16 : vector<32x128xf32> to vector<1x32x128xf32>
    tpu.vector_store %arg6[%c0_11, %c0_12, %c0_13], %19 {strides = array<i32>} : memref<1x32x128xf32, #tpu.memory_space<vmem>>, vector<1x32x128xf32>,
    return
  }
  func.func @transform_0(%arg0: i32, %arg1: i32) -> (i32, i32, i32) {
    %c0_i32 = arith.constant 0 : i32
    %c0_i32_0 = arith.constant 0 : i32
    return %arg0, %arg1, %c0_i32 : i32, i32, i32
  }
  func.func @transform_1(%arg0: i32, %arg1: i32) -> (i32, i32) {
    %c0_i32 = arith.constant 0 : i32
    %c0_i32_0 = arith.constant 0 : i32
    %c0_i32_1 = arith.constant 0 : i32
    return %c0_i32, %c0_i32_0 : i32, i32
  }
  func.func @transform_2(%arg0: i32, %arg1: i32) -> (i32, i32) {
    %c0_i32 = arith.constant 0 : i32
    %c0_i32_0 = arith.constant 0 : i32
    %c0_i32_1 = arith.constant 0 : i32
    return %c0_i32, %c0_i32_0 : i32, i32
  }
  func.func @transform_3(%arg0: i32, %arg1: i32) -> (i32, i32) {
    %c0_i32 = arith.constant 0 : i32
    %c0_i32_0 = arith.constant 0 : i32
    return %arg1, %c0_i32 : i32, i32
  }
  func.func @transform_4(%arg0: i32, %arg1: i32) -> (i32, i32, i32) {
    %c0_i32 = arith.constant 0 : i32
    %c0_i32_0 = arith.constant 0 : i32
    return %arg0, %arg1, %c0_i32 : i32, i32, i32
  }
}

module attributes {stable_mosaic.version = 11 : i64} {
  func.func @ln_qkv_kernel(%arg0: i32, %arg1: i32, %arg2: memref<1x32x128xf32, #tpu.memory_space<vmem>>, %arg3: memref<1x128xf32, #tpu.memory_space<vmem>>, %arg4: memref<1x128xf32, #tpu.memory_space<vmem>>, %arg5: memref<128x384xbf16, #tpu.memory_space<vmem>>, %arg6: memref<1x384xf32, #tpu.memory_space<vmem>>, %arg7: memref<1x4x32x32xbf16, #tpu.memory_space<vmem>>, %arg8: memref<1x4x32x32xbf16, #tpu.memory_space<vmem>>, %arg9: memref<1x4x32x32xbf16, #tpu.memory_space<vmem>>) attributes {dimension_semantics = [#tpu.dimension_semantics<parallel>, #tpu.dimension_semantics<parallel>], iteration_bounds = array<i64: 2, 2>, scalar_prefetch = 0 : i64, scratch_operands = 0 : i64, tpu.core_type = #tpu.core_type<tc>, window_params = [{transform_indices = @transform_0, window_bounds = array<i64: 1, 32, 128>}, {pipeline_mode = #tpu.pipeline_mode<synchronous>, transform_indices = @transform_1, window_bounds = array<i64: 1, 128>}, {pipeline_mode = #tpu.pipeline_mode<synchronous>, transform_indices = @transform_2, window_bounds = array<i64: 1, 128>}, {pipeline_mode = #tpu.pipeline_mode<synchronous>, transform_indices = @transform_3, window_bounds = array<i64: 128, 384>}, {pipeline_mode = #tpu.pipeline_mode<synchronous>, transform_indices = @transform_4, window_bounds = array<i64: 1, 384>}, {transform_indices = @transform_5, window_bounds = array<i64: 1, 4, 32, 32>}, {transform_indices = @transform_6, window_bounds = array<i64: 1, 4, 32, 32>}, {transform_indices = @transform_7, window_bounds = array<i64: 1, 4, 32, 32>}]} {
    %c0 = arith.constant 0 : index
    %c0_0 = arith.constant 0 : index
    %c0_1 = arith.constant 0 : index
    %0 = vector.load %arg2[%c0, %c0_0, %c0_1] : memref<1x32x128xf32, #tpu.memory_space<vmem>>, vector<1x32x128xf32>
    %1 = vector.shape_cast %0 : vector<1x32x128xf32> to vector<32x128xf32>
    %c0_2 = arith.constant 0 : index
    %c0_3 = arith.constant 0 : index
    %2 = vector.load %arg3[%c0_2, %c0_3] : memref<1x128xf32, #tpu.memory_space<vmem>>, vector<1x128xf32>
    %c0_4 = arith.constant 0 : index
    %c0_5 = arith.constant 0 : index
    %3 = vector.load %arg4[%c0_4, %c0_5] : memref<1x128xf32, #tpu.memory_space<vmem>>, vector<1x128xf32>
    %cst = arith.constant dense<0.000000e+00> : vector<32xf32>
    %4 = vector.multi_reduction <add>, %1, %cst [1] : vector<32x128xf32> to vector<32xf32>
    %5 = vector.shape_cast %4 : vector<32xf32> to vector<32x1xf32>
    %cst_6 = arith.constant 1.280000e+02 : f32
    %6 = vector.broadcast %cst_6 : f32 to vector<32x1xf32>
    %7 = arith.divf %5, %6 : vector<32x1xf32>
    %8 = vector.broadcast %7 : vector<32x1xf32> to vector<32x128xf32>
    %9 = arith.subf %1, %8 : vector<32x128xf32>
    %10 = arith.mulf %9, %9 : vector<32x128xf32>
    %cst_7 = arith.constant dense<0.000000e+00> : vector<32xf32>
    %11 = vector.multi_reduction <add>, %10, %cst_7 [1] : vector<32x128xf32> to vector<32xf32>
    %12 = vector.shape_cast %11 : vector<32xf32> to vector<32x1xf32>
    %cst_8 = arith.constant 1.280000e+02 : f32
    %13 = vector.broadcast %cst_8 : f32 to vector<32x1xf32>
    %14 = arith.divf %12, %13 : vector<32x1xf32>
    %15 = vector.broadcast %7 : vector<32x1xf32> to vector<32x128xf32>
    %16 = arith.subf %1, %15 : vector<32x128xf32>
    %cst_9 = arith.constant 9.99999974E-6 : f32
    %17 = vector.broadcast %cst_9 : f32 to vector<32x1xf32>
    %18 = arith.addf %14, %17 : vector<32x1xf32>
    %19 = math.rsqrt %18 : vector<32x1xf32>
    %20 = vector.broadcast %19 : vector<32x1xf32> to vector<32x128xf32>
    %21 = arith.mulf %16, %20 : vector<32x128xf32>
    %22 = vector.broadcast %2 : vector<1x128xf32> to vector<32x128xf32>
    %23 = arith.mulf %21, %22 : vector<32x128xf32>
    %24 = vector.broadcast %3 : vector<1x128xf32> to vector<32x128xf32>
    %25 = arith.addf %23, %24 : vector<32x128xf32>
    %26 = arith.truncf %25 : vector<32x128xf32> to vector<32x128xbf16>
    %c0_10 = arith.constant 0 : index
    %c0_11 = arith.constant 0 : index
    %27 = vector.load %arg5[%c0_10, %c0_11] : memref<128x384xbf16, #tpu.memory_space<vmem>>, vector<128x384xbf16>
    %cst_12 = arith.constant dense<0.000000e+00> : vector<32x384xf32>
    %28 = tpu.matmul %26, %27, %cst_12 {dimension_numbers = #tpu.dot_dimension_numbers<[1], [0], [0], [1], [0, 0, 1, 1], [], []>} : vector<32x128xbf16>, vector<128x384xbf16>, vector<32x384xf32> -> vector<32x384xf32>
    %c0_13 = arith.constant 0 : index
    %c0_14 = arith.constant 0 : index
    %29 = vector.load %arg6[%c0_13, %c0_14] : memref<1x384xf32, #tpu.memory_space<vmem>>, vector<1x384xf32>
    %30 = vector.broadcast %29 : vector<1x384xf32> to vector<32x384xf32>
    %31 = arith.addf %28, %30 : vector<32x384xf32>
    %32 = arith.truncf %31 : vector<32x384xf32> to vector<32x384xbf16>
    %33 = vector.extract_strided_slice %32 {offsets = [0, 0], sizes = [32, 32], strides = [1, 1]} : vector<32x384xbf16> to vector<32x32xbf16>
    %c0_15 = arith.constant 0 : index
    %c0_16 = arith.constant 0 : index
    %c0_17 = arith.constant 0 : index
    %c0_18 = arith.constant 0 : index
    %34 = vector.load %arg7[%c0_15, %c0_16, %c0_17, %c0_18] : memref<1x4x32x32xbf16, #tpu.memory_space<vmem>>, vector<1x1x32x32xbf16>
    %35 = vector.shape_cast %34 : vector<1x1x32x32xbf16> to vector<32x32xbf16>
    %36 = vector.shape_cast %33 : vector<32x32xbf16> to vector<1x1x32x32xbf16>
    tpu.vector_store %arg7[%c0_15, %c0_16, %c0_17, %c0_18], %36 {strides = array<i32>} : memref<1x4x32x32xbf16, #tpu.memory_space<vmem>>, vector<1x1x32x32xbf16>,
    %37 = vector.extract_strided_slice %32 {offsets = [0, 128], sizes = [32, 32], strides = [1, 1]} : vector<32x384xbf16> to vector<32x32xbf16>
    %c0_19 = arith.constant 0 : index
    %c0_20 = arith.constant 0 : index
    %c0_21 = arith.constant 0 : index
    %c0_22 = arith.constant 0 : index
    %38 = vector.load %arg8[%c0_19, %c0_20, %c0_21, %c0_22] : memref<1x4x32x32xbf16, #tpu.memory_space<vmem>>, vector<1x1x32x32xbf16>
    %39 = vector.shape_cast %38 : vector<1x1x32x32xbf16> to vector<32x32xbf16>
    %40 = vector.shape_cast %37 : vector<32x32xbf16> to vector<1x1x32x32xbf16>
    tpu.vector_store %arg8[%c0_19, %c0_20, %c0_21, %c0_22], %40 {strides = array<i32>} : memref<1x4x32x32xbf16, #tpu.memory_space<vmem>>, vector<1x1x32x32xbf16>,
    %41 = vector.extract_strided_slice %32 {offsets = [0, 256], sizes = [32, 32], strides = [1, 1]} : vector<32x384xbf16> to vector<32x32xbf16>
    %c0_23 = arith.constant 0 : index
    %c0_24 = arith.constant 0 : index
    %c0_25 = arith.constant 0 : index
    %c0_26 = arith.constant 0 : index
    %42 = vector.load %arg9[%c0_23, %c0_24, %c0_25, %c0_26] : memref<1x4x32x32xbf16, #tpu.memory_space<vmem>>, vector<1x1x32x32xbf16>
    %43 = vector.shape_cast %42 : vector<1x1x32x32xbf16> to vector<32x32xbf16>
    %44 = vector.shape_cast %41 : vector<32x32xbf16> to vector<1x1x32x32xbf16>
    tpu.vector_store %arg9[%c0_23, %c0_24, %c0_25, %c0_26], %44 {strides = array<i32>} : memref<1x4x32x32xbf16, #tpu.memory_space<vmem>>, vector<1x1x32x32xbf16>,
    %45 = vector.extract_strided_slice %32 {offsets = [0, 32], sizes = [32, 32], strides = [1, 1]} : vector<32x384xbf16> to vector<32x32xbf16>
    %c0_27 = arith.constant 0 : index
    %c1 = arith.constant 1 : index
    %c0_28 = arith.constant 0 : index
    %c0_29 = arith.constant 0 : index
    %46 = vector.load %arg7[%c0_27, %c1, %c0_28, %c0_29] : memref<1x4x32x32xbf16, #tpu.memory_space<vmem>>, vector<1x1x32x32xbf16>
    %47 = vector.shape_cast %46 : vector<1x1x32x32xbf16> to vector<32x32xbf16>
    %48 = vector.shape_cast %45 : vector<32x32xbf16> to vector<1x1x32x32xbf16>
    tpu.vector_store %arg7[%c0_27, %c1, %c0_28, %c0_29], %48 {strides = array<i32>} : memref<1x4x32x32xbf16, #tpu.memory_space<vmem>>, vector<1x1x32x32xbf16>,
    %49 = vector.extract_strided_slice %32 {offsets = [0, 160], sizes = [32, 32], strides = [1, 1]} : vector<32x384xbf16> to vector<32x32xbf16>
    %c0_30 = arith.constant 0 : index
    %c1_31 = arith.constant 1 : index
    %c0_32 = arith.constant 0 : index
    %c0_33 = arith.constant 0 : index
    %50 = vector.load %arg8[%c0_30, %c1_31, %c0_32, %c0_33] : memref<1x4x32x32xbf16, #tpu.memory_space<vmem>>, vector<1x1x32x32xbf16>
    %51 = vector.shape_cast %50 : vector<1x1x32x32xbf16> to vector<32x32xbf16>
    %52 = vector.shape_cast %49 : vector<32x32xbf16> to vector<1x1x32x32xbf16>
    tpu.vector_store %arg8[%c0_30, %c1_31, %c0_32, %c0_33], %52 {strides = array<i32>} : memref<1x4x32x32xbf16, #tpu.memory_space<vmem>>, vector<1x1x32x32xbf16>,
    %53 = vector.extract_strided_slice %32 {offsets = [0, 288], sizes = [32, 32], strides = [1, 1]} : vector<32x384xbf16> to vector<32x32xbf16>
    %c0_34 = arith.constant 0 : index
    %c1_35 = arith.constant 1 : index
    %c0_36 = arith.constant 0 : index
    %c0_37 = arith.constant 0 : index
    %54 = vector.load %arg9[%c0_34, %c1_35, %c0_36, %c0_37] : memref<1x4x32x32xbf16, #tpu.memory_space<vmem>>, vector<1x1x32x32xbf16>
    %55 = vector.shape_cast %54 : vector<1x1x32x32xbf16> to vector<32x32xbf16>
    %56 = vector.shape_cast %53 : vector<32x32xbf16> to vector<1x1x32x32xbf16>
    tpu.vector_store %arg9[%c0_34, %c1_35, %c0_36, %c0_37], %56 {strides = array<i32>} : memref<1x4x32x32xbf16, #tpu.memory_space<vmem>>, vector<1x1x32x32xbf16>,
    %57 = vector.extract_strided_slice %32 {offsets = [0, 64], sizes = [32, 32], strides = [1, 1]} : vector<32x384xbf16> to vector<32x32xbf16>
    %c0_38 = arith.constant 0 : index
    %c2 = arith.constant 2 : index
    %c0_39 = arith.constant 0 : index
    %c0_40 = arith.constant 0 : index
    %58 = vector.load %arg7[%c0_38, %c2, %c0_39, %c0_40] : memref<1x4x32x32xbf16, #tpu.memory_space<vmem>>, vector<1x1x32x32xbf16>
    %59 = vector.shape_cast %58 : vector<1x1x32x32xbf16> to vector<32x32xbf16>
    %60 = vector.shape_cast %57 : vector<32x32xbf16> to vector<1x1x32x32xbf16>
    tpu.vector_store %arg7[%c0_38, %c2, %c0_39, %c0_40], %60 {strides = array<i32>} : memref<1x4x32x32xbf16, #tpu.memory_space<vmem>>, vector<1x1x32x32xbf16>,
    %61 = vector.extract_strided_slice %32 {offsets = [0, 192], sizes = [32, 32], strides = [1, 1]} : vector<32x384xbf16> to vector<32x32xbf16>
    %c0_41 = arith.constant 0 : index
    %c2_42 = arith.constant 2 : index
    %c0_43 = arith.constant 0 : index
    %c0_44 = arith.constant 0 : index
    %62 = vector.load %arg8[%c0_41, %c2_42, %c0_43, %c0_44] : memref<1x4x32x32xbf16, #tpu.memory_space<vmem>>, vector<1x1x32x32xbf16>
    %63 = vector.shape_cast %62 : vector<1x1x32x32xbf16> to vector<32x32xbf16>
    %64 = vector.shape_cast %61 : vector<32x32xbf16> to vector<1x1x32x32xbf16>
    tpu.vector_store %arg8[%c0_41, %c2_42, %c0_43, %c0_44], %64 {strides = array<i32>} : memref<1x4x32x32xbf16, #tpu.memory_space<vmem>>, vector<1x1x32x32xbf16>,
    %65 = vector.extract_strided_slice %32 {offsets = [0, 320], sizes = [32, 32], strides = [1, 1]} : vector<32x384xbf16> to vector<32x32xbf16>
    %c0_45 = arith.constant 0 : index
    %c2_46 = arith.constant 2 : index
    %c0_47 = arith.constant 0 : index
    %c0_48 = arith.constant 0 : index
    %66 = vector.load %arg9[%c0_45, %c2_46, %c0_47, %c0_48] : memref<1x4x32x32xbf16, #tpu.memory_space<vmem>>, vector<1x1x32x32xbf16>
    %67 = vector.shape_cast %66 : vector<1x1x32x32xbf16> to vector<32x32xbf16>
    %68 = vector.shape_cast %65 : vector<32x32xbf16> to vector<1x1x32x32xbf16>
    tpu.vector_store %arg9[%c0_45, %c2_46, %c0_47, %c0_48], %68 {strides = array<i32>} : memref<1x4x32x32xbf16, #tpu.memory_space<vmem>>, vector<1x1x32x32xbf16>,
    %69 = vector.extract_strided_slice %32 {offsets = [0, 96], sizes = [32, 32], strides = [1, 1]} : vector<32x384xbf16> to vector<32x32xbf16>
    %c0_49 = arith.constant 0 : index
    %c3 = arith.constant 3 : index
    %c0_50 = arith.constant 0 : index
    %c0_51 = arith.constant 0 : index
    %70 = vector.load %arg7[%c0_49, %c3, %c0_50, %c0_51] : memref<1x4x32x32xbf16, #tpu.memory_space<vmem>>, vector<1x1x32x32xbf16>
    %71 = vector.shape_cast %70 : vector<1x1x32x32xbf16> to vector<32x32xbf16>
    %72 = vector.shape_cast %69 : vector<32x32xbf16> to vector<1x1x32x32xbf16>
    tpu.vector_store %arg7[%c0_49, %c3, %c0_50, %c0_51], %72 {strides = array<i32>} : memref<1x4x32x32xbf16, #tpu.memory_space<vmem>>, vector<1x1x32x32xbf16>,
    %73 = vector.extract_strided_slice %32 {offsets = [0, 224], sizes = [32, 32], strides = [1, 1]} : vector<32x384xbf16> to vector<32x32xbf16>
    %c0_52 = arith.constant 0 : index
    %c3_53 = arith.constant 3 : index
    %c0_54 = arith.constant 0 : index
    %c0_55 = arith.constant 0 : index
    %74 = vector.load %arg8[%c0_52, %c3_53, %c0_54, %c0_55] : memref<1x4x32x32xbf16, #tpu.memory_space<vmem>>, vector<1x1x32x32xbf16>
    %75 = vector.shape_cast %74 : vector<1x1x32x32xbf16> to vector<32x32xbf16>
    %76 = vector.shape_cast %73 : vector<32x32xbf16> to vector<1x1x32x32xbf16>
    tpu.vector_store %arg8[%c0_52, %c3_53, %c0_54, %c0_55], %76 {strides = array<i32>} : memref<1x4x32x32xbf16, #tpu.memory_space<vmem>>, vector<1x1x32x32xbf16>,
    %77 = vector.extract_strided_slice %32 {offsets = [0, 352], sizes = [32, 32], strides = [1, 1]} : vector<32x384xbf16> to vector<32x32xbf16>
    %c0_56 = arith.constant 0 : index
    %c3_57 = arith.constant 3 : index
    %c0_58 = arith.constant 0 : index
    %c0_59 = arith.constant 0 : index
    %78 = vector.load %arg9[%c0_56, %c3_57, %c0_58, %c0_59] : memref<1x4x32x32xbf16, #tpu.memory_space<vmem>>, vector<1x1x32x32xbf16>
    %79 = vector.shape_cast %78 : vector<1x1x32x32xbf16> to vector<32x32xbf16>
    %80 = vector.shape_cast %77 : vector<32x32xbf16> to vector<1x1x32x32xbf16>
    tpu.vector_store %arg9[%c0_56, %c3_57, %c0_58, %c0_59], %80 {strides = array<i32>} : memref<1x4x32x32xbf16, #tpu.memory_space<vmem>>, vector<1x1x32x32xbf16>,
    return
  }
  func.func @transform_0(%arg0: i32, %arg1: i32) -> (i32, i32, i32) {
    %c0_i32 = arith.constant 0 : i32
    %c0_i32_0 = arith.constant 0 : i32
    return %arg0, %arg1, %c0_i32 : i32, i32, i32
  }
  func.func @transform_1(%arg0: i32, %arg1: i32) -> (i32, i32) {
    %c0_i32 = arith.constant 0 : i32
    %c0_i32_0 = arith.constant 0 : i32
    %c0_i32_1 = arith.constant 0 : i32
    return %c0_i32, %c0_i32_0 : i32, i32
  }
  func.func @transform_2(%arg0: i32, %arg1: i32) -> (i32, i32) {
    %c0_i32 = arith.constant 0 : i32
    %c0_i32_0 = arith.constant 0 : i32
    %c0_i32_1 = arith.constant 0 : i32
    return %c0_i32, %c0_i32_0 : i32, i32
  }
  func.func @transform_3(%arg0: i32, %arg1: i32) -> (i32, i32) {
    %c0_i32 = arith.constant 0 : i32
    %c0_i32_0 = arith.constant 0 : i32
    %c0_i32_1 = arith.constant 0 : i32
    return %c0_i32, %c0_i32_0 : i32, i32
  }
  func.func @transform_4(%arg0: i32, %arg1: i32) -> (i32, i32) {
    %c0_i32 = arith.constant 0 : i32
    %c0_i32_0 = arith.constant 0 : i32
    %c0_i32_1 = arith.constant 0 : i32
    return %c0_i32, %c0_i32_0 : i32, i32
  }
  func.func @transform_5(%arg0: i32, %arg1: i32) -> (i32, i32, i32, i32) {
    %c0_i32 = arith.constant 0 : i32
    %c0_i32_0 = arith.constant 0 : i32
    %c0_i32_1 = arith.constant 0 : i32
    return %arg0, %c0_i32, %arg1, %c0_i32_0 : i32, i32, i32, i32
  }
  func.func @transform_6(%arg0: i32, %arg1: i32) -> (i32, i32, i32, i32) {
    %c0_i32 = arith.constant 0 : i32
    %c0_i32_0 = arith.constant 0 : i32
    %c0_i32_1 = arith.constant 0 : i32
    return %arg0, %c0_i32, %arg1, %c0_i32_0 : i32, i32, i32, i32
  }
  func.func @transform_7(%arg0: i32, %arg1: i32) -> (i32, i32, i32, i32) {
    %c0_i32 = arith.constant 0 : i32
    %c0_i32_0 = arith.constant 0 : i32
    %c0_i32_1 = arith.constant 0 : i32
    return %arg0, %c0_i32, %arg1, %c0_i32_0 : i32, i32, i32, i32
  }
}

module attributes {stable_mosaic.version = 11 : i64} {
  func.func @flash_attn_kernel(%arg0: i32, %arg1: i32, %arg2: i32, %arg3: memref<1x4x32x32xbf16, #tpu.memory_space<vmem>>, %arg4: memref<1x4x32x32xbf16, #tpu.memory_space<vmem>>, %arg5: memref<1x4x32x32xbf16, #tpu.memory_space<vmem>>, %arg6: memref<1x4x32x32xbf16, #tpu.memory_space<vmem>>, %arg7: memref<4x32x1xf32, #tpu.memory_space<vmem>>, %arg8: memref<4x32x1xf32, #tpu.memory_space<vmem>>, %arg9: memref<4x32x32xf32, #tpu.memory_space<vmem>>) attributes {dimension_semantics = [#tpu.dimension_semantics<parallel>, #tpu.dimension_semantics<parallel>, #tpu.dimension_semantics<arbitrary>], iteration_bounds = array<i64: 2, 2, 2>, scalar_prefetch = 0 : i64, scratch_operands = 3 : i64, tpu.core_type = #tpu.core_type<tc>, window_params = [{transform_indices = @transform_0, window_bounds = array<i64: 1, 4, 32, 32>}, {transform_indices = @transform_1, window_bounds = array<i64: 1, 4, 32, 32>}, {transform_indices = @transform_2, window_bounds = array<i64: 1, 4, 32, 32>}, {transform_indices = @transform_3, window_bounds = array<i64: 1, 4, 32, 32>}]} {
    %c0_i32 = arith.constant 0 : i32
    %0 = arith.cmpi eq, %arg2, %c0_i32 : i32
    %1 = arith.extui %0 : i1 to i32
    %c0_i32_0 = arith.constant 0 : i32
    %2 = arith.cmpi ne, %1, %c0_i32_0 : i32
    scf.if %2 {
      %cst_34 = arith.constant 0xFF800000 : f32
      %36 = vector.broadcast %cst_34 : f32 to vector<4x32x1xf32>
      %c0_35 = arith.constant 0 : index
      %c0_36 = arith.constant 0 : index
      %c0_37 = arith.constant 0 : index
      %37 = vector.load %arg7[%c0_35, %c0_36, %c0_37] : memref<4x32x1xf32, #tpu.memory_space<vmem>>, vector<4x32x1xf32>
      tpu.vector_store %arg7[%c0_35, %c0_36, %c0_37], %36 {strides = array<i32>} : memref<4x32x1xf32, #tpu.memory_space<vmem>>, vector<4x32x1xf32>,
      %cst_38 = arith.constant 0.000000e+00 : f32
      %38 = vector.broadcast %cst_38 : f32 to vector<4x32x1xf32>
      %c0_39 = arith.constant 0 : index
      %c0_40 = arith.constant 0 : index
      %c0_41 = arith.constant 0 : index
      %39 = vector.load %arg8[%c0_39, %c0_40, %c0_41] : memref<4x32x1xf32, #tpu.memory_space<vmem>>, vector<4x32x1xf32>
      tpu.vector_store %arg8[%c0_39, %c0_40, %c0_41], %38 {strides = array<i32>} : memref<4x32x1xf32, #tpu.memory_space<vmem>>, vector<4x32x1xf32>,
      %cst_42 = arith.constant 0.000000e+00 : f32
      %40 = vector.broadcast %cst_42 : f32 to vector<4x32x32xf32>
      %c0_43 = arith.constant 0 : index
      %c0_44 = arith.constant 0 : index
      %c0_45 = arith.constant 0 : index
      %41 = vector.load %arg9[%c0_43, %c0_44, %c0_45] : memref<4x32x32xf32, #tpu.memory_space<vmem>>, vector<4x32x32xf32>
      tpu.vector_store %arg9[%c0_43, %c0_44, %c0_45], %40 {strides = array<i32>} : memref<4x32x32xf32, #tpu.memory_space<vmem>>, vector<4x32x32xf32>,
    } else {
    }
    %c0 = arith.constant 0 : index
    %c0_1 = arith.constant 0 : index
    %c0_2 = arith.constant 0 : index
    %c0_3 = arith.constant 0 : index
    %3 = vector.load %arg3[%c0, %c0_1, %c0_2, %c0_3] : memref<1x4x32x32xbf16, #tpu.memory_space<vmem>>, vector<1x4x32x32xbf16>
    %4 = vector.shape_cast %3 : vector<1x4x32x32xbf16> to vector<4x32x32xbf16>
    %c0_4 = arith.constant 0 : index
    %c0_5 = arith.constant 0 : index
    %c0_6 = arith.constant 0 : index
    %c0_7 = arith.constant 0 : index
    %5 = vector.load %arg4[%c0_4, %c0_5, %c0_6, %c0_7] : memref<1x4x32x32xbf16, #tpu.memory_space<vmem>>, vector<1x4x32x32xbf16>
    %6 = vector.shape_cast %5 : vector<1x4x32x32xbf16> to vector<4x32x32xbf16>
    %c0_8 = arith.constant 0 : index
    %c0_9 = arith.constant 0 : index
    %c0_10 = arith.constant 0 : index
    %c0_11 = arith.constant 0 : index
    %7 = vector.load %arg5[%c0_8, %c0_9, %c0_10, %c0_11] : memref<1x4x32x32xbf16, #tpu.memory_space<vmem>>, vector<1x4x32x32xbf16>
    %8 = vector.shape_cast %7 : vector<1x4x32x32xbf16> to vector<4x32x32xbf16>
    "tpu.trace_start"() <{level = 10 : i32, message = "hqd,hkd->hqk"}> : () -> ()
    %cst = arith.constant dense<0.000000e+00> : vector<4x32x32xf32>
    %9 = tpu.matmul %4, %6, %cst {dimension_numbers = #tpu.dot_dimension_numbers<[2], [2], [1], [1], [0, 0, 0, 1, 1, 1], [0], [0]>} : vector<4x32x32xbf16>, vector<4x32x32xbf16>, vector<4x32x32xf32> -> vector<4x32x32xf32>
    "tpu.trace_stop"() : () -> ()
    %c0_12 = arith.constant 0 : index
    %c0_13 = arith.constant 0 : index
    %c0_14 = arith.constant 0 : index
    %10 = vector.load %arg7[%c0_12, %c0_13, %c0_14] : memref<4x32x1xf32, #tpu.memory_space<vmem>>, vector<4x32x1xf32>
    %cst_15 = arith.constant dense<0xFF800000> : vector<4x32xf32>
    %11 = vector.multi_reduction <maximumf>, %9, %cst_15 [2] : vector<4x32x32xf32> to vector<4x32xf32>
    %12 = vector.shape_cast %11 : vector<4x32xf32> to vector<4x32x1xf32>
    %13 = arith.maximumf %10, %12 : vector<4x32x1xf32>
    %14 = arith.subf %10, %13 : vector<4x32x1xf32>
    %15 = math.exp %14 : vector<4x32x1xf32>
    %16 = vector.broadcast %13 : vector<4x32x1xf32> to vector<4x32x32xf32>
    %17 = arith.subf %9, %16 : vector<4x32x32xf32>
    %18 = math.exp %17 : vector<4x32x32xf32>
    %c0_16 = arith.constant 0 : index
    %c0_17 = arith.constant 0 : index
    %c0_18 = arith.constant 0 : index
    %19 = vector.load %arg8[%c0_16, %c0_17, %c0_18] : memref<4x32x1xf32, #tpu.memory_space<vmem>>, vector<4x32x1xf32>
    %20 = arith.mulf %15, %19 : vector<4x32x1xf32>
    %cst_19 = arith.constant dense<0.000000e+00> : vector<4x32xf32>
    %21 = vector.multi_reduction <add>, %18, %cst_19 [2] : vector<4x32x32xf32> to vector<4x32xf32>
    %22 = vector.shape_cast %21 : vector<4x32xf32> to vector<4x32x1xf32>
    %23 = arith.addf %20, %22 : vector<4x32x1xf32>
    %c0_20 = arith.constant 0 : index
    %c0_21 = arith.constant 0 : index
    %c0_22 = arith.constant 0 : index
    %24 = vector.load %arg8[%c0_20, %c0_21, %c0_22] : memref<4x32x1xf32, #tpu.memory_space<vmem>>, vector<4x32x1xf32>
    tpu.vector_store %arg8[%c0_20, %c0_21, %c0_22], %23 {strides = array<i32>} : memref<4x32x1xf32, #tpu.memory_space<vmem>>, vector<4x32x1xf32>,
    %c0_23 = arith.constant 0 : index
    %c0_24 = arith.constant 0 : index
    %c0_25 = arith.constant 0 : index
    %25 = vector.load %arg9[%c0_23, %c0_24, %c0_25] : memref<4x32x32xf32, #tpu.memory_space<vmem>>, vector<4x32x32xf32>
    %26 = vector.broadcast %15 : vector<4x32x1xf32> to vector<4x32x32xf32>
    %27 = arith.mulf %26, %25 : vector<4x32x32xf32>
    %28 = arith.truncf %18 : vector<4x32x32xf32> to vector<4x32x32xbf16>
    "tpu.trace_start"() <{level = 10 : i32, message = "hqk,hkd->hqd"}> : () -> ()
    %cst_26 = arith.constant dense<0.000000e+00> : vector<4x32x32xf32>
    %29 = tpu.matmul %28, %8, %cst_26 {dimension_numbers = #tpu.dot_dimension_numbers<[2], [1], [1], [2], [0, 0, 0, 1, 1, 2], [0], [0]>} : vector<4x32x32xbf16>, vector<4x32x32xbf16>, vector<4x32x32xf32> -> vector<4x32x32xf32>
    "tpu.trace_stop"() : () -> ()
    %30 = arith.addf %27, %29 : vector<4x32x32xf32>
    %c0_27 = arith.constant 0 : index
    %c0_28 = arith.constant 0 : index
    %c0_29 = arith.constant 0 : index
    %31 = vector.load %arg9[%c0_27, %c0_28, %c0_29] : memref<4x32x32xf32, #tpu.memory_space<vmem>>, vector<4x32x32xf32>
    tpu.vector_store %arg9[%c0_27, %c0_28, %c0_29], %30 {strides = array<i32>} : memref<4x32x32xf32, #tpu.memory_space<vmem>>, vector<4x32x32xf32>,
    %c0_30 = arith.constant 0 : index
    %c0_31 = arith.constant 0 : index
    %c0_32 = arith.constant 0 : index
    %32 = vector.load %arg7[%c0_30, %c0_31, %c0_32] : memref<4x32x1xf32, #tpu.memory_space<vmem>>, vector<4x32x1xf32>
    tpu.vector_store %arg7[%c0_30, %c0_31, %c0_32], %13 {strides = array<i32>} : memref<4x32x1xf32, #tpu.memory_space<vmem>>, vector<4x32x1xf32>,
    %c1_i32 = arith.constant 1 : i32
    %33 = arith.cmpi eq, %arg2, %c1_i32 : i32
    %34 = arith.extui %33 : i1 to i32
    %c0_i32_33 = arith.constant 0 : i32
    %35 = arith.cmpi ne, %34, %c0_i32_33 : i32
    scf.if %35 {
      %c0_34 = arith.constant 0 : index
      %c0_35 = arith.constant 0 : index
      %c0_36 = arith.constant 0 : index
      %36 = vector.load %arg8[%c0_34, %c0_35, %c0_36] : memref<4x32x1xf32, #tpu.memory_space<vmem>>, vector<4x32x1xf32>
      %37 = tpu.reciprocal %36 {approx = true} : vector<4x32x1xf32> -> vector<4x32x1xf32>
      %c0_37 = arith.constant 0 : index
      %c0_38 = arith.constant 0 : index
      %c0_39 = arith.constant 0 : index
      %38 = vector.load %arg9[%c0_37, %c0_38, %c0_39] : memref<4x32x32xf32, #tpu.memory_space<vmem>>, vector<4x32x32xf32>
      %39 = vector.broadcast %37 : vector<4x32x1xf32> to vector<4x32x32xf32>
      %40 = arith.mulf %38, %39 : vector<4x32x32xf32>
      %41 = arith.truncf %40 : vector<4x32x32xf32> to vector<4x32x32xbf16>
      %c0_40 = arith.constant 0 : index
      %c0_41 = arith.constant 0 : index
      %c0_42 = arith.constant 0 : index
      %c0_43 = arith.constant 0 : index
      %42 = vector.load %arg6[%c0_40, %c0_41, %c0_42, %c0_43] : memref<1x4x32x32xbf16, #tpu.memory_space<vmem>>, vector<1x4x32x32xbf16>
      %43 = vector.shape_cast %42 : vector<1x4x32x32xbf16> to vector<4x32x32xbf16>
      %44 = vector.shape_cast %41 : vector<4x32x32xbf16> to vector<1x4x32x32xbf16>
      tpu.vector_store %arg6[%c0_40, %c0_41, %c0_42, %c0_43], %44 {strides = array<i32>} : memref<1x4x32x32xbf16, #tpu.memory_space<vmem>>, vector<1x4x32x32xbf16>,
    } else {
    }
    return
  }
  func.func @transform_0(%arg0: i32, %arg1: i32, %arg2: i32) -> (i32, i32, i32, i32) {
    %c0_i32 = arith.constant 0 : i32
    %c0_i32_0 = arith.constant 0 : i32
    %c0_i32_1 = arith.constant 0 : i32
    return %arg0, %c0_i32, %arg1, %c0_i32_0 : i32, i32, i32, i32
  }
  func.func @transform_1(%arg0: i32, %arg1: i32, %arg2: i32) -> (i32, i32, i32, i32) {
    %c0_i32 = arith.constant 0 : i32
    %c0_i32_0 = arith.constant 0 : i32
    %c0_i32_1 = arith.constant 0 : i32
    return %arg0, %c0_i32, %arg2, %c0_i32_0 : i32, i32, i32, i32
  }
  func.func @transform_2(%arg0: i32, %arg1: i32, %arg2: i32) -> (i32, i32, i32, i32) {
    %c0_i32 = arith.constant 0 : i32
    %c0_i32_0 = arith.constant 0 : i32
    %c0_i32_1 = arith.constant 0 : i32
    return %arg0, %c0_i32, %arg2, %c0_i32_0 : i32, i32, i32, i32
  }
  func.func @transform_3(%arg0: i32, %arg1: i32, %arg2: i32) -> (i32, i32, i32, i32) {
    %c0_i32 = arith.constant 0 : i32
    %c0_i32_0 = arith.constant 0 : i32
    %c0_i32_1 = arith.constant 0 : i32
    return %arg0, %c0_i32, %arg1, %c0_i32_0 : i32, i32, i32, i32
  }
}

module attributes {stable_mosaic.version = 11 : i64} {
  func.func @layernorm_kernel(%arg0: i32, %arg1: i32, %arg2: memref<1x32x128xf32, #tpu.memory_space<vmem>>, %arg3: memref<1x128xf32, #tpu.memory_space<vmem>>, %arg4: memref<1x128xf32, #tpu.memory_space<vmem>>, %arg5: memref<1x32x128xf32, #tpu.memory_space<vmem>>) attributes {dimension_semantics = [#tpu.dimension_semantics<parallel>, #tpu.dimension_semantics<parallel>], iteration_bounds = array<i64: 2, 2>, scalar_prefetch = 0 : i64, scratch_operands = 0 : i64, tpu.core_type = #tpu.core_type<tc>, window_params = [{transform_indices = @transform_0, window_bounds = array<i64: 1, 32, 128>}, {pipeline_mode = #tpu.pipeline_mode<synchronous>, transform_indices = @transform_1, window_bounds = array<i64: 1, 128>}, {pipeline_mode = #tpu.pipeline_mode<synchronous>, transform_indices = @transform_2, window_bounds = array<i64: 1, 128>}, {transform_indices = @transform_3, window_bounds = array<i64: 1, 32, 128>}]} {
    %c0 = arith.constant 0 : index
    %c0_0 = arith.constant 0 : index
    %c0_1 = arith.constant 0 : index
    %0 = vector.load %arg2[%c0, %c0_0, %c0_1] : memref<1x32x128xf32, #tpu.memory_space<vmem>>, vector<1x32x128xf32>
    %1 = vector.shape_cast %0 : vector<1x32x128xf32> to vector<32x128xf32>
    %c0_2 = arith.constant 0 : index
    %c0_3 = arith.constant 0 : index
    %2 = vector.load %arg3[%c0_2, %c0_3] : memref<1x128xf32, #tpu.memory_space<vmem>>, vector<1x128xf32>
    %c0_4 = arith.constant 0 : index
    %c0_5 = arith.constant 0 : index
    %3 = vector.load %arg4[%c0_4, %c0_5] : memref<1x128xf32, #tpu.memory_space<vmem>>, vector<1x128xf32>
    %cst = arith.constant dense<0.000000e+00> : vector<32xf32>
    %4 = vector.multi_reduction <add>, %1, %cst [1] : vector<32x128xf32> to vector<32xf32>
    %5 = vector.shape_cast %4 : vector<32xf32> to vector<32x1xf32>
    %cst_6 = arith.constant 1.280000e+02 : f32
    %6 = vector.broadcast %cst_6 : f32 to vector<32x1xf32>
    %7 = arith.divf %5, %6 : vector<32x1xf32>
    %8 = vector.broadcast %7 : vector<32x1xf32> to vector<32x128xf32>
    %9 = arith.subf %1, %8 : vector<32x128xf32>
    %10 = arith.mulf %9, %9 : vector<32x128xf32>
    %cst_7 = arith.constant dense<0.000000e+00> : vector<32xf32>
    %11 = vector.multi_reduction <add>, %10, %cst_7 [1] : vector<32x128xf32> to vector<32xf32>
    %12 = vector.shape_cast %11 : vector<32xf32> to vector<32x1xf32>
    %cst_8 = arith.constant 1.280000e+02 : f32
    %13 = vector.broadcast %cst_8 : f32 to vector<32x1xf32>
    %14 = arith.divf %12, %13 : vector<32x1xf32>
    %15 = vector.broadcast %7 : vector<32x1xf32> to vector<32x128xf32>
    %16 = arith.subf %1, %15 : vector<32x128xf32>
    %cst_9 = arith.constant 9.99999974E-6 : f32
    %17 = vector.broadcast %cst_9 : f32 to vector<32x1xf32>
    %18 = arith.addf %14, %17 : vector<32x1xf32>
    %19 = math.rsqrt %18 : vector<32x1xf32>
    %20 = vector.broadcast %19 : vector<32x1xf32> to vector<32x128xf32>
    %21 = arith.mulf %16, %20 : vector<32x128xf32>
    %22 = vector.broadcast %2 : vector<1x128xf32> to vector<32x128xf32>
    %23 = arith.mulf %21, %22 : vector<32x128xf32>
    %24 = vector.broadcast %3 : vector<1x128xf32> to vector<32x128xf32>
    %25 = arith.addf %23, %24 : vector<32x128xf32>
    %c0_10 = arith.constant 0 : index
    %c0_11 = arith.constant 0 : index
    %c0_12 = arith.constant 0 : index
    %26 = vector.load %arg5[%c0_10, %c0_11, %c0_12] : memref<1x32x128xf32, #tpu.memory_space<vmem>>, vector<1x32x128xf32>
    %27 = vector.shape_cast %26 : vector<1x32x128xf32> to vector<32x128xf32>
    %28 = vector.shape_cast %25 : vector<32x128xf32> to vector<1x32x128xf32>
    tpu.vector_store %arg5[%c0_10, %c0_11, %c0_12], %28 {strides = array<i32>} : memref<1x32x128xf32, #tpu.memory_space<vmem>>, vector<1x32x128xf32>,
    return
  }
  func.func @transform_0(%arg0: i32, %arg1: i32) -> (i32, i32, i32) {
    %c0_i32 = arith.constant 0 : i32
    %c0_i32_0 = arith.constant 0 : i32
    return %arg0, %arg1, %c0_i32 : i32, i32, i32
  }
  func.func @transform_1(%arg0: i32, %arg1: i32) -> (i32, i32) {
    %c0_i32 = arith.constant 0 : i32
    %c0_i32_0 = arith.constant 0 : i32
    %c0_i32_1 = arith.constant 0 : i32
    return %c0_i32, %c0_i32_0 : i32, i32
  }
  func.func @transform_2(%arg0: i32, %arg1: i32) -> (i32, i32) {
    %c0_i32 = arith.constant 0 : i32
    %c0_i32_0 = arith.constant 0 : i32
    %c0_i32_1 = arith.constant 0 : i32
    return %c0_i32, %c0_i32_0 : i32, i32
  }
  func.func @transform_3(%arg0: i32, %arg1: i32) -> (i32, i32, i32) {
    %c0_i32 = arith.constant 0 : i32
    %c0_i32_0 = arith.constant 0 : i32
    return %arg0, %arg1, %c0_i32 : i32, i32, i32
  }
}

module attributes {stable_mosaic.version = 11 : i64} {
  func.func @attn_out_ln_mlp_kernel(%arg0: i32, %arg1: i32, %arg2: i32, %arg3: memref<1x32x128xf32, #tpu.memory_space<vmem>>, %arg4: memref<1x32x128xbf16, #tpu.memory_space<vmem>>, %arg5: memref<128x128xbf16, #tpu.memory_space<vmem>>, %arg6: memref<1x128xf32, #tpu.memory_space<vmem>>, %arg7: memref<1x128xf32, #tpu.memory_space<vmem>>, %arg8: memref<1x128xf32, #tpu.memory_space<vmem>>, %arg9: memref<128x256xbf16, #tpu.memory_space<vmem>>, %arg10: memref<1x256xf32, #tpu.memory_space<vmem>>, %arg11: memref<256x128xbf16, #tpu.memory_space<vmem>>, %arg12: memref<1x128xf32, #tpu.memory_space<vmem>>, %arg13: memref<1x32x128xf32, #tpu.memory_space<vmem>>, %arg14: memref<32x128xf32, #tpu.memory_space<vmem>>, %arg15: memref<32x128xbf16, #tpu.memory_space<vmem>>) attributes {dimension_semantics = [#tpu.dimension_semantics<parallel>, #tpu.dimension_semantics<parallel>, #tpu.dimension_semantics<arbitrary>], iteration_bounds = array<i64: 2, 2, 2>, scalar_prefetch = 0 : i64, scratch_operands = 2 : i64, tpu.core_type = #tpu.core_type<tc>, window_params = [{transform_indices = @transform_0, window_bounds = array<i64: 1, 32, 128>}, {transform_indices = @transform_1, window_bounds = array<i64: 1, 32, 128>}, {pipeline_mode = #tpu.pipeline_mode<synchronous>, transform_indices = @transform_2, window_bounds = array<i64: 128, 128>}, {pipeline_mode = #tpu.pipeline_mode<synchronous>, transform_indices = @transform_3, window_bounds = array<i64: 1, 128>}, {pipeline_mode = #tpu.pipeline_mode<synchronous>, transform_indices = @transform_4, window_bounds = array<i64: 1, 128>}, {pipeline_mode = #tpu.pipeline_mode<synchronous>, transform_indices = @transform_5, window_bounds = array<i64: 1, 128>}, {transform_indices = @transform_6, window_bounds = array<i64: 128, 256>}, {transform_indices = @transform_7, window_bounds = array<i64: 1, 256>}, {transform_indices = @transform_8, window_bounds = array<i64: 256, 128>}, {pipeline_mode = #tpu.pipeline_mode<synchronous>, transform_indices = @transform_9, window_bounds = array<i64: 1, 128>}, {transform_indices = @transform_10, window_bounds = array<i64: 1, 32, 128>}]} {
    %c0_i32 = arith.constant 0 : i32
    %0 = arith.cmpi eq, %arg2, %c0_i32 : i32
    %1 = arith.extui %0 : i1 to i32
    %c0_i32_0 = arith.constant 0 : i32
    %2 = arith.cmpi ne, %1, %c0_i32_0 : i32
    scf.if %2 {
      %c0_17 = arith.constant 0 : index
      %c0_18 = arith.constant 0 : index
      %c0_19 = arith.constant 0 : index
      %26 = vector.load %arg4[%c0_17, %c0_18, %c0_19] : memref<1x32x128xbf16, #tpu.memory_space<vmem>>, vector<1x32x128xbf16>
      %27 = vector.shape_cast %26 : vector<1x32x128xbf16> to vector<32x128xbf16>
      %c0_20 = arith.constant 0 : index
      %c0_21 = arith.constant 0 : index
      %28 = vector.load %arg5[%c0_20, %c0_21] : memref<128x128xbf16, #tpu.memory_space<vmem>>, vector<128x128xbf16>
      %cst_22 = arith.constant dense<0.000000e+00> : vector<32x128xf32>
      %29 = tpu.matmul %27, %28, %cst_22 {dimension_numbers = #tpu.dot_dimension_numbers<[1], [0], [0], [1], [0, 0, 1, 1], [], []>} : vector<32x128xbf16>, vector<128x128xbf16>, vector<32x128xf32> -> vector<32x128xf32>
      %c0_23 = arith.constant 0 : index
      %c0_24 = arith.constant 0 : index
      %c0_25 = arith.constant 0 : index
      %30 = vector.load %arg3[%c0_23, %c0_24, %c0_25] : memref<1x32x128xf32, #tpu.memory_space<vmem>>, vector<1x32x128xf32>
      %31 = vector.shape_cast %30 : vector<1x32x128xf32> to vector<32x128xf32>
      %32 = arith.addf %31, %29 : vector<32x128xf32>
      %c0_26 = arith.constant 0 : index
      %c0_27 = arith.constant 0 : index
      %33 = vector.load %arg6[%c0_26, %c0_27] : memref<1x128xf32, #tpu.memory_space<vmem>>, vector<1x128xf32>
      %34 = vector.broadcast %33 : vector<1x128xf32> to vector<32x128xf32>
      %35 = arith.addf %32, %34 : vector<32x128xf32>
      %c0_28 = arith.constant 0 : index
      %c0_29 = arith.constant 0 : index
      %36 = vector.load %arg7[%c0_28, %c0_29] : memref<1x128xf32, #tpu.memory_space<vmem>>, vector<1x128xf32>
      %c0_30 = arith.constant 0 : index
      %c0_31 = arith.constant 0 : index
      %37 = vector.load %arg8[%c0_30, %c0_31] : memref<1x128xf32, #tpu.memory_space<vmem>>, vector<1x128xf32>
      %cst_32 = arith.constant dense<0.000000e+00> : vector<32xf32>
      %38 = vector.multi_reduction <add>, %35, %cst_32 [1] : vector<32x128xf32> to vector<32xf32>
      %39 = vector.shape_cast %38 : vector<32xf32> to vector<32x1xf32>
      %cst_33 = arith.constant 1.280000e+02 : f32
      %40 = vector.broadcast %cst_33 : f32 to vector<32x1xf32>
      %41 = arith.divf %39, %40 : vector<32x1xf32>
      %42 = vector.broadcast %41 : vector<32x1xf32> to vector<32x128xf32>
      %43 = arith.subf %35, %42 : vector<32x128xf32>
      %44 = arith.mulf %43, %43 : vector<32x128xf32>
      %cst_34 = arith.constant dense<0.000000e+00> : vector<32xf32>
      %45 = vector.multi_reduction <add>, %44, %cst_34 [1] : vector<32x128xf32> to vector<32xf32>
      %46 = vector.shape_cast %45 : vector<32xf32> to vector<32x1xf32>
      %cst_35 = arith.constant 1.280000e+02 : f32
      %47 = vector.broadcast %cst_35 : f32 to vector<32x1xf32>
      %48 = arith.divf %46, %47 : vector<32x1xf32>
      %49 = vector.broadcast %41 : vector<32x1xf32> to vector<32x128xf32>
      %50 = arith.subf %35, %49 : vector<32x128xf32>
      %cst_36 = arith.constant 9.99999974E-6 : f32
      %51 = vector.broadcast %cst_36 : f32 to vector<32x1xf32>
      %52 = arith.addf %48, %51 : vector<32x1xf32>
      %53 = math.rsqrt %52 : vector<32x1xf32>
      %54 = vector.broadcast %53 : vector<32x1xf32> to vector<32x128xf32>
      %55 = arith.mulf %50, %54 : vector<32x128xf32>
      %56 = vector.broadcast %36 : vector<1x128xf32> to vector<32x128xf32>
      %57 = arith.mulf %55, %56 : vector<32x128xf32>
      %58 = vector.broadcast %37 : vector<1x128xf32> to vector<32x128xf32>
      %59 = arith.addf %57, %58 : vector<32x128xf32>
      %c0_37 = arith.constant 0 : index
      %c0_38 = arith.constant 0 : index
      %60 = vector.load %arg12[%c0_37, %c0_38] : memref<1x128xf32, #tpu.memory_space<vmem>>, vector<1x128xf32>
      %61 = vector.broadcast %60 : vector<1x128xf32> to vector<32x128xf32>
      %62 = arith.addf %59, %61 : vector<32x128xf32>
      %c0_39 = arith.constant 0 : index
      %c0_40 = arith.constant 0 : index
      %63 = vector.load %arg14[%c0_39, %c0_40] : memref<32x128xf32, #tpu.memory_space<vmem>>, vector<32x128xf32>
      tpu.vector_store %arg14[%c0_39, %c0_40], %62 {strides = array<i32>} : memref<32x128xf32, #tpu.memory_space<vmem>>, vector<32x128xf32>,
      %64 = arith.truncf %59 : vector<32x128xf32> to vector<32x128xbf16>
      %c0_41 = arith.constant 0 : index
      %c0_42 = arith.constant 0 : index
      %65 = vector.load %arg15[%c0_41, %c0_42] : memref<32x128xbf16, #tpu.memory_space<vmem>>, vector<32x128xbf16>
      tpu.vector_store %arg15[%c0_41, %c0_42], %64 {strides = array<i32>} : memref<32x128xbf16, #tpu.memory_space<vmem>>, vector<32x128xbf16>,
    } else {
    }
    %c0 = arith.constant 0 : index
    %c0_1 = arith.constant 0 : index
    %3 = vector.load %arg15[%c0, %c0_1] : memref<32x128xbf16, #tpu.memory_space<vmem>>, vector<32x128xbf16>
    %c0_2 = arith.constant 0 : index
    %c0_3 = arith.constant 0 : index
    %4 = vector.load %arg9[%c0_2, %c0_3] : memref<128x256xbf16, #tpu.memory_space<vmem>>, vector<128x256xbf16>
    %cst = arith.constant dense<0.000000e+00> : vector<32x256xf32>
    %5 = tpu.matmul %3, %4, %cst {dimension_numbers = #tpu.dot_dimension_numbers<[1], [0], [0], [1], [0, 0, 1, 1], [], []>} : vector<32x128xbf16>, vector<128x256xbf16>, vector<32x256xf32> -> vector<32x256xf32>
    %c0_4 = arith.constant 0 : index
    %c0_5 = arith.constant 0 : index
    %6 = vector.load %arg10[%c0_4, %c0_5] : memref<1x256xf32, #tpu.memory_space<vmem>>, vector<1x256xf32>
    %7 = vector.broadcast %6 : vector<1x256xf32> to vector<32x256xf32>
    %8 = arith.addf %5, %7 : vector<32x256xf32>
    %cst_6 = arith.constant 5.000000e-01 : f32
    %9 = vector.broadcast %cst_6 : f32 to vector<32x256xf32>
    %10 = arith.mulf %9, %8 : vector<32x256xf32>
    %cst_7 = arith.constant 1.41421354 : f32
    %11 = vector.broadcast %cst_7 : f32 to vector<32x256xf32>
    %12 = arith.divf %8, %11 : vector<32x256xf32>
    %13 = math.erf %12 : vector<32x256xf32>
    %cst_8 = arith.constant 1.000000e+00 : f32
    %14 = vector.broadcast %cst_8 : f32 to vector<32x256xf32>
    %15 = arith.addf %14, %13 : vector<32x256xf32>
    %16 = arith.mulf %10, %15 : vector<32x256xf32>
    %c0_9 = arith.constant 0 : index
    %c0_10 = arith.constant 0 : index
    %17 = vector.load %arg14[%c0_9, %c0_10] : memref<32x128xf32, #tpu.memory_space<vmem>>, vector<32x128xf32>
    %18 = arith.truncf %16 : vector<32x256xf32> to vector<32x256xbf16>
    %c0_11 = arith.constant 0 : index
    %c0_12 = arith.constant 0 : index
    %19 = vector.load %arg11[%c0_11, %c0_12] : memref<256x128xbf16, #tpu.memory_space<vmem>>, vector<256x128xbf16>
    %cst_13 = arith.constant dense<0.000000e+00> : vector<32x128xf32>
    %20 = tpu.matmul %18, %19, %cst_13 {dimension_numbers = #tpu.dot_dimension_numbers<[1], [0], [0], [1], [0, 0, 1, 1], [], []>} : vector<32x256xbf16>, vector<256x128xbf16>, vector<32x128xf32> -> vector<32x128xf32>
    %21 = arith.addf %17, %20 : vector<32x128xf32>
    %c0_14 = arith.constant 0 : index
    %c0_15 = arith.constant 0 : index
    %22 = vector.load %arg14[%c0_14, %c0_15] : memref<32x128xf32, #tpu.memory_space<vmem>>, vector<32x128xf32>
    tpu.vector_store %arg14[%c0_14, %c0_15], %21 {strides = array<i32>} : memref<32x128xf32, #tpu.memory_space<vmem>>, vector<32x128xf32>,
    %c1_i32 = arith.constant 1 : i32
    %23 = arith.cmpi eq, %arg2, %c1_i32 : i32
    %24 = arith.extui %23 : i1 to i32
    %c0_i32_16 = arith.constant 0 : i32
    %25 = arith.cmpi ne, %24, %c0_i32_16 : i32
    scf.if %25 {
      %c0_17 = arith.constant 0 : index
      %c0_18 = arith.constant 0 : index
      %26 = vector.load %arg14[%c0_17, %c0_18] : memref<32x128xf32, #tpu.memory_space<vmem>>, vector<32x128xf32>
      %c0_19 = arith.constant 0 : index
      %c0_20 = arith.constant 0 : index
      %c0_21 = arith.constant 0 : index
      %27 = vector.load %arg13[%c0_19, %c0_20, %c0_21] : memref<1x32x128xf32, #tpu.memory_space<vmem>>, vector<1x32x128xf32>
      %28 = vector.shape_cast %27 : vector<1x32x128xf32> to vector<32x128xf32>
      %29 = vector.shape_cast %26 : vector<32x128xf32> to vector<1x32x128xf32>
      tpu.vector_store %arg13[%c0_19, %c0_20, %c0_21], %29 {strides = array<i32>} : memref<1x32x128xf32, #tpu.memory_space<vmem>>, vector<1x32x128xf32>,
    } else {
    }
    return
  }
  func.func @transform_0(%arg0: i32, %arg1: i32, %arg2: i32) -> (i32, i32, i32) {
    %c0_i32 = arith.constant 0 : i32
    %c0_i32_0 = arith.constant 0 : i32
    return %arg0, %arg1, %c0_i32 : i32, i32, i32
  }
  func.func @transform_1(%arg0: i32, %arg1: i32, %arg2: i32) -> (i32, i32, i32) {
    %c0_i32 = arith.constant 0 : i32
    %c0_i32_0 = arith.constant 0 : i32
    return %arg0, %arg1, %c0_i32 : i32, i32, i32
  }
  func.func @transform_2(%arg0: i32, %arg1: i32, %arg2: i32) -> (i32, i32) {
    %c0_i32 = arith.constant 0 : i32
    %c0_i32_0 = arith.constant 0 : i32
    %c0_i32_1 = arith.constant 0 : i32
    return %c0_i32, %c0_i32_0 : i32, i32
  }
  func.func @transform_3(%arg0: i32, %arg1: i32, %arg2: i32) -> (i32, i32) {
    %c0_i32 = arith.constant 0 : i32
    %c0_i32_0 = arith.constant 0 : i32
    %c0_i32_1 = arith.constant 0 : i32
    return %c0_i32, %c0_i32_0 : i32, i32
  }
  func.func @transform_4(%arg0: i32, %arg1: i32, %arg2: i32) -> (i32, i32) {
    %c0_i32 = arith.constant 0 : i32
    %c0_i32_0 = arith.constant 0 : i32
    %c0_i32_1 = arith.constant 0 : i32
    return %c0_i32, %c0_i32_0 : i32, i32
  }
  func.func @transform_5(%arg0: i32, %arg1: i32, %arg2: i32) -> (i32, i32) {
    %c0_i32 = arith.constant 0 : i32
    %c0_i32_0 = arith.constant 0 : i32
    %c0_i32_1 = arith.constant 0 : i32
    return %c0_i32, %c0_i32_0 : i32, i32
  }
  func.func @transform_6(%arg0: i32, %arg1: i32, %arg2: i32) -> (i32, i32) {
    %c0_i32 = arith.constant 0 : i32
    %c0_i32_0 = arith.constant 0 : i32
    return %c0_i32, %arg2 : i32, i32
  }
  func.func @transform_7(%arg0: i32, %arg1: i32, %arg2: i32) -> (i32, i32) {
    %c0_i32 = arith.constant 0 : i32
    %c0_i32_0 = arith.constant 0 : i32
    return %c0_i32, %arg2 : i32, i32
  }
  func.func @transform_8(%arg0: i32, %arg1: i32, %arg2: i32) -> (i32, i32) {
    %c0_i32 = arith.constant 0 : i32
    %c0_i32_0 = arith.constant 0 : i32
    return %arg2, %c0_i32 : i32, i32
  }
  func.func @transform_9(%arg0: i32, %arg1: i32, %arg2: i32) -> (i32, i32) {
    %c0_i32 = arith.constant 0 : i32
    %c0_i32_0 = arith.constant 0 : i32
    %c0_i32_1 = arith.constant 0 : i32
    return %c0_i32, %c0_i32_0 : i32, i32
  }
  func.func @transform_10(%arg0: i32, %arg1: i32, %arg2: i32) -> (i32, i32, i32) {
    %c0_i32 = arith.constant 0 : i32
    %c0_i32_0 = arith.constant 0 : i32
    return %arg0, %arg1, %c0_i32 : i32, i32, i32
  }
}

</mosaic_0001>

<bundles_post_ra>
// kernel: audio_encoder_forward.9
= control target key start
LH: loop header
LB: loop body
LE: loop exit
PB: predicated region body
PF: predicated region fallthrough
CT: control target
= control target key end

     0   :  { %s576_s12 = smov 0   ;;  %s578_s13 = smov 0   ;;  %s643_s0 = inlined_call_operand.vmem [shape: bf16[2,64,48], index: 0, kind: input, shape index: {}]   ;;  %s644_s1 = inlined_call_operand.vmem [shape: bf16[48,128], index: 1, kind: input, shape index: {}]   ;;  %s645_s2 = inlined_call_operand.vmem [shape: f32[1,128], index: 2, kind: input, shape index: {}]   ;;  %s646_s3 = inlined_call_operand.vmem [shape: f32[2,64,128], index: 3, kind: output, shape index: {}]  }
   0x1   :  { %s580_s14 = smov 0   ;;  %s582_s15 = smov 0  }
   0x2   :  { %s584_s16 = smov 0  }
   0x3 LB: > { %s22_s17 = sadd.s32 1, %s546_s14  ;;  %s25_s18 = sadd.s32 1, %s550_s15  ;;  %s554_s16 = sphi %s584_s16, %s13_s16   ;;  %s550_s15 = sphi %s582_s15, %s650_s15   ;;  %s546_s14 = sphi %s580_s14, %s649_s14   ;;  %s542_s13 = sphi %s578_s13, %s648_s13   ;;  %s538_s12 = sphi %s576_s12, %s647_s12  }
   0x4   : > { %p23_p0 = scmp.ge.s32.totalorder %s22_s17, 2  ;;  %p431_p1 = scmp.ge.s32.totalorder %s554_s16, 1 }
   0x5   : > { %p158_p2 = scmp.lt.s32.totalorder %s554_s16, 5 }
   0x6   : > { %s652_s17 = smov (%p23_p0, %s22_s17), 0  ;;  %s654_s18 = smov (!%p23_p0, %s25_s18), %s550_s15 }
   0x7   : > { %p159_p3 = pnand %p431_p1, %p158_p2  ;;  %p27_p4 = scmp.ge.s32.totalorder %s654_s18, 2 }
   0x8   : > { %v503_v0 = vld [vmem:[%s644_s1] sm:$0xff] (!%p159_p3)   ;;  %s432_s21 = sshll.u32 (!%p159_p3), %s538_s12, 2  ;;  %v504_v1 = vld [vmem:[%s644_s1 + $0x8] sm:$0xff] (!%p159_p3)   ;;  %p191_p5 = scmp.lt.s32.totalorder (!%p159_p3), %s542_s13, 1  ;;  %v505_v2 = vld [vmem:[%s644_s1 + $0x10] sm:$0xff] (!%p159_p3)   ;;  %vm256_vm0 = vcmask (!%p159_p3), 392192  }
   0x9   : > { %s656_s18 = smov (%p27_p4, %s654_s18), 0  ;;  %162 = sbr.rel (%p159_p3) target bundleno = 258 (0x102), region = 32 }
   0xa   : > { %453 = vmatprep.subr.bf16.mxu0 (!%p159_p3), %v503_v0  ;;  %p193_p6 = scmp.lt.s32.totalorder (!%p159_p3), %s432_s21, 7  ;;  %v438_v5 = vld [vmem:[%s645_s2] ss:$0 sm:$0xff] (!%p159_p3) }
   0xb   : > { %454 = vmatpush3.bf16.msra.mxu0 (!%p159_p3), %v503_v0 }
   0xc   : > { %455 = vmatprep.subr.bf16.mxu0 (!%p159_p3), %v504_v1 }
   0xf   : > { %456 = vmatpush3.bf16.msra.mxu0 (!%p159_p3), %v504_v1 }
  0x10   : > { %s658_s13 = smov (!%p191_p5, %s542_s13), 1  ;;  %s660_s21 = smov (!%p193_p6, %s432_s21), 7  ;;  %457 = vmatprep.subr.bf16.mxu0 %v505_v2 }
  0x11   : > { %s433_s26 = sshll.u32 %s658_s13, 3 }
  0x12   : > { %s615_s27 = sadd.s32 %s433_s26, %s660_s21 }
  0x13   : > { %s434_s28 = sshll.u32 %s615_s27, 2  ;;  %458 = vmatpush3.bf16.msra.mxu0 %v505_v2  ;;  %s437_s7 = sshll.u32 %s615_s27, 3 }
  0x14   : > { %s198_s4 = scalar_lea.vmem %s643_s0, %s434_s28  ;;  %s208_s10 = scalar_lea.vmem %s646_s3, %s437_s7 }
  0x15   : > { %v506_v3 = vld [vmem:[%s198_s4] sm:$0xff]   ;;  %v507_v4 = vld [vmem:[%s198_s4 + $0x8] sm:$0xff]  }
  0x16   : > { %459 = vmatprep.mubr.msk.bf16.mxu0 %vm256_vm0, %v506_v3 }
  0x17   : > { %460 = vmatmul.mubr.msk.bf16.vlgmr.msra.gmra.mrb[0].mxu0 %vm256_vm0, %v507_v4 }
  0xea   : > { %v461_v6 = vpop.f32.mrb[0].mxu0 }
  0xeb   : > { %v306_v7 = vadd.f32 %v461_v6, %v438_v5  ;;  %v297_v8 = vpop.f32.mrb[1].mxu0 }
  0xec   : > { %v298_v9 = vadd.f32 %v438_v5, %v297_v8  ;;  %v462_v10 = vpop.f32.mrb[2].mxu0 }
  0xed   : > { %v319_v11 = vmul.f32 0.70710677, %v306_v7  ;;  %v309_v12 = vadd.f32 %v462_v10, %v438_v5  ;;  %v300_v13 = vpop.f32.mrb[3].mxu0  ;;  %v314_v20 = vmul.f32 0.5, %v306_v7 }
  0xee   : > { %v317_v14 = vmul.f32 0.70710677, %v298_v9  ;;  %v301_v15 = vadd.f32 %v438_v5, %v300_v13  ;;  %v312_v23 = vmul.f32 0.5, %v298_v9 }
  0xef   : > { %508 = verf.f32 %v319_v11  ;;  %v320_v16 = vmul.f32 0.70710677, %v309_v12  ;;  %v315_v27 = vmul.f32 0.5, %v309_v12 }
  0xf0   : > { %510 = verf.f32 %v317_v14  ;;  %v318_v17 = vmul.f32 0.70710677, %v301_v15  ;;  %v313_v30 = vmul.f32 0.5, %v301_v15 }
  0xf1   : > { %512 = verf.f32 %v320_v16 }
  0xf2   : > { %514 = verf.f32 %v318_v17 }
  0xf9   : > { %v509_v18 = vpop.eup %508 }
  0xfa   : > { %v511_v19 = vpop.eup %510  ;;  %v327_v21 = vadd.f32 1.0, %v509_v18 }
  0xfb   : > { %v513_v22 = vpop.eup %512  ;;  %v325_v24 = vadd.f32 1.0, %v511_v19 }
  0xfc   : > { %v515_v25 = vpop.eup %514  ;;  %v331_v26 = vmul.f32 %v327_v21, %v314_v20  ;;  %v328_v28 = vadd.f32 1.0, %v513_v22 }
  0xfd   : > { %v329_v29 = vmul.f32 %v325_v24, %v312_v23  ;;  %v326_v31 = vadd.f32 1.0, %v515_v25 }
  0xfe   : > { %335 = vst [vmem:[%s208_s10 + $0x10] sm:$0xff] %v331_v26  ;;  %v332_v32 = vmul.f32 %v328_v28, %v315_v27 }
  0xff   : > { %333 = vst [vmem:[%s208_s10] sm:$0xff] %v329_v29  ;;  %v330_v33 = vmul.f32 %v326_v31, %v313_v30 }
 0x100   : > { %336 = vst [vmem:[%s208_s10 + $0x18] sm:$0xff] %v332_v32 }
 0x101   : > { %334 = vst [vmem:[%s208_s10 + $0x8] sm:$0xff] %v330_v33 }
 0x102 PF: > { %s13_s16 = sadd.s32 1, %s554_s16   ;;  %s647_s12 = smov %s546_s14 }
 0x103   : > { %p10_p7 = scmp.ge.s32.totalorder %s13_s16, 6   ;;  %s648_s13 = smov %s550_s15 }
 0x104   : > { %s649_s14 = smov %s652_s17  ;;  %s650_s15 = smov %s656_s18 }
 0x105   :  { %12 = sbr.rel (!%p10_p7) target bundleno = 3 (0x3), region = 62 }

// kernel: audio_encoder_forward.10
= control target key start
LH: loop header
LB: loop body
LE: loop exit
PB: predicated region body
PF: predicated region fallthrough
CT: control target
= control target key end

     0   :  { %s988_s15 = smov 0   ;;  %s990_s16 = smov 0   ;;  %s1133_s0 = inlined_call_operand.vmem [shape: bf16[2,64,384], index: 0, kind: input, shape index: {}]   ;;  %s1134_s1 = inlined_call_operand.vmem [shape: bf16[384,128], index: 1, kind: input, shape index: {}]   ;;  %s1135_s2 = inlined_call_operand.vmem [shape: f32[1,128], index: 2, kind: input, shape index: {}]   ;;  %s1136_s3 = inlined_call_operand.vmem [shape: f32[64,128], index: 3, kind: input, shape index: {}]   ;;  %s1137_s4 = inlined_call_operand.vmem [shape: f32[2,64,128], index: 4, kind: output, shape index: {}]  }
   0x1   :  { %s992_s17 = smov 0   ;;  %s994_s18 = smov 0  }
   0x2   :  { %s996_s19 = smov 0  }
   0x3 LB: > { %s23_s20 = sadd.s32 1, %s953_s17  ;;  %s26_s21 = sadd.s32 1, %s957_s18  ;;  %s961_s19 = sphi %s996_s19, %s14_s19   ;;  %s957_s18 = sphi %s994_s18, %s1141_s18   ;;  %s953_s17 = sphi %s992_s17, %s1140_s17   ;;  %s949_s16 = sphi %s990_s16, %s1139_s16   ;;  %s945_s15 = sphi %s988_s15, %s1138_s15  }
   0x4   : > { %p24_p0 = scmp.ge.s32.totalorder %s23_s20, 2  ;;  %p742_p1 = scmp.ge.s32.totalorder %s961_s19, 1 }
   0x5   : > { %p195_p2 = scmp.lt.s32.totalorder %s961_s19, 5 }
   0x6   : > { %s1143_s20 = smov (%p24_p0, %s23_s20), 0  ;;  %s1145_s21 = smov (!%p24_p0, %s26_s21), %s957_s18 }
   0x7   : > { %p196_p3 = pnand %p742_p1, %p195_p2  ;;  %p28_p4 = scmp.ge.s32.totalorder %s1145_s21, 2 }
   0x8   : > { %v883_v0 = vld [vmem:[%s1134_s1 + $0x40] sm:$0xff] (!%p196_p3)   ;;  %s743_s24 = sshll.u32 (!%p196_p3), %s945_s15, 2  ;;  %v885_v2 = vld [vmem:[%s1134_s1 + $0x48] sm:$0xff] (!%p196_p3)   ;;  %p236_p5 = scmp.lt.s32.totalorder (!%p196_p3), %s949_s16, 1  ;;  %v888_v5 = vld [vmem:[%s1134_s1 + $0x50] sm:$0xff] (!%p196_p3)  }
   0x9   : > { %s1147_s21 = smov (%p28_p4, %s1145_s21), 0  ;;  %199 = sbr.rel (%p196_p3) target bundleno = 291 (0x123), region = 36 }
   0xa   : > { %v884_v1 = vld [vmem:[%s1134_s1] sm:$0xff] (!%p196_p3)   ;;  %783 = vmatprep.subr.bf16.mxu0 (!%p196_p3), %v883_v0  ;;  %p238_p6 = scmp.lt.s32.totalorder (!%p196_p3), %s743_s24, 7  ;;  %v887_v4 = vld [vmem:[%s1134_s1 + $0x8] sm:$0xff] (!%p196_p3)   ;;  %v890_v7 = vld [vmem:[%s1134_s1 + $0x10] sm:$0xff] (!%p196_p3)  }
   0xb   : > { %784 = vmatpush3.bf16.msra.mxu0 (!%p196_p3), %v884_v1  ;;  %v886_v3 = vld [vmem:[%s1134_s1 + $0x80] sm:$0xff] (!%p196_p3)   ;;  %v889_v6 = vld [vmem:[%s1134_s1 + $0x88] sm:$0xff] (!%p196_p3)   ;;  %v891_v8 = vld [vmem:[%s1134_s1 + $0x58] sm:$0xff] (!%p196_p3)  }
   0xc   : > { %785 = vmatprep.subr.bf16.mxu0 (!%p196_p3), %v885_v2  ;;  %821 = vmatprep.subr.bf16.mxu1 (!%p196_p3), %v886_v3  ;;  %v892_v9 = vld [vmem:[%s1134_s1 + $0x90] sm:$0xff] (!%p196_p3)   ;;  %v893_v10 = vld [vmem:[%s1134_s1 + $0x18] sm:$0xff] (!%p196_p3)   ;;  %v894_v11 = vld [vmem:[%s1134_s1 + $0x60] sm:$0xff] (!%p196_p3)  }
   0xd   : > { %822 = vmatpush3.bf16.msra.mxu1 (!%p196_p3), %v886_v3  ;;  %v895_v12 = vld [vmem:[%s1134_s1 + $0x98] sm:$0xff] (!%p196_p3)   ;;  %v896_v13 = vld [vmem:[%s1134_s1 + $0x20] sm:$0xff] (!%p196_p3)   ;;  %v897_v15 = vld [vmem:[%s1134_s1 + $0x68] sm:$0xff] (!%p196_p3)  }
   0xe   : > { %823 = vmatprep.subr.bf16.mxu1 (!%p196_p3), %v889_v6  ;;  %v898_v14 = vld [vmem:[%s1134_s1 + $0xa0] sm:$0xff] (!%p196_p3)   ;;  %v899_v16 = vld [vmem:[%s1134_s1 + $0x28] sm:$0xff] (!%p196_p3)   ;;  %v900_v18 = vld [vmem:[%s1134_s1 + $0x70] sm:$0xff] (!%p196_p3)  }
   0xf   : > { %786 = vmatpush3.bf16.msra.mxu0 (!%p196_p3), %v887_v4  ;;  %v901_v17 = vld [vmem:[%s1134_s1 + $0xa8] sm:$0xff] (!%p196_p3)   ;;  %v902_v19 = vld [vmem:[%s1134_s1 + $0x30] sm:$0xff] (!%p196_p3)   ;;  %v903_v20 = vld [vmem:[%s1134_s1 + $0x78] sm:$0xff] (!%p196_p3)  }
  0x10   : > { %s1149_s16 = smov (!%p236_p5, %s949_s16), 1  ;;  %s1151_s24 = smov (!%p238_p6, %s743_s24), 7  ;;  %787 = vmatprep.subr.bf16.mxu0 %v888_v5  ;;  %v904_v21 = vld [vmem:[%s1134_s1 + $0xb0] sm:$0xff]   ;;  %v905_v23 = vld [vmem:[%s1134_s1 + $0x38] sm:$0xff]   ;;  %v750_v32 = vld [vmem:[%s1135_s2] ss:$0 sm:$0xff] }
  0x11   : > { %824 = vmatpush3.bf16.msra.mxu1 %v889_v6  ;;  %s842_s26 = smul.u32 24, %s1149_s16  ;;  %v909_v25 = vld [vmem:[%s1134_s1 + $0xb8] sm:$0xff]   ;;  %s748_s22 = sshll.u32 %s1149_s16, 3 }
  0x12   : > { %825 = vmatprep.subr.bf16.mxu1 %v892_v9  ;;  %s841_s29 = smul.u32 3, %s1151_s24  ;;  %s746_s23 = sshll.u32 %s1151_s24, 3 }
  0x13   : > { %788 = vmatpush3.bf16.msra.mxu0 %v890_v7  ;;  %s258_s25 = sadd.s32 %s748_s22, %s1151_s24  ;;  %s250_s28 = scalar_lea.vmem %s1136_s3, %s746_s23 }
  0x14   : > { %789 = vmatprep.subr.bf16.mxu0 %v891_v8  ;;  %s242_s10 = sadd.s32 %s842_s26, %s841_s29  ;;  %s749_s29 = sshll.u32 %s258_s25, 3  ;;  %v621_v63 = vld [vmem:[%s250_s28] sm:$0xff]  ;;  %v622_v3 = vld [vmem:[%s250_s28 + $0x8] sm:$0xff] }
  0x15   : > { %826 = vmatpush3.bf16.msra.mxu1 %v892_v9  ;;  %s744_s15 = sshll.u32 %s242_s10, 2  ;;  %s260_s24 = scalar_lea.vmem %s1137_s4, %s749_s29 }
  0x16   : > { %827 = vmatprep.subr.bf16.mxu1 %v895_v12  ;;  %s244_s5 = scalar_lea.vmem %s1133_s0, %s744_s15 }
  0x17   : > { %790 = vmatpush3.bf16.msra.mxu0 %v893_v10  ;;  %v908_v22 = vld [vmem:[%s244_s5 + $0x4] ss:$12 sps:$4 sm:$0xff]   ;;  %v910_v24 = vld [vmem:[%s244_s5 + $0x8] ss:$12 sps:$4 sm:$0xff]   ;;  %v906_v26 = vld [vmem:[%s244_s5] ss:$12 sps:$4 sm:$0xff]  }
  0x18   : > { %791 = vmatprep.subr.bf16.mxu0 %v894_v11  ;;  %534 = vmatprep.mubr.bf16.mxu0 %v908_v22  ;;  %v912_v27 = vld [vmem:[%s244_s5 + $0x1c] ss:$12 sps:$4 sm:$0xff]   ;;  %v911_v28 = vld [vmem:[%s244_s5 + $0x20] ss:$12 sps:$4 sm:$0xff]   ;;  %v914_v29 = vld [vmem:[%s244_s5 + $0x18] ss:$12 sps:$4 sm:$0xff]  }
  0x19   : > { %828 = vmatpush3.bf16.msra.mxu1 %v895_v12  ;;  %837 = vmatprep.mubr.bf16.mxu1 %v910_v24  ;;  %v623_v11 = vld [vmem:[%s250_s28 + $0x10] sm:$0xff] }
  0x1a   : > { %829 = vmatprep.subr.bf16.mxu1 %v898_v14 }
  0x1b   : > { %792 = vmatpush3.bf16.msra.mxu0 %v896_v13 }
  0x1c   : > { %793 = vmatprep.subr.bf16.mxu0 %v897_v15  ;;  %v624_v15 = vld [vmem:[%s250_s28 + $0x18] sm:$0xff] }
  0x1d   : > { %830 = vmatpush3.bf16.msra.mxu1 %v898_v14 }
  0x1e   : > { %831 = vmatprep.subr.bf16.mxu1 %v901_v17 }
  0x1f   : > { %794 = vmatpush3.bf16.msra.mxu0 %v899_v16 }
  0x20   : > { %795 = vmatprep.subr.bf16.mxu0 %v900_v18 }
  0x21   : > { %832 = vmatpush3.bf16.msra.mxu1 %v901_v17 }
  0x22   : > { %833 = vmatprep.subr.bf16.mxu1 %v904_v21 }
  0x23   : > { %796 = vmatpush3.bf16.msra.mxu0 %v902_v19 }
  0x24   : > { %797 = vmatprep.subr.bf16.mxu0 %v903_v20 }
  0x25   : > { %834 = vmatpush3.bf16.msra.mxu1 %v904_v21 }
  0x26   : > { %835 = vmatprep.subr.bf16.mxu1 %v909_v25 }
  0x27   : > { %798 = vmatpush3.bf16.msra.mxu0 %v905_v23 }
  0x29   : > { %836 = vmatpush3.bf16.msra.mxu1 %v909_v25 }
  0x2a   : > { %535 = vmatmul.mubr.bf16.vlgmr.msra.gmra.mrb[0].mxu0 %v906_v26 }
  0x2b   : > { %542 = vmatprep.mubr.bf16.mxu0 %v912_v27 }
  0x2c   : > { %838 = vmatmul.mubr.bf16.vlgmr.msra.gmra.mrb[0].mxu1 %v911_v28 }
  0x32   : > { %543 = vmatmul.mubr.bf16.gmra.mrb[4].mxu0 %v914_v29 }
  0xfd   : > { %v799_v30 = vpop.f32.mrb[0].mxu0 }
  0xfe   : > { %v800_v31 = vpop.f32.mrb[1].mxu0 }
  0xff   : > { %v801_v33 = vadd.f32 %v800_v31, %v799_v30  ;;  %v802_v34 = vpop.f32.mrb[2].mxu0  ;;  %v839_v36 = vpop.f32.mrb[0].mxu1 }
 0x100   : > { %v803_v35 = vpop.f32.mrb[3].mxu0  ;;  %v585_v39 = vpop.f32.mrb[1].mxu1 }
 0x101   : > { %v804_v37 = vadd.f32 %v803_v35, %v802_v34  ;;  %v537_v38 = vadd.f32 %v801_v33, %v750_v32  ;;  %v840_v40 = vpop.f32.mrb[2].mxu1 }
 0x102   : > { %v588_v43 = vpop.f32.mrb[3].mxu1 }
 0x103   : > { %v586_v41 = vadd.f32 %v585_v39, %v537_v38  ;;  %v540_v42 = vadd.f32 %v804_v37, %v750_v32 }
 0x105   : > { %v605_v44 = vmul.f32 0.70710677, %v586_v41  ;;  %v589_v45 = vadd.f32 %v588_v43, %v540_v42  ;;  %v805_v46 = vpop.f32.mrb[4].mxu0  ;;  %v600_v60 = vmul.f32 0.5, %v586_v41 }
 0x106   : > { %v806_v47 = vpop.f32.mrb[5].mxu0 }
 0x107   : > { %915 = verf.f32 %v605_v44  ;;  %v606_v48 = vmul.f32 0.70710677, %v589_v45  ;;  %v807_v49 = vadd.f32 %v806_v47, %v805_v46  ;;  %v808_v50 = vpop.f32.mrb[6].mxu0  ;;  %v601_v1 = vmul.f32 0.5, %v589_v45 }
 0x108   : > { %v809_v51 = vpop.f32.mrb[7].mxu0 }
 0x109   : > { %917 = verf.f32 %v606_v48  ;;  %v545_v52 = vadd.f32 %v807_v49, %v750_v32  ;;  %v810_v53 = vadd.f32 %v809_v51, %v808_v50 }
 0x10b   : > { %v594_v54 = vadd.f32 %v839_v36, %v545_v52  ;;  %v548_v55 = vadd.f32 %v810_v53, %v750_v32 }
 0x10d   : > { %v607_v56 = vmul.f32 0.70710677, %v594_v54  ;;  %v597_v57 = vadd.f32 %v840_v40, %v548_v55  ;;  %v602_v8 = vmul.f32 0.5, %v594_v54 }
 0x10f   : > { %919 = verf.f32 %v607_v56  ;;  %v608_v58 = vmul.f32 0.70710677, %v597_v57  ;;  %v603_v13 = vmul.f32 0.5, %v597_v57 }
 0x111   : > { %v916_v59 = vpop.eup %915  ;;  %921 = verf.f32 %v608_v58 }
 0x112   : > { %v613_v61 = vadd.f32 1.0, %v916_v59 }
 0x113   : > { %v918_v62 = vpop.eup %917 }
 0x114   : > { %v617_v0 = vmul.f32 %v613_v61, %v600_v60  ;;  %v614_v2 = vadd.f32 1.0, %v918_v62 }
 0x116   : > { %v625_v4 = vadd.f32 %v621_v63, %v617_v0  ;;  %v618_v5 = vmul.f32 %v614_v2, %v601_v1 }
 0x118   : > { %629 = vst [vmem:[%s260_s24] sm:$0xff] %v625_v4  ;;  %v626_v6 = vadd.f32 %v622_v3, %v618_v5 }
 0x119   : > { %v920_v7 = vpop.eup %919 }
 0x11a   : > { %630 = vst [vmem:[%s260_s24 + $0x8] sm:$0xff] %v626_v6  ;;  %v615_v9 = vadd.f32 1.0, %v920_v7 }
 0x11b   : > { %v922_v10 = vpop.eup %921 }
 0x11c   : > { %v619_v12 = vmul.f32 %v615_v9, %v602_v8  ;;  %v616_v14 = vadd.f32 1.0, %v922_v10 }
 0x11e   : > { %v627_v16 = vadd.f32 %v623_v11, %v619_v12  ;;  %v620_v17 = vmul.f32 %v616_v14, %v603_v13 }
 0x120   : > { %631 = vst [vmem:[%s260_s24 + $0x10] sm:$0xff] %v627_v16  ;;  %v628_v18 = vadd.f32 %v624_v15, %v620_v17 }
 0x122   : > { %632 = vst [vmem:[%s260_s24 + $0x18] sm:$0xff] %v628_v18 }
 0x123 PF: > { %s14_s19 = sadd.s32 1, %s961_s19   ;;  %s1138_s15 = smov %s953_s17 }
 0x124   : > { %p11_p7 = scmp.ge.s32.totalorder %s14_s19, 6   ;;  %s1139_s16 = smov %s957_s18 }
 0x125   : > { %s1140_s17 = smov %s1143_s20  ;;  %s1141_s18 = smov %s1147_s21 }
 0x126   :  { %13 = sbr.rel (!%p11_p7) target bundleno = 3 (0x3), region = 69 }

// kernel: audio_encoder_forward.11
= control target key start
LH: loop header
LB: loop body
LE: loop exit
PB: predicated region body
PF: predicated region fallthrough
CT: control target
= control target key end

     0   :  { %s1697_s24 = smov 0   ;;  %s1699_s25 = smov 0   ;;  %s2074_s0 = inlined_call_operand.vmem [shape: f32[2,64,128], index: 0, kind: input, shape index: {}]   ;;  %s2075_s1 = inlined_call_operand.vmem [shape: f32[1,128], index: 1, kind: input, shape index: {}]   ;;  %s2076_s2 = inlined_call_operand.vmem [shape: f32[1,128], index: 2, kind: input, shape index: {}]   ;;  %s2077_s3 = inlined_call_operand.vmem [shape: bf16[128,384], index: 3, kind: input, shape index: {}]   ;;  %s2078_s4 = inlined_call_operand.vmem [shape: f32[1,384], index: 4, kind: input, shape index: {}]   ;;  %s2079_s5 = inlined_call_operand.vmem [shape: bf16[2,4,64,32], index: 5, kind: output, shape index: {0}]   ;;  %s2080_s6 = inlined_call_operand.vmem [shape: bf16[2,4,64,32], index: 6, kind: output, shape index: {1}]   ;;  %s2081_s7 = inlined_call_operand.vmem [shape: bf16[2,4,64,32], index: 7, kind: output, shape index: {2}]  }
   0x1   :  { %s1701_s26 = smov 0   ;;  %s1703_s27 = smov 0  }
   0x2   :  { %s1705_s28 = smov 0   ;;  %s1707_s29 = smov 0  }
   0x3   :  { %s1709_s30 = smov 0  }
   0x4 LB: > { %s27_s8 = sadd.s32 1, %s1643_s28  ;;  %s30_s9 = sadd.s32 1, %s1647_s29  ;;  %s1651_s30 = sphi %s1709_s30, %s18_s30   ;;  %s1647_s29 = sphi %s1707_s29, %s2088_s29   ;;  %s1643_s28 = sphi %s1705_s28, %s2087_s28   ;;  %s1639_s27 = sphi %s1703_s27, %s2086_s27   ;;  %s1635_s26 = sphi %s1701_s26, %s2085_s26   ;;  %s1631_s25 = sphi %s1699_s25, %s2084_s25   ;;  %s1627_s24 = sphi %s1697_s24, %s2083_s24  }
   0x5   : > { %p28_p0 = scmp.ge.s32.totalorder %s27_s8, 2  ;;  %s1356_s10 = sadd.s32 4294967295, %s1651_s30  }
   0x6   : > { %p161_p1 = scmp.ne.s32.totalorder %s1631_s25, %s1627_s24  ;;  %p162_p2 = scmp.eq.s32.totalorder %s1356_s10, 3 }
   0x7   : > { %s2090_s8 = smov (%p28_p0, %s27_s8), 0  ;;  %s2092_s9 = smov (!%p28_p0, %s30_s9), %s1647_s29 }
   0x8   : > { %s147_s11 = ssub.s32 %s1643_s28, %s2090_s8  ;;  %p32_p3 = scmp.ge.s32.totalorder %s2092_s9, 2 }
   0x9   : > { %p1360_p4 = scmp.ge.s32.totalorder %s1651_s30, 1  ;;  %p1741_p5 = por %p162_p2, %p161_p1 }
   0xa   : > { %p267_p6 = scmp.lt.s32.totalorder %s1651_s30, 5  ;;  %s2094_s9 = smov (%p32_p3, %s2092_s9), 0 }
   0xb   : > { %s146_s13 = ssub.s32 %s1647_s29, %s2094_s9  ;;  %s151_s15 = sadd.s32 1, %s1631_s25 }
   0xc   : > { %p268_p7 = pnand %p1360_p4, %p267_p6  ;;  %s148_s14 = sor.u32 %s147_s11, %s146_s13 }
   0xd   : > { %p149_p8 = scmp.eq.s32.totalorder %s148_s14, 0  ;;  %s1754_s17 = sshll.u32 (!%p268_p7), %s1635_s26, 2  ;;  %v1557_v4 = vld [vmem:[%s2077_s3 + $0x4] ss:$12 sps:$4 sm:$0xff] (!%p268_p7)   ;;  %v1559_v5 = vld [vmem:[%s2077_s3] ss:$12 sps:$4 sm:$0xff] (!%p268_p7)  }
   0xe   : > { %271 = sbr.rel (%p268_p7) target bundleno = 767 (0x2ff), region = 40  ;;  %p311_p9 = scmp.lt.s32.totalorder (!%p268_p7), %s1639_s27, 1  ;;  %v1560_v6 = vld [vmem:[%s2077_s3 + $0x1c] ss:$12 sps:$4 sm:$0xff] (!%p268_p7)   ;;  %574 = vmatprep.subr.bf16.mxu0 (!%p268_p7), %v1557_v4  ;;  %v1563_v24 = vld [vmem:[%s2077_s3 + $0x18] ss:$12 sps:$4 sm:$0xff] (!%p268_p7)  }
   0xf   : > { %s1752_s16 = scalar_select %p149_p8, %s1631_s25, %s151_s15  }
  0x10   : > { %p313_p10 = scmp.lt.s32.totalorder (!%p268_p7), %s1754_s17, 7  ;;  %v1562_v7 = vld [vmem:[%s2077_s3 + $0x8] ss:$12 sps:$4 sm:$0xff] (!%p268_p7)   ;;  %575 = vmatpush1.bf16.msra.mxu0 (!%p268_p7), %v1559_v5  ;;  %v1566_v26 = vld [vmem:[%s2077_s3 + $0x20] ss:$12 sps:$4 sm:$0xff] (!%p268_p7)   ;;  %v1653_v39 = vmov (!%p268_p7), 0  }
  0x11   : > { %1477 = vmatprep.subr.bf16.mxu1 (!%p268_p7), %v1562_v7  ;;  %576 = vmatprep.subr.bf16.mxu0 (!%p268_p7), %v1560_v6  ;;  %v1564_v25 = vld [vmem:[%s2077_s3 + $0x34] ss:$12 sps:$4 sm:$0xff] (!%p268_p7)   ;;  %v1567_v27 = vld [vmem:[%s2077_s3 + $0x30] ss:$12 sps:$4 sm:$0xff] (!%p268_p7)   ;;  %v1568_v28 = vld [vmem:[%s2077_s3 + $0x4c] ss:$12 sps:$4 sm:$0xff] (!%p268_p7)  }
  0x12   : > { %1478 = vmatpush3.bf16.msra.mxu1 (!%p268_p7), %v1562_v7  ;;  %v1570_v29 = vld [vmem:[%s2077_s3 + $0x38] ss:$12 sps:$4 sm:$0xff] (!%p268_p7)   ;;  %v1571_v30 = vld [vmem:[%s2077_s3 + $0x48] ss:$12 sps:$4 sm:$0xff] (!%p268_p7)   ;;  %v1574_v32 = vld [vmem:[%s2077_s3 + $0x50] ss:$12 sps:$4 sm:$0xff] (!%p268_p7)   ;;  %606 = vmatprep.mubr.bf16.mxu0 (!%p268_p7), %v1653_v39 }
  0x13   : > { %1479 = vmatprep.subr.bf16.mxu1 (!%p268_p7), %v1566_v26  ;;  %v1572_v31 = vld [vmem:[%s2077_s3 + $0x64] ss:$12 sps:$4 sm:$0xff] (!%p268_p7)   ;;  %v1575_v33 = vld [vmem:[%s2077_s3 + $0x60] ss:$12 sps:$4 sm:$0xff] (!%p268_p7)   ;;  %v1576_v34 = vld [vmem:[%s2077_s3 + $0x7c] ss:$12 sps:$4 sm:$0xff] (!%p268_p7)  }
  0x14   : > { %577 = vmatpush1.bf16.msra.mxu0 (!%p268_p7), %v1563_v24  ;;  %v1578_v35 = vld [vmem:[%s2077_s3 + $0x68] ss:$12 sps:$4 sm:$0xff] (!%p268_p7)   ;;  %v1579_v36 = vld [vmem:[%s2077_s3 + $0x78] ss:$12 sps:$4 sm:$0xff] (!%p268_p7)   ;;  %v1582_v38 = vld [vmem:[%s2077_s3 + $0x80] ss:$12 sps:$4 sm:$0xff] (!%p268_p7)  }
  0x15   : > { %s312_s18 = scalar_select %p311_p9, %s1639_s27, 1  ;;  %578 = vmatprep.subr.bf16.mxu0 %v1564_v25  ;;  %v1580_v37 = vld [vmem:[%s2077_s3 + $0x94] ss:$12 sps:$4 sm:$0xff]   ;;  %v1583_v40 = vld [vmem:[%s2077_s3 + $0x90] ss:$12 sps:$4 sm:$0xff]   ;;  %vm696_vm0 = vcmask 257024  }
  0x16   : > { %s314_s19 = scalar_select %p313_p10, %s1754_s17, 7  ;;  %1480 = vmatpush3.bf16.msra.mxu1 %v1566_v26  ;;  %v1584_v41 = vld [vmem:[%s2077_s3 + $0xac] ss:$12 sps:$4 sm:$0xff]   ;;  %v1587_v43 = vld [vmem:[%s2077_s3 + $0xa8] ss:$12 sps:$4 sm:$0xff]  }
  0x17   : > { %s1365_s20 = sshll.u32 %s312_s18, 3  ;;  %1481 = vmatprep.subr.bf16.mxu1 %v1570_v29  ;;  %v1586_v42 = vld [vmem:[%s2077_s3 + $0x98] ss:$12 sps:$4 sm:$0xff]   ;;  %v1588_v44 = vld [vmem:[%s2077_s3 + $0xb0] ss:$12 sps:$4 sm:$0xff]   ;;  %s1656_s26 = smov 32  }
  0x18   : > { %s316_s21 = sadd.s32 %s1365_s20, %s314_s19  ;;  %579 = vmatpush1.bf16.msra.mxu0 %v1567_v27  ;;  %v1367_v59 = vld [vmem:[%s2075_s1] ss:$0 sm:$0xff]  ;;  %s295_s20 = sand.u32 1, %s1627_s24  }
  0x19   : > { %s1366_s22 = sshll.u32 %s316_s21, 3  ;;  %580 = vmatprep.subr.bf16.mxu0 %v1568_v28  ;;  %s1865_s21 = sshll.u32 %s295_s20, 6 }
  0x1a   : > { %s318_s11 = scalar_lea.vmem %s2074_s0, %s1366_s22  ;;  %1482 = vmatpush3.bf16.msra.mxu1 %v1570_v29  ;;  %s1868_s24 = scalar_lea.vmem [#allocation2], %s1865_s21 }
  0x1b   : > { %v324_v0 = vld [vmem:[%s318_s11] sm:$0xff]  ;;  %v326_v1 = vld [vmem:[%s318_s11 + $0x10] sm:$0xff]  ;;  %v325_v2 = vld [vmem:[%s318_s11 + $0x8] sm:$0xff]  ;;  %1483 = vmatprep.subr.bf16.mxu1 %v1574_v32  ;;  %s1654_s22 = smov 96   ;;  %s1874_s23 = scalar_lea.vmem [#allocation3], %s1865_s21 }
  0x1c   : > { %330 = vadd.xlane.f32.xlu0 %v324_v0  ;;  %334 = vadd.xlane.f32.xlu1 %v326_v1  ;;  %v327_v3 = vld [vmem:[%s318_s11 + $0x18] sm:$0xff]  ;;  %s1884_s10 = scalar_lea.vmem [#allocation4], %s1865_s21  ;;  %s1655_s11 = smov 64  }
  0x1d   : > { %581 = vmatpush1.bf16.msra.mxu0 %v1571_v30  ;;  %s1445_s13 = sshll.u32 (%p1741_p5), %s1639_s27, 5 }
  0x1e   : > { %582 = vmatprep.subr.bf16.mxu0 %v1572_v31  ;;  %1484 = vmatpush3.bf16.msra.mxu1 %v1574_v32  ;;  %s907_s14 = sadd.s32 (%p1741_p5), %s1445_s13, %s1754_s17 }
  0x1f   : > { %1485 = vmatprep.subr.bf16.mxu1 %v1578_v35  ;;  %s1446_s15 = sshll.u32 (%p1741_p5), %s907_s14, 2 }
  0x20   : > { %332 = vadd.xlane.f32.xlu0 %v325_v2  ;;  %336 = vadd.xlane.f32.xlu1 %v327_v3  ;;  %s909_s20 = scalar_lea.vmem (%p1741_p5), %s2079_s5, %s1446_s15 }
  0x21   : > { %583 = vmatpush1.bf16.msra.mxu0 %v1575_v33 }
  0x22   : > { %584 = vmatprep.subr.bf16.mxu0 %v1576_v34  ;;  %1486 = vmatpush3.bf16.msra.mxu1 %v1578_v35 }
  0x23   : > { %1487 = vmatprep.subr.bf16.mxu1 %v1582_v38 }
  0x25   : > { %585 = vmatpush1.bf16.msra.mxu0 %v1579_v36 }
  0x26   : > { %586 = vmatprep.subr.bf16.mxu0 %v1580_v37  ;;  %1488 = vmatpush3.bf16.msra.mxu1 %v1582_v38 }
  0x27   : > { %1489 = vmatprep.subr.bf16.mxu1 %v1586_v42 }
  0x29   : > { %587 = vmatpush1.bf16.msra.mxu0 %v1583_v40 }
  0x2a   : > { %588 = vmatprep.subr.bf16.mxu0 %v1584_v41  ;;  %1490 = vmatpush3.bf16.msra.mxu1 %v1586_v42 }
  0x2b   : > { %1491 = vmatprep.subr.bf16.mxu1 %v1588_v44 }
  0x2d   : > { %589 = vmatpush1.bf16.msra.mxu0 %v1587_v43 }
  0x2e   : > { %1492 = vmatpush3.bf16.msra.mxu1 %v1588_v44 }
  0xa9   : > { %v331_v8 = vpop.xlane.xlu0 %330  ;;  %v335_v9 = vpop.xlane.xlu1 %334 }
  0xaa   : > { %v339_v10 = vmul.f32 0.0078125, %v331_v8  ;;  %v341_v11 = vmul.f32 0.0078125, %v335_v9 }
  0xac   : > { %v1775_v12 = vsub.f32 %v324_v0, %v339_v10  ;;  %v1777_v13 = vsub.f32 %v326_v1, %v341_v11  ;;  %v1368_v0 = vld [vmem:[%s2076_s2] ss:$0 sm:$0xff] }
  0xad   : > { %v333_v14 = vpop.xlane.xlu0 %332  ;;  %v337_v15 = vpop.xlane.xlu1 %336 }
  0xae   : > { %v340_v16 = vmul.f32 0.0078125, %v333_v14  ;;  %v347_v17 = vmul.f32 %v1775_v12, %v1775_v12  ;;  %v342_v18 = vmul.f32 0.0078125, %v337_v15  ;;  %v349_v21 = vmul.f32 %v1777_v13, %v1777_v13 }
  0xaf   : > { %v431_v14 = vlaneseq }
  0xb0   : > { %v1781_v19 = vsub.f32 %v325_v2, %v340_v16  ;;  %351 = vadd.xlane.f32.xlu0 %v347_v17  ;;  %v1783_v20 = vsub.f32 %v327_v3, %v342_v18  ;;  %v429_v16 = vld [vmem:[%s2078_s4] sm:$0x7] }
  0xb2   : > { %v348_v22 = vmul.f32 %v1781_v19, %v1781_v19  ;;  %v350_v23 = vmul.f32 %v1783_v20, %v1783_v20 }
  0xb4   : > { %355 = vadd.xlane.f32.xlu0 %v349_v21  ;;  %353 = vadd.xlane.f32.xlu1 %v348_v22 }
  0xb8   : > { %357 = vadd.xlane.f32.xlu1 %v350_v23 }
 0x13d   : > { %v352_v45 = vpop.xlane.xlu0 %351 }
 0x13e   : > { %v359_v46 = vmul.f32 0.0078125, %v352_v45 }
 0x140   : > { %v363_v47 = vadd.f32 1e-05, %v359_v46 }
 0x141   : > { %v354_v48 = vpop.xlane.xlu1 %353  ;;  %v356_v49 = vpop.xlane.xlu0 %355 }
 0x142   : > { %1589 = vrsqrt.f32 %v363_v47  ;;  %v360_v50 = vmul.f32 0.0078125, %v354_v48  ;;  %v361_v51 = vmul.f32 0.0078125, %v356_v49 }
 0x144   : > { %v364_v52 = vadd.f32 1e-05, %v360_v50  ;;  %v365_v53 = vadd.f32 1e-05, %v361_v51 }
 0x145   : > { %v358_v54 = vpop.xlane.xlu1 %357 }
 0x146   : > { %1591 = vrsqrt.f32 %v364_v52  ;;  %v362_v55 = vmul.f32 0.0078125, %v358_v54 }
 0x147   : > { %1593 = vrsqrt.f32 %v365_v53 }
 0x148   : > { %v366_v56 = vadd.f32 1e-05, %v362_v55 }
 0x14a   : > { %1595 = vrsqrt.f32 %v366_v56 }
 0x14c   : > { %v1590_v57 = vpop.eup %1589 }
 0x14d   : > { %v371_v58 = vmul.f32 %v1590_v57, %v1775_v12 }
 0x14f   : > { %v381_v63 = vmul.f32 %v1367_v59, %v371_v58 }
 0x150   : > { %v1592_v60 = vpop.eup %1591 }
 0x151   : > { %v1594_v61 = vpop.eup %1593  ;;  %v372_v62 = vmul.f32 %v1592_v60, %v1781_v19  ;;  %v391_v4 = vadd.f32 %v1368_v0, %v381_v63 }
 0x152   : > { %v373_v1 = vmul.f32 %v1594_v61, %v1777_v13  ;;  %v432_v13 = vshrl.u32 %v431_v14, 7 }
 0x153   : > { %v382_v2 = vmul.f32 %v1367_v59, %v372_v62 }
 0x154   : > { %v1596_v3 = vpop.eup %1595  ;;  %v383_v7 = vmul.f32 %v1367_v59, %v373_v1  ;;  %v433_v15 = vsub.s32 0, %v432_v13  ;;  %v437_v17 = vsub.s32 1, %v432_v13  ;;  %v441_v19 = vsub.s32 2, %v432_v13 }
 0x155   : > { %v392_v5 = vadd.f32 %v1368_v0, %v382_v2  ;;  %v374_v6 = vmul.f32 %v1596_v3, %v1783_v20 }
 0x156   : > { %v393_v10 = vadd.f32 %v1368_v0, %v383_v7  ;;  %v434_v18 = vrot.slane %v429_v16, %v433_v15  ;;  %v438_v20 = vrot.slane %v429_v16, %v437_v17  ;;  %v442_v24 = vrot.slane %v429_v16, %v441_v19 }
 0x157   : > { %v395_v8 = vpack.c.bf16 %v392_v5, %v391_v4  ;;  %v384_v9 = vmul.f32 %v1367_v59, %v374_v6 }
 0x159   : > { %607 = vmatmul.mubr.bf16.vlgmr.msra.gmra.mrb[0].mxu0 %v395_v8  ;;  %1493 = vmatprep.mubr.bf16.mxu1 %v395_v8  ;;  %v394_v11 = vadd.f32 %v1368_v0, %v384_v9 }
 0x15a   : > { %616 = vmatprep.mubr.bf16.mxu0 %v1653_v39 }
 0x15b   : > { %v396_v12 = vpack.c.bf16 %v394_v11, %v393_v10 }
 0x15d   : > { %1494 = vmatmul.mubr.bf16.vlgmr.msra.gmra.mrb[0].mxu1 %v396_v12 }
 0x161   : > { %617 = vmatmul.mubr.bf16.gmra.mrb[4].mxu0 %v396_v12 }
 0x22c   : > { %v608_v21 = vpop.f32.mrb[0].mxu0 }
 0x22d   : > { %v609_v22 = vadd.f32 %v608_v21, %v434_v18  ;;  %v610_v23 = vpop.f32.mrb[1].mxu0 }
 0x22e   : > { %v611_v25 = vadd.f32 %v610_v23, %v438_v20  ;;  %v612_v26 = vpop.f32.mrb[2].mxu0 }
 0x22f   : > { %v1455_v27 = vpack.c.bf16 %v609_v22, %v609_v22  ;;  %v613_v28 = vadd.f32 %v612_v26, %v434_v18  ;;  %v614_v29 = vpop.f32.mrb[3].mxu0 }
 0x230   : > { %v1459_v30 = vpack.c.bf16 %v611_v25, %v611_v25  ;;  %v615_v31 = vadd.f32 %v614_v29, %v438_v20  ;;  %v1495_v32 = vpop.f32.mrb[0].mxu1 }
 0x231   : > { %697 = vst.msk [vmem:[%s1868_s24] sm:$0xf] %vm696_vm0, %v1455_v27  ;;  %v1456_v33 = vpack.c.bf16 %v613_v28, %v613_v28  ;;  %v670_v34 = vadd.f32 %v1495_v32, %v442_v24  ;;  %737 = vrot.lane.b32.xlu0 %v1455_v27, %s1654_s22  ;;  %v661_v35 = vpop.f32.mrb[1].mxu1 }
 0x232   : > { %715 = vst.msk [vmem:[%s1874_s23] sm:$0xf] %vm696_vm0, %v1459_v30  ;;  %v1460_v36 = vpack.c.bf16 %v615_v31, %v615_v31  ;;  %v662_v37 = vadd.f32 %v661_v35, %v442_v24  ;;  %v1496_v38 = vpop.f32.mrb[2].mxu1 }
 0x233   : > { %698 = vst.msk [vmem:[%s1868_s24 + $0x4] sm:$0xf] %vm696_vm0, %v1456_v33  ;;  %v1465_v39 = vpack.c.bf16 %v670_v34, %v670_v34  ;;  %v673_v40 = vadd.f32 %v1496_v38, %v442_v24  ;;  %739 = vrot.lane.b32.xlu1 %v1456_v33, %s1654_s22  ;;  %v664_v41 = vpop.f32.mrb[3].mxu1 }
 0x234   : > { %716 = vst.msk [vmem:[%s1874_s23 + $0x4] sm:$0xf] %vm696_vm0, %v1460_v36  ;;  %v1463_v42 = vpack.c.bf16 %v662_v37, %v662_v37  ;;  %v665_v43 = vadd.f32 %v664_v41, %v442_v24  ;;  %v618_v44 = vpop.f32.mrb[4].mxu0 }
 0x235   : > { %735 = vst.msk [vmem:[%s1884_s10 + $0x8] sm:$0xf] %vm696_vm0, %v1465_v39  ;;  %v1466_v45 = vpack.c.bf16 %v673_v40, %v673_v40  ;;  %v619_v46 = vadd.f32 %v618_v44, %v434_v18  ;;  %788 = vrot.lane.b32.xlu0 %v1455_v27, %s1655_s11  ;;  %v620_v47 = vpop.f32.mrb[5].mxu0 }
 0x236   : > { %733 = vst.msk [vmem:[%s1884_s10] sm:$0xf] %vm696_vm0, %v1463_v42  ;;  %v1464_v48 = vpack.c.bf16 %v665_v43, %v665_v43  ;;  %v621_v49 = vadd.f32 %v620_v47, %v438_v20  ;;  %v622_v50 = vpop.f32.mrb[6].mxu0 }
 0x237   : > { %736 = vst.msk [vmem:[%s1884_s10 + $0xc] sm:$0xf] %vm696_vm0, %v1466_v45  ;;  %v1457_v51 = vpack.c.bf16 %v619_v46, %v619_v46  ;;  %v623_v52 = vadd.f32 %v622_v50, %v434_v18  ;;  %790 = vrot.lane.b32.xlu1 %v1456_v33, %s1655_s11  ;;  %v624_v53 = vpop.f32.mrb[7].mxu0 }
 0x238   : > { %734 = vst.msk [vmem:[%s1884_s10 + $0x4] sm:$0xf] %vm696_vm0, %v1464_v48  ;;  %v1461_v54 = vpack.c.bf16 %v621_v49, %v621_v49  ;;  %v625_v55 = vadd.f32 %v624_v53, %v438_v20 }
 0x239   : > { %699 = vst.msk [vmem:[%s1868_s24 + $0x8] sm:$0xf] %vm696_vm0, %v1457_v51  ;;  %v1458_v56 = vpack.c.bf16 %v623_v52, %v623_v52  ;;  %839 = vrot.lane.b32.xlu0 %v1455_v27, %s1656_s26 }
 0x23a   : > { %717 = vst.msk [vmem:[%s1874_s23 + $0x8] sm:$0xf] %vm696_vm0, %v1461_v54  ;;  %v1462_v57 = vpack.c.bf16 %v625_v55, %v625_v55 }
 0x23b   : > { %700 = vst.msk [vmem:[%s1868_s24 + $0xc] sm:$0xf] %vm696_vm0, %v1458_v56  ;;  %841 = vrot.lane.b32.xlu1 %v1456_v33, %s1656_s26 }
 0x23c   : > { %718 = vst.msk [vmem:[%s1874_s23 + $0xc] sm:$0xf] %vm696_vm0, %v1462_v57 }
 0x23d   : > { %754 = vrot.lane.b32.xlu0 %v1459_v30, %s1654_s22 }
 0x23f   : > { %756 = vrot.lane.b32.xlu1 %v1460_v36, %s1654_s22 }
 0x241   : > { %775 = vrot.lane.b32.xlu0 %v1465_v39, %s1654_s22 }
 0x242   : > { %v929_v31 = vld [vmem:[%s1868_s24 + $0x8] sm:$0xff] (%p1741_p5)  }
 0x243   : > { %777 = vrot.lane.b32.xlu1 %v1466_v45, %s1654_s22  ;;  %930 = vst [vmem:[%s909_s20 + $0x8] sm:$0xff] (%p1741_p5), %v929_v31  }
 0x245   : > { %805 = vrot.lane.b32.xlu0 %v1459_v30, %s1655_s11 }
 0x247   : > { %807 = vrot.lane.b32.xlu1 %v1460_v36, %s1655_s11 }
 0x249   : > { %826 = vrot.lane.b32.xlu0 %v1465_v39, %s1655_s11 }
 0x24b   : > { %828 = vrot.lane.b32.xlu1 %v1466_v45, %s1655_s11 }
 0x24d   : > { %856 = vrot.lane.b32.xlu0 %v1459_v30, %s1656_s26  ;;  %v925_v30 = vld [vmem:[%s1868_s24] sm:$0xff] (%p1741_p5)  }
 0x24e   : > { %926 = vst [vmem:[%s909_s20] sm:$0xff] (%p1741_p5), %v925_v30  }
 0x24f   : > { %858 = vrot.lane.b32.xlu1 %v1460_v36, %s1656_s26 }
 0x251   : > { %771 = vrot.lane.b32.xlu0 %v1463_v42, %s1654_s22 }
 0x253   : > { %773 = vrot.lane.b32.xlu1 %v1464_v48, %s1654_s22 }
 0x255   : > { %822 = vrot.lane.b32.xlu0 %v1463_v42, %s1655_s11 }
 0x257   : > { %824 = vrot.lane.b32.xlu1 %v1464_v48, %s1655_s11 }
 0x259   : > { %873 = vrot.lane.b32.xlu0 %v1463_v42, %s1656_s26 }
 0x25b   : > { %875 = vrot.lane.b32.xlu1 %v1464_v48, %s1656_s26 }
 0x25d   : > { %792 = vrot.lane.b32.xlu0 %v1457_v51, %s1655_s11 }
 0x25f   : > { %741 = vrot.lane.b32.xlu1 %v1457_v51, %s1654_s22 }
 0x261   : > { %843 = vrot.lane.b32.xlu0 %v1457_v51, %s1656_s26 }
 0x263   : > { %743 = vrot.lane.b32.xlu1 %v1458_v56, %s1654_s22 }
 0x265   : > { %758 = vrot.lane.b32.xlu0 %v1461_v54, %s1654_s22 }
 0x267   : > { %794 = vrot.lane.b32.xlu1 %v1458_v56, %s1655_s11 }
 0x269   : > { %809 = vrot.lane.b32.xlu0 %v1461_v54, %s1655_s11 }
 0x26b   : > { %845 = vrot.lane.b32.xlu1 %v1458_v56, %s1656_s26 }
 0x26d   : > { %860 = vrot.lane.b32.xlu0 %v1461_v54, %s1656_s26 }
 0x26f   : > { %760 = vrot.lane.b32.xlu1 %v1462_v57, %s1654_s22 }
 0x271   : > { %877 = vrot.lane.b32.xlu0 %v1465_v39, %s1656_s26 }
 0x273   : > { %811 = vrot.lane.b32.xlu1 %v1462_v57, %s1655_s11 }
 0x277   : > { %862 = vrot.lane.b32.xlu1 %v1462_v57, %s1656_s26 }
 0x27b   : > { %879 = vrot.lane.b32.xlu1 %v1466_v45, %s1656_s26 }
 0x2a3   : > { %v738_v58 = vpop.permute.xlu0 %737 }
 0x2a4   : > { %1405 = vst.msk [vmem:[%s1868_s24 + $0x10] sm:$0xf] %vm696_vm0, %v738_v58 }
 0x2a5   : > { %v740_v59 = vpop.permute.xlu1 %739 }
 0x2a6   : > { %1406 = vst.msk [vmem:[%s1868_s24 + $0x14] sm:$0xf] %vm696_vm0, %v740_v59 }
 0x2a7   : > { %v789_v60 = vpop.permute.xlu0 %788 }
 0x2a8   : > { %1417 = vst.msk [vmem:[%s1868_s24 + $0x20] sm:$0xf] %vm696_vm0, %v789_v60 }
 0x2a9   : > { %v791_v61 = vpop.permute.xlu1 %790 }
 0x2aa   : > { %1418 = vst.msk [vmem:[%s1868_s24 + $0x24] sm:$0xf] %vm696_vm0, %v791_v61 }
 0x2ab   : > { %v840_v62 = vpop.permute.xlu0 %839 }
 0x2ac   : > { %1429 = vst.msk [vmem:[%s1868_s24 + $0x30] sm:$0xf] %vm696_vm0, %v840_v62 }
 0x2ad   : > { %v842_v63 = vpop.permute.xlu1 %841  ;;  %v933_v32 = vld [vmem:[%s1868_s24 + $0x10] sm:$0xff] (%p1741_p5)  }
 0x2ae   : > { %1430 = vst.msk [vmem:[%s1868_s24 + $0x34] sm:$0xf] %vm696_vm0, %v842_v63  ;;  %934 = vst [vmem:[%s909_s20 + $0x20] sm:$0xff] (%p1741_p5), %v933_v32  }
 0x2af   : > { %v755_v0 = vpop.permute.xlu0 %754 }
 0x2b0   : > { %1409 = vst.msk [vmem:[%s1874_s23 + $0x10] sm:$0xf] %vm696_vm0, %v755_v0 }
 0x2b1   : > { %v757_v1 = vpop.permute.xlu1 %756  ;;  %v941_v34 = vld [vmem:[%s1868_s24 + $0x20] sm:$0xff] (%p1741_p5)  }
 0x2b2   : > { %1410 = vst.msk [vmem:[%s1874_s23 + $0x14] sm:$0xf] %vm696_vm0, %v757_v1  ;;  %942 = vst [vmem:[%s909_s20 + $0x40] sm:$0xff] (%p1741_p5), %v941_v34  }
 0x2b3   : > { %v776_v2 = vpop.permute.xlu0 %775 }
 0x2b4   : > { %1415 = vst.msk [vmem:[%s1884_s10 + $0x18] sm:$0xf] %vm696_vm0, %v776_v2 }
 0x2b5   : > { %v778_v3 = vpop.permute.xlu1 %777  ;;  %v949_v36 = vld [vmem:[%s1868_s24 + $0x30] sm:$0xff] (%p1741_p5)  }
 0x2b6   : > { %1416 = vst.msk [vmem:[%s1884_s10 + $0x1c] sm:$0xf] %vm696_vm0, %v778_v3  ;;  %950 = vst [vmem:[%s909_s20 + $0x60] sm:$0xff] (%p1741_p5), %v949_v36  }
 0x2b7   : > { %v806_v4 = vpop.permute.xlu0 %805 }
 0x2b8   : > { %1421 = vst.msk [vmem:[%s1874_s23 + $0x20] sm:$0xf] %vm696_vm0, %v806_v4 }
 0x2b9   : > { %v808_v5 = vpop.permute.xlu1 %807 }
 0x2ba   : > { %1422 = vst.msk [vmem:[%s1874_s23 + $0x24] sm:$0xf] %vm696_vm0, %v808_v5 }
 0x2bb   : > { %v827_v6 = vpop.permute.xlu0 %826 }
 0x2bc   : > { %1427 = vst.msk [vmem:[%s1884_s10 + $0x28] sm:$0xf] %vm696_vm0, %v827_v6 }
 0x2bd   : > { %v829_v7 = vpop.permute.xlu1 %828 }
 0x2be   : > { %1428 = vst.msk [vmem:[%s1884_s10 + $0x2c] sm:$0xf] %vm696_vm0, %v829_v7 }
 0x2bf   : > { %v857_v8 = vpop.permute.xlu0 %856 }
 0x2c0   : > { %1433 = vst.msk [vmem:[%s1874_s23 + $0x30] sm:$0xf] %vm696_vm0, %v857_v8 }
 0x2c1   : > { %v859_v9 = vpop.permute.xlu1 %858 }
 0x2c2   : > { %1434 = vst.msk [vmem:[%s1874_s23 + $0x34] sm:$0xf] %vm696_vm0, %v859_v9 }
 0x2c3   : > { %v772_v10 = vpop.permute.xlu0 %771 }
 0x2c4   : > { %1413 = vst.msk [vmem:[%s1884_s10 + $0x10] sm:$0xf] %vm696_vm0, %v772_v10 }
 0x2c5   : > { %v774_v11 = vpop.permute.xlu1 %773 }
 0x2c6   : > { %1414 = vst.msk [vmem:[%s1884_s10 + $0x14] sm:$0xf] %vm696_vm0, %v774_v11 }
 0x2c7   : > { %v823_v12 = vpop.permute.xlu0 %822 }
 0x2c8   : > { %1425 = vst.msk [vmem:[%s1884_s10 + $0x20] sm:$0xf] %vm696_vm0, %v823_v12 }
 0x2c9   : > { %v825_v14 = vpop.permute.xlu1 %824 }
 0x2ca   : > { %1426 = vst.msk [vmem:[%s1884_s10 + $0x24] sm:$0xf] %vm696_vm0, %v825_v14 }
 0x2cb   : > { %v874_v13 = vpop.permute.xlu0 %873 }
 0x2cc   : > { %1437 = vst.msk [vmem:[%s1884_s10 + $0x30] sm:$0xf] %vm696_vm0, %v874_v13 }
 0x2cd   : > { %v876_v15 = vpop.permute.xlu1 %875 }
 0x2ce   : > { %1438 = vst.msk [vmem:[%s1884_s10 + $0x34] sm:$0xf] %vm696_vm0, %v876_v15 }
 0x2cf   : > { %v793_v16 = vpop.permute.xlu0 %792 }
 0x2d0   : > { %1419 = vst.msk [vmem:[%s1868_s24 + $0x28] sm:$0xf] %vm696_vm0, %v793_v16 }
 0x2d1   : > { %v742_v17 = vpop.permute.xlu1 %741 }
 0x2d2   : > { %1407 = vst.msk [vmem:[%s1868_s24 + $0x18] sm:$0xf] %vm696_vm0, %v742_v17 }
 0x2d3   : > { %v844_v18 = vpop.permute.xlu0 %843 }
 0x2d4   : > { %1431 = vst.msk [vmem:[%s1868_s24 + $0x38] sm:$0xf] %vm696_vm0, %v844_v18 }
 0x2d5   : > { %v744_v19 = vpop.permute.xlu1 %743 }
 0x2d6   : > { %1408 = vst.msk [vmem:[%s1868_s24 + $0x1c] sm:$0xf] %vm696_vm0, %v744_v19 }
 0x2d7   : > { %v759_v20 = vpop.permute.xlu0 %758 }
 0x2d8   : > { %1411 = vst.msk [vmem:[%s1874_s23 + $0x18] sm:$0xf] %vm696_vm0, %v759_v20 }
 0x2d9   : > { %v795_v21 = vpop.permute.xlu1 %794 }
 0x2da   : > { %1420 = vst.msk [vmem:[%s1868_s24 + $0x2c] sm:$0xf] %vm696_vm0, %v795_v21 }
 0x2db   : > { %v810_v22 = vpop.permute.xlu0 %809 }
 0x2dc   : > { %1423 = vst.msk [vmem:[%s1874_s23 + $0x28] sm:$0xf] %vm696_vm0, %v810_v22 }
 0x2dd   : > { %v846_v23 = vpop.permute.xlu1 %845  ;;  %v937_v33 = vld [vmem:[%s1868_s24 + $0x18] sm:$0xff] (%p1741_p5)  }
 0x2de   : > { %1432 = vst.msk [vmem:[%s1868_s24 + $0x3c] sm:$0xf] %vm696_vm0, %v846_v23  ;;  %938 = vst [vmem:[%s909_s20 + $0x28] sm:$0xff] (%p1741_p5), %v937_v33  }
 0x2df   : > { %v861_v24 = vpop.permute.xlu0 %860 }
 0x2e0   : > { %1435 = vst.msk [vmem:[%s1874_s23 + $0x38] sm:$0xf] %vm696_vm0, %v861_v24 }
 0x2e1   : > { %v761_v25 = vpop.permute.xlu1 %760  ;;  %v945_v35 = vld [vmem:[%s1868_s24 + $0x28] sm:$0xff] (%p1741_p5)  }
 0x2e2   : > { %1412 = vst.msk [vmem:[%s1874_s23 + $0x1c] sm:$0xf] %vm696_vm0, %v761_v25  ;;  %946 = vst [vmem:[%s909_s20 + $0x48] sm:$0xff] (%p1741_p5), %v945_v35  }
 0x2e3   : > { %v878_v26 = vpop.permute.xlu0 %877 }
 0x2e4   : > { %1439 = vst.msk [vmem:[%s1884_s10 + $0x38] sm:$0xf] %vm696_vm0, %v878_v26 }
 0x2e5   : > { %v812_v27 = vpop.permute.xlu1 %811  ;;  %v953_v37 = vld [vmem:[%s1868_s24 + $0x38] sm:$0xff] (%p1741_p5)  }
 0x2e6   : > { %1424 = vst.msk [vmem:[%s1874_s23 + $0x2c] sm:$0xf] %vm696_vm0, %v812_v27  ;;  %954 = vst [vmem:[%s909_s20 + $0x68] sm:$0xff] (%p1741_p5), %v953_v37  }
 0x2e8   : > { %904 = sbr.rel (!%p1741_p5) target bundleno = 751 (0x2ef), region = 44 }
 0x2e9   : > { %v863_v28 = vpop.permute.xlu1 %862 }
 0x2ea   : > { %1436 = vst.msk [vmem:[%s1874_s23 + $0x3c] sm:$0xf] %vm696_vm0, %v863_v28 }
 0x2ed   : > { %v880_v29 = vpop.permute.xlu1 %879 }
 0x2ee   : > { %1440 = vst.msk [vmem:[%s1884_s10 + $0x3c] sm:$0xf] %vm696_vm0, %v880_v29 }
 0x2ef PF: > { %1011 = sbr.rel (!%p1741_p5) target bundleno = 759 (0x2f7), region = 85  ;;  %s1448_s21 = sshll.u32 (%p1741_p5), %s1639_s27, 5  ;;  %v1032_v38 = vld [vmem:[%s1874_s23] sm:$0xff] (%p1741_p5)   ;;  %v1036_v39 = vld [vmem:[%s1874_s23 + $0x8] sm:$0xff] (%p1741_p5)   ;;  %v1040_v40 = vld [vmem:[%s1874_s23 + $0x10] sm:$0xff] (%p1741_p5)  }
 0x2f0   : > { %s1014_s24 = sadd.s32 (%p1741_p5), %s1448_s21, %s1754_s17  ;;  %v1044_v41 = vld [vmem:[%s1874_s23 + $0x18] sm:$0xff] (%p1741_p5)   ;;  %v1048_v42 = vld [vmem:[%s1874_s23 + $0x20] sm:$0xff] (%p1741_p5)   ;;  %v1052_v43 = vld [vmem:[%s1874_s23 + $0x28] sm:$0xff] (%p1741_p5)  }
 0x2f1   : > { %s1449_s22 = sshll.u32 (%p1741_p5), %s1014_s24, 2  ;;  %v1056_v44 = vld [vmem:[%s1874_s23 + $0x30] sm:$0xff] (%p1741_p5)   ;;  %v1060_v45 = vld [vmem:[%s1874_s23 + $0x38] sm:$0xff] (%p1741_p5)  }
 0x2f2   : > { %s1016_s13 = scalar_lea.vmem (%p1741_p5), %s2080_s6, %s1449_s22 }
 0x2f3   : > { %1033 = vst [vmem:[%s1016_s13] sm:$0xff] (%p1741_p5), %v1032_v38   ;;  %1037 = vst [vmem:[%s1016_s13 + $0x8] sm:$0xff] (%p1741_p5), %v1036_v39  }
 0x2f4   : > { %1041 = vst [vmem:[%s1016_s13 + $0x20] sm:$0xff] (%p1741_p5), %v1040_v40   ;;  %1045 = vst [vmem:[%s1016_s13 + $0x28] sm:$0xff] (%p1741_p5), %v1044_v41  }
 0x2f5   : > { %1049 = vst [vmem:[%s1016_s13 + $0x40] sm:$0xff] (%p1741_p5), %v1048_v42   ;;  %1053 = vst [vmem:[%s1016_s13 + $0x48] sm:$0xff] (%p1741_p5), %v1052_v43  }
 0x2f6   : > { %1057 = vst [vmem:[%s1016_s13 + $0x60] sm:$0xff] %v1056_v44   ;;  %1061 = vst [vmem:[%s1016_s13 + $0x68] sm:$0xff] %v1060_v45  }
 0x2f7 PF: > { %1118 = sbr.rel (!%p1741_p5) target bundleno = 767 (0x2ff), region = 126  ;;  %s1451_s23 = sshll.u32 (%p1741_p5), %s1639_s27, 5  ;;  %v1139_v46 = vld [vmem:[%s1884_s10] sm:$0xff] (%p1741_p5)   ;;  %v1143_v47 = vld [vmem:[%s1884_s10 + $0x8] sm:$0xff] (%p1741_p5)   ;;  %v1147_v48 = vld [vmem:[%s1884_s10 + $0x10] sm:$0xff] (%p1741_p5)  }
 0x2f8   : > { %s1121_s14 = sadd.s32 (%p1741_p5), %s1451_s23, %s1754_s17  ;;  %v1151_v49 = vld [vmem:[%s1884_s10 + $0x18] sm:$0xff] (%p1741_p5)   ;;  %v1155_v50 = vld [vmem:[%s1884_s10 + $0x20] sm:$0xff] (%p1741_p5)   ;;  %v1159_v51 = vld [vmem:[%s1884_s10 + $0x28] sm:$0xff] (%p1741_p5)  }
 0x2f9   : > { %s1452_s12 = sshll.u32 (%p1741_p5), %s1121_s14, 2  ;;  %v1163_v52 = vld [vmem:[%s1884_s10 + $0x30] sm:$0xff] (%p1741_p5)   ;;  %v1167_v53 = vld [vmem:[%s1884_s10 + $0x38] sm:$0xff] (%p1741_p5)  }
 0x2fa   : > { %s1123_s19 = scalar_lea.vmem (%p1741_p5), %s2081_s7, %s1452_s12 }
 0x2fb   : > { %1140 = vst [vmem:[%s1123_s19] sm:$0xff] (%p1741_p5), %v1139_v46   ;;  %1144 = vst [vmem:[%s1123_s19 + $0x8] sm:$0xff] (%p1741_p5), %v1143_v47  }
 0x2fc   : > { %1148 = vst [vmem:[%s1123_s19 + $0x20] sm:$0xff] (%p1741_p5), %v1147_v48   ;;  %1152 = vst [vmem:[%s1123_s19 + $0x28] sm:$0xff] (%p1741_p5), %v1151_v49  }
 0x2fd   : > { %1156 = vst [vmem:[%s1123_s19 + $0x40] sm:$0xff] (%p1741_p5), %v1155_v50   ;;  %1160 = vst [vmem:[%s1123_s19 + $0x48] sm:$0xff] (%p1741_p5), %v1159_v51  }
 0x2fe   : > { %1164 = vst [vmem:[%s1123_s19 + $0x60] sm:$0xff] %v1163_v52   ;;  %1168 = vst [vmem:[%s1123_s19 + $0x68] sm:$0xff] %v1167_v53  }
 0x2ff PF: > { %s18_s30 = sadd.s32 1, %s1651_s30   ;;  %s2083_s24 = smov %s1631_s25 }
 0x300   : > { %p15_p11 = scmp.ge.s32.totalorder %s18_s30, 6   ;;  %s2084_s25 = smov %s1752_s16 }
 0x301   : > { %s2085_s26 = smov %s1643_s28  ;;  %s2086_s27 = smov %s1647_s29 }
 0x302   : > { %s2087_s28 = smov %s2090_s8  ;;  %s2088_s29 = smov %s2094_s9 }
 0x303   :  { %17 = sbr.rel (!%p15_p11) target bundleno = 4 (0x4), region = 226 }

// kernel: audio_encoder_forward.17
= control target key start
LH: loop header
LB: loop body
LE: loop exit
PB: predicated region body
PF: predicated region fallthrough
CT: control target
= control target key end

     0   :  { %8 = vsyncpa [#allocation3], 0  ;;  %s743_s0 = inlined_call_operand.vmem [shape: f32[2,64,128], index: 0, kind: input, shape index: {}]   ;;  %s744_s1 = inlined_call_operand.vmem [shape: f32[1,128], index: 1, kind: input, shape index: {}]   ;;  %s745_s2 = inlined_call_operand.vmem [shape: f32[1,128], index: 2, kind: input, shape index: {}]   ;;  %s746_s3 = inlined_call_operand.hbm [shape: f32[2,64,128], index: 3, kind: output, shape index: {}]  }
   0x1   :  { %10 = vsyncpa [#allocation3 + $0x1], 0  ;;  %s590_s12 = smov 0   ;;  %s592_s13 = smov 0  }
   0x2   :  { %s594_s14 = smov 0   ;;  %s596_s15 = smov 0  }
   0x3   :  { %s598_s16 = smov 0   ;;  %s600_s17 = smov 0  }
   0x4   :  { %s602_s18 = smov 0   ;;  %s604_s19 = smov 0  }
   0x5 LB: > { %s373_s20 = sadd.s32 4294967295, %s565_s19   ;;  %s374_s21 = sadd.s32 4294967294, %s565_s19   ;;  %s565_s19 = sphi %s604_s19, %s16_s19   ;;  %s561_s18 = sphi %s602_s18, %s755_s18   ;;  %s557_s17 = sphi %s600_s17, %s754_s17   ;;  %s553_s16 = sphi %s598_s16, %s753_s16   ;;  %s549_s15 = sphi %s596_s15, %s752_s15   ;;  %s545_s14 = sphi %s594_s14, %s751_s14   ;;  %s541_s13 = sphi %s592_s13, %s750_s13   ;;  %s537_s12 = sphi %s590_s12, %s749_s12  }
   0x6   : > { %s25_s22 = sadd.s32 1, %s557_s17  ;;  %s28_s23 = sadd.s32 1, %s561_s18 }
   0x7   : > { %p26_p0 = scmp.ge.s32.totalorder %s25_s22, 2  ;;  %p117_p1 = scmp.ne.s32.totalorder %s545_s14, %s541_s13 }
   0x8   : > { %p118_p2 = scmp.eq.s32.totalorder %s373_s20, 3  ;;  %p123_p5 = scmp.ne.s32.totalorder %s541_s13, %s537_s12 }
   0x9   : > { %s757_s22 = smov (%p26_p0, %s25_s22), 0  ;;  %s759_s23 = smov (!%p26_p0, %s28_s23), %s561_s18 }
   0xa   : > { %s103_s24 = ssub.s32 %s557_s17, %s757_s22  ;;  %p641_p3 = por %p118_p2, %p117_p1 }
   0xb   : > { %p30_p4 = scmp.ge.s32.totalorder %s759_s23, 2  ;;  %p124_p6 = scmp.eq.s32.totalorder %s374_s21, 3 }
   0xc   : > { %p377_p7 = scmp.ge.s32.totalorder %s565_s19, 1  ;;  %p161_p9 = scmp.lt.s32.totalorder %s565_s19, 5 }
   0xd   : > { %s761_s23 = smov (%p30_p4, %s759_s23), 0  ;;  %p650_p8 = por %p124_p6, %p123_p5 }
   0xe   : > { %s102_s27 = ssub.s32 %s561_s18, %s761_s23  ;;  %s107_s28 = sadd.s32 1, %s545_s14 }
   0xf   : > { %s104_s29 = sor.u32 %s103_s24, %s102_s27  ;;  %p162_p10 = pnand %p377_p7, %p161_p9 }
  0x10   : > { %p105_p11 = scmp.eq.s32.totalorder %s104_s29, 0  ;;  %s662_s4 = sshll.u32 (!%p162_p10), %s549_s15, 2  ;;  %v382_v33 = vld [vmem:[%s744_s1] ss:$0 sm:$0xff] (!%p162_p10) }
  0x11   : > { %165 = sbr.rel (%p162_p10) target bundleno = 365 (0x16d), region = 32  ;;  %p190_p12 = scmp.lt.s32.totalorder (!%p162_p10), %s553_s16, 1  ;;  %v383_v35 = vld [vmem:[%s745_s2] ss:$0 sm:$0xff] (!%p162_p10) }
  0x12   : > { %s659_s30 = scalar_select %p105_p11, %s545_s14, %s107_s28  }
  0x13   : > { %p192_p13 = scmp.lt.s32.totalorder (!%p162_p10), %s662_s4, 7  ;;  %s186_s15 = sand.u32 (!%p162_p10), 1, %s541_s13  }
  0x14   : > { %s378_s27 = sshll.u32 (!%p162_p10), %s186_s15, 5  ;;  %s386_s28 = sshll.u32 (!%p162_p10), %s553_s16, 3 }
  0x15   : > { %s567_s21 = smov (!%p162_p10), [#allocation2]  }
  0x16   : > { %s475_s24 = sshll.u32 (!%p162_p10), %s567_s21, 4  ;;  %s476_s24 = int_to_ptr.vmem [resolvable:$false] %s475_s24 }
  0x18   : > { %s191_s5 = scalar_select %p190_p12, %s553_s16, 1 }
  0x19   : > { %s193_s6 = scalar_select %p192_p13, %s662_s4, 7 }
  0x1a   : > { %s380_s7 = sshll.u32 %s191_s5, 3 }
  0x1b   : > { %s195_s8 = sadd.s32 %s380_s7, %s193_s6  ;;  %s288_s6 = sadd.s32 %s386_s28, %s662_s4 }
  0x1c   : > { %s381_s9 = sshll.u32 %s195_s8, 3  ;;  %s188_s7 = scalar_lea.vmem [#allocation2], %s378_s27 }
  0x1d   : > { %s197_s20 = scalar_lea.vmem %s743_s0, %s381_s9  ;;  %s387_s8 = sshll.u32 %s288_s6, 7 }
  0x1e   : > { %v200_v0 = vld [vmem:[%s197_s20] sm:$0xff]  ;;  %v202_v1 = vld [vmem:[%s197_s20 + $0x10] sm:$0xff]  ;;  %v201_v2 = vld [vmem:[%s197_s20 + $0x8] sm:$0xff]  ;;  %s291_s16 = sshll.u32 %s188_s7, 4  ;;  %s685_s11 = scalar_lea.hbm %s746_s3, %s387_s8  ;;  %s687_s16 = int_to_ptr.vmem [resolvable:$true] %s291_s16 }
  0x1f   : > { %206 = vadd.xlane.f32.xlu0 %v200_v0  ;;  %210 = vadd.xlane.f32.xlu1 %v202_v1  ;;  %v203_v3 = vld [vmem:[%s197_s20 + $0x18] sm:$0xff]  ;;  %s691_s4 = scalar_lea.sflag [#allocation3], %s186_s15  ;;  %s471_s20 = scalar_lea.vmem %s687_s16, 512 }
  0x20   : > { %p472_p0 = scmp.ne.s32.totalorder %s687_s16, %s471_s20  ;;  %s477_s27 = scalar_lea.vmem %s476_s24, 1024 }
  0x21   : > { %p478_p4 = scmp.lt.s32.totalorder %s687_s16, %s476_s24  ;;  %p479_p5 = scmp.lt.s32.totalorder %s477_s27, %s471_s20 }
  0x22   : > { %p473_p1 = pnand %p472_p0, %p641_p3 }
  0x23   : > { %208 = vadd.xlane.f32.xlu0 %v201_v2  ;;  %212 = vadd.xlane.f32.xlu1 %v203_v3  ;;  %p480_p6 = por %p479_p5, %p478_p4 }
  0x24   : > { %p474_p2 = pneg %p473_p1 }
  0x26   : > { %p481_p7 = pnand %p480_p6, %p474_p2 }
  0xac   : > { %v207_v4 = vpop.xlane.xlu0 %206  ;;  %v211_v5 = vpop.xlane.xlu1 %210 }
  0xad   : > { %v215_v6 = vmul.f32 0.0078125, %v207_v4  ;;  %v217_v7 = vmul.f32 0.0078125, %v211_v5 }
  0xaf   : > { %v219_v8 = vsub.f32 %v200_v0, %v215_v6  ;;  %v221_v9 = vsub.f32 %v202_v1, %v217_v7 }
  0xb0   : > { %v209_v10 = vpop.xlane.xlu0 %208  ;;  %v213_v11 = vpop.xlane.xlu1 %212 }
  0xb1   : > { %v216_v12 = vmul.f32 0.0078125, %v209_v10  ;;  %v223_v13 = vmul.f32 %v219_v8, %v219_v8  ;;  %v218_v14 = vmul.f32 0.0078125, %v213_v11  ;;  %v225_v17 = vmul.f32 %v221_v9, %v221_v9 }
  0xb3   : > { %v220_v15 = vsub.f32 %v201_v2, %v216_v12  ;;  %227 = vadd.xlane.f32.xlu0 %v223_v13  ;;  %v222_v16 = vsub.f32 %v203_v3, %v218_v14 }
  0xb5   : > { %v224_v18 = vmul.f32 %v220_v15, %v220_v15  ;;  %v226_v19 = vmul.f32 %v222_v16, %v222_v16 }
  0xb7   : > { %231 = vadd.xlane.f32.xlu0 %v225_v17  ;;  %229 = vadd.xlane.f32.xlu1 %v224_v18 }
  0xbb   : > { %233 = vadd.xlane.f32.xlu1 %v226_v19 }
 0x140   : > { %v228_v20 = vpop.xlane.xlu0 %227 }
 0x141   : > { %v235_v21 = vmul.f32 0.0078125, %v228_v20 }
 0x143   : > { %v239_v22 = vadd.f32 1e-05, %v235_v21 }
 0x144   : > { %v230_v23 = vpop.xlane.xlu1 %229  ;;  %v232_v24 = vpop.xlane.xlu0 %231 }
 0x145   : > { %463 = vrsqrt.f32 %v239_v22  ;;  %v236_v25 = vmul.f32 0.0078125, %v230_v23  ;;  %v237_v26 = vmul.f32 0.0078125, %v232_v24 }
 0x147   : > { %v240_v27 = vadd.f32 1e-05, %v236_v25  ;;  %v241_v28 = vadd.f32 1e-05, %v237_v26 }
 0x148   : > { %v234_v29 = vpop.xlane.xlu1 %233 }
 0x149   : > { %465 = vrsqrt.f32 %v240_v27  ;;  %v238_v30 = vmul.f32 0.0078125, %v234_v29 }
 0x14a   : > { %467 = vrsqrt.f32 %v241_v28 }
 0x14b   : > { %v242_v31 = vadd.f32 1e-05, %v238_v30 }
 0x14d   : > { %469 = vrsqrt.f32 %v242_v31 }
 0x14f   : > { %v464_v32 = vpop.eup %463 }
 0x150   : > { %v247_v34 = vmul.f32 %v464_v32, %v219_v8 }
 0x152   : > { %v257_v36 = vmul.f32 %v382_v33, %v247_v34 }
 0x153   : > { %v466_v37 = vpop.eup %465 }
 0x154   : > { %v468_v38 = vpop.eup %467  ;;  %v267_v39 = vadd.f32 %v383_v35, %v257_v36  ;;  %v248_v40 = vmul.f32 %v466_v37, %v220_v15 }
 0x155   : > { %v249_v41 = vmul.f32 %v468_v38, %v221_v9 }
 0x156   : > { %271 = vst [vmem:[%s188_s7] sm:$0xff] %v267_v39  ;;  %v258_v42 = vmul.f32 %v382_v33, %v248_v40 }
 0x157   : > { %v470_v43 = vpop.eup %469  ;;  %v259_v44 = vmul.f32 %v382_v33, %v249_v41 }
 0x158   : > { %v268_v45 = vadd.f32 %v383_v35, %v258_v42  ;;  %v250_v46 = vmul.f32 %v470_v43, %v222_v16 }
 0x159   : > { %v269_v47 = vadd.f32 %v383_v35, %v259_v44 }
 0x15a   : > { %272 = vst [vmem:[%s188_s7 + $0x8] sm:$0xff] %v268_v45  ;;  %v260_v48 = vmul.f32 %v382_v33, %v250_v46 }
 0x15b   : > { %273 = vst [vmem:[%s188_s7 + $0x10] sm:$0xff] %v269_v47 }
 0x15c   : > { %v270_v49 = vadd.f32 %v383_v35, %v260_v48 }
 0x15e   : > { %274 = vst [vmem:[%s188_s7 + $0x18] sm:$0xff] %v270_v49 }
 0x15f   : > { %484 = shalt.err (!%p481_p7)
}
 0x160   : > { %s485_s15 = scalar_lea.hbm %s685_s11, 512  ;;  %s489_s5 = scalar_lea.hbm %s746_s3, 2048 }
 0x161   : > { %p486_p9 = scmp.ne.s32.totalorder %s685_s11, %s485_s15  ;;  %p490_p12 = scmp.lt.u32.totalorder %s685_s11, %s746_s3 }
 0x162   : > { %p491_p13 = scmp.lt.u32.totalorder %s489_s5, %s485_s15  ;;  %p493_p1 = scmp.lt.u32.totalorder %s485_s15, %s685_s11 }
 0x163   : > { %p487_p10 = pnand %p486_p9, %p641_p3 }
 0x164   : > { %p492_p0 = por %p491_p13, %p490_p12 }
 0x165   : > { %p488_p11 = pneg %p487_p10 }
 0x166   : > { %p494_p2 = por %p493_p1, %p492_p0 }
 0x168   : > { %p495_p4 = pnand %p494_p2, %p488_p11 }
 0x16a   : > { %498 = shalt.err (!%p495_p4)
}
 0x16b   : > { %s568_s8 = smov 128   ;;  %s569_s9 = smov 8  }
 0x16c   : > { %390 = dma.vmem_to_hbm [thread:$0]  (%p641_p3), %s687_s16, 512, %s685_s11, %s691_s4, %s568_s8, %s568_s8, %s569_s9  }
 0x16d PF: > { %p396_p5 = scmp.ge.s32.totalorder %s565_s19, 2  ;;  %s306_s10 = sand.u32 1, %s537_s12  }
 0x16e   : > { %s307_s20 = scalar_lea.sflag [#allocation3], %s306_s10 }
 0x16f   : > { %p393_p6 = pnand %p396_p5, %p650_p8 }
 0x171   : > { %532 = dma.done.wait (!%p393_p6), %s307_s20, 512  }
 0x172   : > { %534 = vsyncadd (!%p393_p6), %s307_s20, 4294966784  ;;  %s16_s19 = sadd.s32 1, %s565_s19   ;;  %s749_s12 = smov %s541_s13 }
 0x173   : > { %p13_p7 = scmp.ge.s32.totalorder %s16_s19, 6   ;;  %s750_s13 = smov %s545_s14 }
 0x174   : > { %s751_s14 = smov %s659_s30  ;;  %s752_s15 = smov %s557_s17 }
 0x175   : > { %s753_s16 = smov %s561_s18  ;;  %s754_s17 = smov %s757_s22 }
 0x176   : > { %s755_s18 = smov %s761_s23  ;;  %15 = sbr.rel (!%p13_p7) target bundleno = 5 (0x5), region = 67 }
 0x17d   :  { %312 = vsyncpa [#allocation3], 1 }
 0x17e   :  { %314 = vsyncpa [#allocation3 + $0x1], 1 }

// kernel: audio_encoder_forward.12
= control target key start
LH: loop header
LB: loop body
LE: loop exit
PB: predicated region body
PF: predicated region fallthrough
CT: control target
= control target key end

     0   :  { %s2776_s12 = smov 0   ;;  %s2778_s13 = smov 0   ;;  %s3477_s0 = inlined_call_operand.vmem [shape: bf16[2,4,64,32], index: 0, kind: input, shape index: {}]   ;;  %s3478_s1 = inlined_call_operand.vmem [shape: bf16[2,4,64,32], index: 1, kind: input, shape index: {}]   ;;  %s3479_s2 = inlined_call_operand.vmem [shape: bf16[2,4,64,32], index: 2, kind: input, shape index: {}]   ;;  %s3480_s3 = inlined_call_operand.vmem [shape: bf16[2,4,64,32], index: 3, kind: output, shape index: {}]  }
   0x1   :  { %s2780_s14 = smov 0   ;;  %s2782_s15 = smov 0  }
   0x2   :  { %s2784_s16 = smov 0   ;;  %s2786_s17 = smov 0  }
   0x3   :  { %s2788_s18 = smov 0   ;;  %s2790_s19 = smov 0  }
   0x4   :  { %s2792_s20 = smov 0   ;;  %s2794_s21 = smov 0  }
   0x5   :  { %s2796_s22 = smov 0  }
   0x6 LB: > { %s25_s23 = sadd.s32 1, %s2738_s19  ;;  %s28_s24 = sadd.s32 1, %s2742_s20  ;;  %s2750_s22 = sphi %s2796_s22, %s13_s22   ;;  %s2746_s21 = sphi %s2794_s21, %s3499_s21   ;;  %s2742_s20 = sphi %s2792_s20, %s3498_s20   ;;  %s2738_s19 = sphi %s2790_s19, %s3497_s19   ;;  %s2734_s18 = sphi %s2788_s18, %s3496_s18   ;;  %s2730_s17 = sphi %s2786_s17, %s3495_s17   ;;  %s2726_s16 = sphi %s2784_s16, %s3494_s16   ;;  %s2722_s15 = sphi %s2782_s15, %s3493_s15   ;;  %s2718_s14 = sphi %s2780_s14, %s3492_s14   ;;  %s2714_s13 = sphi %s2778_s13, %s3491_s13   ;;  %s2710_s12 = sphi %s2776_s12, %s3490_s12  }
   0x7   : > { %p26_p0 = scmp.ge.s32.totalorder %s25_s23, 2  ;;  %p48_p1 = scmp.ne.s32.totalorder %s2722_s15, %s2718_s14 }
   0x8   : > { %p49_p2 = scmp.eq.s32.totalorder %s2750_s22, 0  ;;  %s32_s25 = sadd.s32 1, %s2746_s21 }
   0x9   : > { %s3501_s23 = smov (%p26_p0, %s25_s23), 0  ;;  %s3503_s24 = smov (!%p26_p0, %s28_s24), %s2742_s20 }
   0xa   : > { %p30_p3 = scmp.ge.s32.totalorder %s3503_s24, 2  ;;  %s2243_s26 = sadd.s32 4294967295, %s2750_s22  }
   0xb   : > { %p2844_p4 = por %p49_p2, %p48_p1  ;;  %s65_s28 = ssub.s32 %s2738_s19, %s3501_s23 }
   0xc   : > { %s3505_s24 = smov (%p30_p3, %s3503_s24), 0  ;;  %s3507_s25 = smov (!%p30_p3, %s32_s25), %s2746_s21 }
   0xd   : > { %3484 = sst [smem:[#allocation9_spill]] %s3505_s24  ;;  %p76_p5 = scmp.ne.s32.totalorder %s2714_s13, %s2710_s12 }
   0xe   : > { %p34_p6 = scmp.ge.s32.totalorder %s3507_s25, 2  ;;  %p136_p7 = scmp.eq.s32.totalorder %s2243_s26, 7 }
   0xf   : > { %s37_s29 = ssub.s32 %s2742_s20, %s3505_s24  ;;  %p2857_p8 = por %p76_p5, %p49_p2 }
  0x10   : > { %s3509_s25 = smov (%p34_p6, %s3507_s25), 0  ;;  %s41_s4 = sadd.s32 1, %s2722_s15 }
  0x11   : > { %3486 = sst [smem:[#allocation10_spill]] %s3509_s25  ;;  %p2867_p9 = por %p136_p7, %p48_p1 }
  0x12   : > { %s36_s6 = ssub.s32 %s2746_s21, %s3509_s25  ;;  %s69_s7 = sadd.s32 1, %s2714_s13 }
  0x13   : > { %s38_s8 = sor.u32 %s37_s29, %s36_s6  ;;  %s66_s9 = sor.u32 %s65_s28, %s36_s6 }
  0x14   : > { %p39_p10 = scmp.eq.s32.totalorder %s38_s8, 0  ;;  %p67_p11 = scmp.eq.s32.totalorder %s66_s9, 0 }
  0x15   : > { %p2246_p12 = scmp.ge.s32.totalorder %s2750_s22, 8 }
  0x16   : > { %s2875_s10 = scalar_select %p39_p10, %s2722_s15, %s41_s4  }
  0x17   : > { %s2878_s11 = scalar_select %p67_p11, %s2714_s13, %s69_s7  }
  0x18   : > { %158 = sbr.rel (%p2246_p12) target bundleno = 64 (0x40), region = 16 }
  0x1f   : > { %161 = sbr.rel (!%p2844_p4) target bundleno = 42 (0x2a), region = 20  ;;  %s163_s26 = sand.u32 (%p2844_p4), 1, %s2722_s15  }
  0x20   : > { %s2248_s25 = sshll.u32 (%p2844_p4), %s2742_s20, 2  ;;  %s2247_s24 = sshll.u32 (%p2844_p4), %s163_s26, 6 }
  0x21   : > { %s2249_s29 = sshll.u32 (%p2844_p4), %s2746_s21, 5  ;;  %s165_s9 = scalar_lea.vmem (%p2844_p4), [#allocation5], %s2247_s24 }
  0x22   : > { %s168_s28 = sadd.s32 (%p2844_p4), %s2249_s29, %s2248_s25 }
  0x23   : > { %s2250_s6 = sshll.u32 (%p2844_p4), %s168_s28, 2 }
  0x24   : > { %s170_s7 = scalar_lea.vmem (%p2844_p4), %s3477_s0, %s2250_s6 }
  0x25   : > { %v186_v0 = vld [vmem:[%s170_s7] sm:$0xff] (%p2844_p4)   ;;  %v190_v1 = vld [vmem:[%s170_s7 + $0x8] sm:$0xff] (%p2844_p4)  }
  0x26   : > { %v194_v2 = vld [vmem:[%s170_s7 + $0x20] sm:$0xff]   ;;  %187 = vst [vmem:[%s165_s9] sm:$0xff] %v186_v0   ;;  %191 = vst [vmem:[%s165_s9 + $0x8] sm:$0xff] %v190_v1   ;;  %v198_v3 = vld [vmem:[%s170_s7 + $0x28] sm:$0xff]  }
  0x27   : > { %195 = vst [vmem:[%s165_s9 + $0x10] sm:$0xff] %v194_v2   ;;  %v202_v4 = vld [vmem:[%s170_s7 + $0x40] sm:$0xff]   ;;  %v206_v5 = vld [vmem:[%s170_s7 + $0x48] sm:$0xff]   ;;  %199 = vst [vmem:[%s165_s9 + $0x18] sm:$0xff] %v198_v3  }
  0x28   : > { %203 = vst [vmem:[%s165_s9 + $0x20] sm:$0xff] %v202_v4   ;;  %207 = vst [vmem:[%s165_s9 + $0x28] sm:$0xff] %v206_v5   ;;  %v210_v6 = vld [vmem:[%s170_s7 + $0x60] sm:$0xff]   ;;  %v214_v7 = vld [vmem:[%s170_s7 + $0x68] sm:$0xff]  }
  0x29   : > { %211 = vst [vmem:[%s165_s9 + $0x30] sm:$0xff] %v210_v6   ;;  %215 = vst [vmem:[%s165_s9 + $0x38] sm:$0xff] %v214_v7  }
  0x2a PF: > { %272 = sbr.rel (!%p2857_p8) target bundleno = 53 (0x35), region = 61  ;;  %s274_s24 = sand.u32 (%p2857_p8), 1, %s2714_s13  }
  0x2b   : > { %s2252_s25 = sshll.u32 (%p2857_p8), %s2738_s19, 2  ;;  %s2251_s27 = sshll.u32 (%p2857_p8), %s274_s24, 6 }
  0x2c   : > { %s2253_s26 = sshll.u32 (%p2857_p8), %s2746_s21, 5  ;;  %s276_s7 = scalar_lea.vmem (%p2857_p8), [#allocation6], %s2251_s27 }
  0x2d   : > { %s279_s29 = sadd.s32 (%p2857_p8), %s2253_s26, %s2252_s25 }
  0x2e   : > { %s2254_s28 = sshll.u32 (%p2857_p8), %s279_s29, 2 }
  0x2f   : > { %s281_s4 = scalar_lea.vmem (%p2857_p8), %s3478_s1, %s2254_s28 }
  0x30   : > { %v297_v8 = vld [vmem:[%s281_s4] sm:$0xff] (%p2857_p8)   ;;  %v301_v9 = vld [vmem:[%s281_s4 + $0x8] sm:$0xff] (%p2857_p8)  }
  0x31   : > { %v305_v10 = vld [vmem:[%s281_s4 + $0x20] sm:$0xff]   ;;  %298 = vst [vmem:[%s276_s7] sm:$0xff] %v297_v8   ;;  %302 = vst [vmem:[%s276_s7 + $0x8] sm:$0xff] %v301_v9   ;;  %v309_v11 = vld [vmem:[%s281_s4 + $0x28] sm:$0xff]  }
  0x32   : > { %306 = vst [vmem:[%s276_s7 + $0x10] sm:$0xff] %v305_v10   ;;  %v313_v12 = vld [vmem:[%s281_s4 + $0x40] sm:$0xff]   ;;  %v317_v13 = vld [vmem:[%s281_s4 + $0x48] sm:$0xff]   ;;  %310 = vst [vmem:[%s276_s7 + $0x18] sm:$0xff] %v309_v11  }
  0x33   : > { %314 = vst [vmem:[%s276_s7 + $0x20] sm:$0xff] %v313_v12   ;;  %318 = vst [vmem:[%s276_s7 + $0x28] sm:$0xff] %v317_v13   ;;  %v321_v14 = vld [vmem:[%s281_s4 + $0x60] sm:$0xff]   ;;  %v325_v15 = vld [vmem:[%s281_s4 + $0x68] sm:$0xff]  }
  0x34   : > { %322 = vst [vmem:[%s276_s7 + $0x30] sm:$0xff] %v321_v14   ;;  %326 = vst [vmem:[%s276_s7 + $0x38] sm:$0xff] %v325_v15  }
  0x35 PF: > { %383 = sbr.rel (!%p2857_p8) target bundleno = 64 (0x40), region = 102  ;;  %s385_s9 = sand.u32 (%p2857_p8), 1, %s2714_s13  }
  0x36   : > { %s2256_s24 = sshll.u32 (%p2857_p8), %s2738_s19, 2  ;;  %s2255_s25 = sshll.u32 (%p2857_p8), %s385_s9, 6 }
  0x37   : > { %s2257_s27 = sshll.u32 (%p2857_p8), %s2746_s21, 5  ;;  %s387_s4 = scalar_lea.vmem (%p2857_p8), [#allocation7], %s2255_s25 }
  0x38   : > { %s390_s26 = sadd.s32 (%p2857_p8), %s2257_s27, %s2256_s24 }
  0x39   : > { %s2258_s29 = sshll.u32 (%p2857_p8), %s390_s26, 2 }
  0x3a   : > { %s392_s8 = scalar_lea.vmem (%p2857_p8), %s3479_s2, %s2258_s29 }
  0x3b   : > { %v408_v16 = vld [vmem:[%s392_s8] sm:$0xff] (%p2857_p8)   ;;  %v412_v17 = vld [vmem:[%s392_s8 + $0x8] sm:$0xff] (%p2857_p8)  }
  0x3c   : > { %v416_v18 = vld [vmem:[%s392_s8 + $0x20] sm:$0xff]   ;;  %409 = vst [vmem:[%s387_s4] sm:$0xff] %v408_v16   ;;  %413 = vst [vmem:[%s387_s4 + $0x8] sm:$0xff] %v412_v17   ;;  %v420_v19 = vld [vmem:[%s392_s8 + $0x28] sm:$0xff]  }
  0x3d   : > { %417 = vst [vmem:[%s387_s4 + $0x10] sm:$0xff] %v416_v18   ;;  %v424_v20 = vld [vmem:[%s392_s8 + $0x40] sm:$0xff]   ;;  %v428_v21 = vld [vmem:[%s392_s8 + $0x48] sm:$0xff]   ;;  %421 = vst [vmem:[%s387_s4 + $0x18] sm:$0xff] %v420_v19  }
  0x3e   : > { %425 = vst [vmem:[%s387_s4 + $0x20] sm:$0xff] %v424_v20   ;;  %429 = vst [vmem:[%s387_s4 + $0x28] sm:$0xff] %v428_v21   ;;  %v432_v22 = vld [vmem:[%s392_s8 + $0x60] sm:$0xff]   ;;  %v436_v23 = vld [vmem:[%s392_s8 + $0x68] sm:$0xff]  }
  0x3f   : > { %433 = vst [vmem:[%s387_s4 + $0x30] sm:$0xff] %v432_v22   ;;  %437 = vst [vmem:[%s387_s4 + $0x38] sm:$0xff] %v436_v23  }
  0x40 PF: > { %p2259_p13 = scmp.ge.s32.totalorder %s2750_s22, 1  ;;  %p493_p0 = scmp.lt.s32.totalorder %s2750_s22, 9 }
  0x42   : > { %p494_p1 = pnand %p2259_p13, %p493_p0 }
  0x43   : > { %s500_s30 = sand.u32 (!%p494_p1), 1, %s2718_s14   ;;  %s507_s7 = sand.u32 (!%p494_p1), 1, %s2710_s12  }
  0x44   : > { %497 = sbr.rel (%p494_p1) target bundleno = 1034 (0x40a), region = 143  ;;  %s2260_s9 = sshll.u32 (!%p494_p1), %s500_s30, 6 }
  0x45   : > { %s2261_s24 = sshll.u32 (!%p494_p1), %s507_s7, 6  ;;  %s2909_s25 = scalar_lea.vmem (!%p494_p1), [#allocation5], %s2260_s9 }
  0x46   : > { %s2911_s27 = scalar_lea.vmem (!%p494_p1), [#allocation6], %s2261_s24  ;;  %s2913_s26 = scalar_lea.vmem (!%p494_p1), [#allocation7], %s2261_s24 }
  0x47   : > { %s2915_s29 = scalar_lea.vmem (!%p494_p1), [#allocation8], %s2260_s9  ;;  %p2264_p2 = scmp.ne.s32.totalorder (!%p494_p1), %s2726_s16, 0 }
  0x4b   : > { %552 = sbr.rel (%p2264_p2) target bundleno = 100 (0x64), region = 159  ;;  %vm553_vm0 = vcmask (!%p2264_p2), 7168   ;;  %vm586_vm1 = vcmask (!%p2264_p2), 261120   ;;  %v2752_v24 = vmov (!%p2264_p2), -inf   ;;  %v2753_v25 = vmov (!%p2264_p2), 0.0  }
  0x4c   : > { %554 = vst.msk [vmem:[#allocation2] sm:$0xff] (!%p2264_p2), %vm553_vm0, %v2752_v24  ;;  %555 = vst.msk [vmem:[#allocation2 + $0x8] sm:$0xff] (!%p2264_p2), %vm553_vm0, %v2752_v24 }
  0x4d   : > { %556 = vst.msk [vmem:[#allocation2 + $0x10] sm:$0xff] (!%p2264_p2), %vm553_vm0, %v2752_v24  ;;  %557 = vst.msk [vmem:[#allocation2 + $0x18] sm:$0xff] (!%p2264_p2), %vm553_vm0, %v2752_v24 }
  0x4e   : > { %558 = vst.msk [vmem:[#allocation2 + $0x20] sm:$0xff] (!%p2264_p2), %vm553_vm0, %v2752_v24  ;;  %559 = vst.msk [vmem:[#allocation2 + $0x28] sm:$0xff] (!%p2264_p2), %vm553_vm0, %v2752_v24 }
  0x4f   : > { %560 = vst.msk [vmem:[#allocation2 + $0x30] sm:$0xff] (!%p2264_p2), %vm553_vm0, %v2752_v24  ;;  %561 = vst.msk [vmem:[#allocation2 + $0x38] sm:$0xff] (!%p2264_p2), %vm553_vm0, %v2752_v24 }
  0x50   : > { %562 = vst.msk [vmem:[#allocation2 + $0x40] sm:$0xff] (!%p2264_p2), %vm553_vm0, %v2752_v24  ;;  %563 = vst.msk [vmem:[#allocation2 + $0x48] sm:$0xff] (!%p2264_p2), %vm553_vm0, %v2752_v24 }
  0x51   : > { %564 = vst.msk [vmem:[#allocation2 + $0x50] sm:$0xff] (!%p2264_p2), %vm553_vm0, %v2752_v24  ;;  %565 = vst.msk [vmem:[#allocation2 + $0x58] sm:$0xff] (!%p2264_p2), %vm553_vm0, %v2752_v24 }
  0x52   : > { %566 = vst.msk [vmem:[#allocation2 + $0x60] sm:$0xff] %vm553_vm0, %v2752_v24  ;;  %567 = vst.msk [vmem:[#allocation2 + $0x68] sm:$0xff] %vm553_vm0, %v2752_v24 }
  0x53   : > { %568 = vst.msk [vmem:[#allocation2 + $0x70] sm:$0xff] %vm553_vm0, %v2752_v24  ;;  %569 = vst.msk [vmem:[#allocation2 + $0x78] sm:$0xff] %vm553_vm0, %v2752_v24 }
  0x54   : > { %570 = vst.msk [vmem:[#allocation3] sm:$0xff] %vm553_vm0, %v2753_v25  ;;  %571 = vst.msk [vmem:[#allocation3 + $0x8] sm:$0xff] %vm553_vm0, %v2753_v25 }
  0x55   : > { %572 = vst.msk [vmem:[#allocation3 + $0x10] sm:$0xff] %vm553_vm0, %v2753_v25  ;;  %573 = vst.msk [vmem:[#allocation3 + $0x18] sm:$0xff] %vm553_vm0, %v2753_v25 }
  0x56   : > { %574 = vst.msk [vmem:[#allocation3 + $0x20] sm:$0xff] %vm553_vm0, %v2753_v25  ;;  %575 = vst.msk [vmem:[#allocation3 + $0x28] sm:$0xff] %vm553_vm0, %v2753_v25 }
  0x57   : > { %576 = vst.msk [vmem:[#allocation3 + $0x30] sm:$0xff] %vm553_vm0, %v2753_v25  ;;  %577 = vst.msk [vmem:[#allocation3 + $0x38] sm:$0xff] %vm553_vm0, %v2753_v25 }
  0x58   : > { %578 = vst.msk [vmem:[#allocation3 + $0x40] sm:$0xff] %vm553_vm0, %v2753_v25  ;;  %579 = vst.msk [vmem:[#allocation3 + $0x48] sm:$0xff] %vm553_vm0, %v2753_v25 }
  0x59   : > { %580 = vst.msk [vmem:[#allocation3 + $0x50] sm:$0xff] %vm553_vm0, %v2753_v25  ;;  %581 = vst.msk [vmem:[#allocation3 + $0x58] sm:$0xff] %vm553_vm0, %v2753_v25 }
  0x5a   : > { %582 = vst.msk [vmem:[#allocation3 + $0x60] sm:$0xff] %vm553_vm0, %v2753_v25  ;;  %583 = vst.msk [vmem:[#allocation3 + $0x68] sm:$0xff] %vm553_vm0, %v2753_v25 }
  0x5b   : > { %584 = vst.msk [vmem:[#allocation3 + $0x70] sm:$0xff] %vm553_vm0, %v2753_v25  ;;  %585 = vst.msk [vmem:[#allocation3 + $0x78] sm:$0xff] %vm553_vm0, %v2753_v25 }
  0x5c   : > { %587 = vst.msk [vmem:[#allocation4] sm:$0xff] %vm586_vm1, %v2753_v25  ;;  %588 = vst.msk [vmem:[#allocation4 + $0x8] sm:$0xff] %vm586_vm1, %v2753_v25 }
  0x5d   : > { %589 = vst.msk [vmem:[#allocation4 + $0x10] sm:$0xff] %vm586_vm1, %v2753_v25  ;;  %590 = vst.msk [vmem:[#allocation4 + $0x18] sm:$0xff] %vm586_vm1, %v2753_v25 }
  0x5e   : > { %591 = vst.msk [vmem:[#allocation4 + $0x20] sm:$0xff] %vm586_vm1, %v2753_v25  ;;  %592 = vst.msk [vmem:[#allocation4 + $0x28] sm:$0xff] %vm586_vm1, %v2753_v25 }
  0x5f   : > { %593 = vst.msk [vmem:[#allocation4 + $0x30] sm:$0xff] %vm586_vm1, %v2753_v25  ;;  %594 = vst.msk [vmem:[#allocation4 + $0x38] sm:$0xff] %vm586_vm1, %v2753_v25 }
  0x60   : > { %595 = vst.msk [vmem:[#allocation4 + $0x40] sm:$0xff] %vm586_vm1, %v2753_v25  ;;  %596 = vst.msk [vmem:[#allocation4 + $0x48] sm:$0xff] %vm586_vm1, %v2753_v25 }
  0x61   : > { %597 = vst.msk [vmem:[#allocation4 + $0x50] sm:$0xff] %vm586_vm1, %v2753_v25  ;;  %598 = vst.msk [vmem:[#allocation4 + $0x58] sm:$0xff] %vm586_vm1, %v2753_v25 }
  0x62   : > { %599 = vst.msk [vmem:[#allocation4 + $0x60] sm:$0xff] %vm586_vm1, %v2753_v25  ;;  %600 = vst.msk [vmem:[#allocation4 + $0x68] sm:$0xff] %vm586_vm1, %v2753_v25 }
  0x63   : > { %601 = vst.msk [vmem:[#allocation4 + $0x70] sm:$0xff] %vm586_vm1, %v2753_v25  ;;  %602 = vst.msk [vmem:[#allocation4 + $0x78] sm:$0xff] %vm586_vm1, %v2753_v25 }
  0x64 PF: > { %v2542_v26 = vld [vmem:[%s2911_s27] sm:$0xff]   ;;  %vm671_vm2 = vcmask 261120   ;;  %v2543_v27 = vld [vmem:[%s2911_s27 + $0x10] sm:$0xff]   ;;  %v2544_v29 = vld [vmem:[%s2911_s27 + $0x8] sm:$0xff]   ;;  %v2754_v8 = vmov 0   ;;  %vm1328_vm3 = vcmask 7168  }
  0x65   : > { %2440 = vmatprep.subr.msk.bf16.mxu0 %vm671_vm2, %v2542_v26  ;;  %v679_v28 = vsel %vm671_vm2, %v2542_v26, 0  ;;  %2442 = vmatprep.subr.msk.bf16.mxu1 %vm671_vm2, %v2543_v27  ;;  %v760_v30 = vsel %vm671_vm2, %v2543_v27, 0  ;;  %v2545_v31 = vld [vmem:[%s2911_s27 + $0x18] sm:$0xff]   ;;  %v2546_v32 = vld [vmem:[%s2909_s25] sm:$0xff]   ;;  %v2547_v33 = vld [vmem:[%s2909_s25 + $0x10] sm:$0xff]   ;;  %v682_v34 = vsel %vm671_vm2, %v2544_v29, 0 }
  0x66   : > { %2377 = vmatpush3.bf16.xpose.msra.mxu0 %v679_v28  ;;  %2385 = vmatpush3.bf16.xpose.msra.mxu1 %v760_v30  ;;  %v2550_v35 = vld [vmem:[%s2911_s27 + $0x20] sm:$0xff]   ;;  %v763_v36 = vsel %vm671_vm2, %v2545_v31, 0  ;;  %v2551_v37 = vld [vmem:[%s2911_s27 + $0x30] sm:$0xff]   ;;  %v2548_v38 = vld [vmem:[%s2909_s25 + $0x8] sm:$0xff]   ;;  %p2305_p3 = scmp.ne.s32.totalorder %s2726_s16, 1 }
  0x67   : > { %2441 = vmatprep.subr.msk.bf16.mxu0 %vm671_vm2, %v2544_v29  ;;  %2443 = vmatprep.subr.msk.bf16.mxu1 %vm671_vm2, %v2545_v31  ;;  %v2549_v39 = vld [vmem:[%s2909_s25 + $0x18] sm:$0xff]   ;;  %v841_v40 = vsel %vm671_vm2, %v2550_v35, 0  ;;  %v2552_v41 = vld [vmem:[%s2911_s27 + $0x28] sm:$0xff]   ;;  %v922_v42 = vsel %vm671_vm2, %v2551_v37, 0  ;;  %v2554_v44 = vld [vmem:[%s2909_s25 + $0x20] sm:$0xff]   ;;  %vm1993_vm4 = vcmask (!%p2305_p3), 257024  }
  0x68   : > { %2380 = vmatprep.mubr.msk.bf16.mxu0 %vm671_vm2, %v2546_v32  ;;  %2388 = vmatprep.mubr.msk.bf16.mxu1 %vm671_vm2, %v2547_v33  ;;  %v2553_v43 = vld [vmem:[%s2911_s27 + $0x38] sm:$0xff]   ;;  %v2556_v45 = vld [vmem:[%s2909_s25 + $0x30] sm:$0xff]   ;;  %v844_v46 = vsel %vm671_vm2, %v2552_v41, 0  ;;  %v2555_v48 = vld [vmem:[%s2909_s25 + $0x28] sm:$0xff]  }
  0x69   : > { %v925_v47 = vsel %vm671_vm2, %v2553_v43, 0  ;;  %v2557_v49 = vld [vmem:[%s2909_s25 + $0x38] sm:$0xff]   ;;  %2540 = vset.pattern.permute.xlu1 %v2754_v8  ;;  %2541 = vset.pattern.permute.xlu0 %v2754_v8  ;;  %v3070_v19 = vld [vmem:[#allocation2 + $0x10] sm:$0xff]  ;;  %v3072_v21 = vld [vmem:[#allocation2 + $0x20] sm:$0xff] }
  0x6a   : > { %v3077_v24 = vld [vmem:[#allocation2 + $0x30] sm:$0xff]  ;;  %v3085_v27 = vld [vmem:[#allocation2 + $0x18] sm:$0xff]  ;;  %v976_v30 = vld [vmem:[#allocation2] sm:$0xff] }
  0x6b   : > { %v3096_v33 = vld [vmem:[#allocation2 + $0x38] sm:$0xff] }
  0x6e   : > { %2379 = vmatpush3.bf16.xpose.msra.mxu0 %v682_v34  ;;  %2387 = vmatpush3.bf16.xpose.msra.mxu1 %v763_v36  ;;  %v977_v36 = vld [vmem:[#allocation2 + $0x8] sm:$0xff] }
  0x6f   : > { %2444 = vmatprep.subr.msk.bf16.mxu0 %vm671_vm2, %v2550_v35  ;;  %2446 = vmatprep.subr.msk.bf16.mxu1 %vm671_vm2, %v2551_v37 }
  0x75   : > { %2381 = vmatmul.mubr.msk.bf16.vlgmr.msra.gmra.mrb[0].mxu0 %vm671_vm2, %v2548_v38  ;;  %2389 = vmatmul.mubr.msk.bf16.vlgmr.msra.gmra.mrb[0].mxu1 %vm671_vm2, %v2549_v39  ;;  %v981_v39 = vld [vmem:[#allocation2 + $0x28] sm:$0xff] }
  0x76   : > { %2393 = vmatpush3.bf16.xpose.msra.mxu0 %v841_v40  ;;  %2401 = vmatpush3.bf16.xpose.msra.mxu1 %v922_v42  ;;  %v3106_v42 = vld [vmem:[#allocation2 + $0x50] sm:$0xff] }
  0x77   : > { %2445 = vmatprep.subr.msk.bf16.mxu0 %vm671_vm2, %v2552_v41  ;;  %2447 = vmatprep.subr.msk.bf16.mxu1 %vm671_vm2, %v2553_v43 }
  0x78   : > { %2396 = vmatprep.mubr.msk.bf16.mxu0 %vm671_vm2, %v2554_v44  ;;  %2404 = vmatprep.mubr.msk.bf16.mxu1 %vm671_vm2, %v2556_v45  ;;  %v3109_v45 = vld [vmem:[#allocation2 + $0x58] sm:$0xff] }
  0x7e   : > { %2395 = vmatpush3.bf16.xpose.msra.mxu0 %v844_v46  ;;  %2403 = vmatpush3.bf16.xpose.msra.mxu1 %v925_v47 }
  0x85   : > { %2397 = vmatmul.mubr.msk.bf16.vlgmr.msra.gmra.mrb[4].mxu0 %vm671_vm2, %v2555_v48  ;;  %2405 = vmatmul.mubr.msk.bf16.vlgmr.msra.gmra.mrb[4].mxu1 %vm671_vm2, %v2557_v49  ;;  %v3115_v48 = vld [vmem:[#allocation2 + $0x40] sm:$0xff] }
 0x148   : > { %v3006_v50 = vpop.f32.mrb[0].mxu0  ;;  %v3008_v51 = vpop.f32.mrb[0].mxu1 }
 0x149   : > { %v3010_v52 = vpop.f32.mrb[1].mxu0  ;;  %v998_v53 = vsel %vm671_vm2, %v3006_v50, -inf  ;;  %v3014_v54 = vpop.f32.mrb[1].mxu1  ;;  %v1010_v59 = vsel %vm671_vm2, %v3008_v51, -inf }
 0x14a   : > { %999 = vmax.xlane.f32.xlu0 %v998_v53  ;;  %v3016_v55 = vpop.f32.mrb[2].mxu0  ;;  %v1004_v56 = vsel %vm671_vm2, %v3014_v54, -inf  ;;  %v3022_v58 = vpop.f32.mrb[2].mxu1  ;;  %v992_v62 = vsel %vm671_vm2, %v3010_v52, -inf }
 0x14b   : > { %v3020_v57 = vpop.f32.mrb[3].mxu0  ;;  %1005 = vmax.xlane.f32.xlu1 %v1004_v56  ;;  %v3026_v60 = vpop.f32.mrb[3].mxu1  ;;  %v1001_v61 = vsel %vm671_vm2, %v3016_v55, -inf  ;;  %v1013_v63 = vsel %vm671_vm2, %v3022_v58, -inf  ;;  %v3123_v56 = vld [vmem:[#allocation2 + $0x78] sm:$0xff] }
 0x14c   : > { %v995_v0 = vsel %vm671_vm2, %v3020_v57, -inf  ;;  %v1007_v1 = vsel %vm671_vm2, %v3026_v60, -inf }
 0x14e   : > { %1011 = vmax.xlane.f32.xlu0 %v1010_v59 }
 0x14f   : > { %1002 = vmax.xlane.f32.xlu1 %v1001_v61 }
 0x152   : > { %993 = vmax.xlane.f32.xlu0 %v992_v62 }
 0x153   : > { %1014 = vmax.xlane.f32.xlu1 %v1013_v63  ;;  %v3131_v63 = vld [vmem:[#allocation2 + $0x60] sm:$0xff] }
 0x156   : > { %996 = vmax.xlane.f32.xlu0 %v995_v0 }
 0x157   : > { %1008 = vmax.xlane.f32.xlu1 %v1007_v1 }
 0x158   : > { %v3038_v2 = vpop.f32.mrb[4].mxu0  ;;  %v3044_v5 = vpop.f32.mrb[4].mxu1 }
 0x159   : > { %v3040_v3 = vpop.f32.mrb[5].mxu0  ;;  %v1022_v4 = vsel %vm671_vm2, %v3038_v2, -inf  ;;  %v3048_v7 = vpop.f32.mrb[5].mxu1  ;;  %v1034_v17 = vsel %vm671_vm2, %v3044_v5, -inf }
 0x15a   : > { %1023 = vmax.xlane.f32.xlu0 %v1022_v4  ;;  %v3046_v6 = vpop.f32.mrb[6].mxu0  ;;  %v3052_v10 = vpop.f32.mrb[6].mxu1  ;;  %v1016_v11 = vsel %vm671_vm2, %v3040_v3, -inf  ;;  %v1028_v15 = vsel %vm671_vm2, %v3048_v7, -inf  ;;  %v3138_v4 = vld [vmem:[#allocation2 + $0x48] sm:$0xff] }
 0x15b   : > { %v1025_v9 = vsel %vm671_vm2, %v3046_v6, -inf  ;;  %v3056_v12 = vpop.f32.mrb[7].mxu0  ;;  %v3058_v13 = vpop.f32.mrb[7].mxu1  ;;  %v1037_v14 = vsel %vm671_vm2, %v3052_v10, -inf }
 0x15c   : > { %1026 = vmax.xlane.f32.xlu1 %v1025_v9  ;;  %v1019_v16 = vsel %vm671_vm2, %v3056_v12, -inf  ;;  %v1031_v18 = vsel %vm671_vm2, %v3058_v13, -inf }
 0x15e   : > { %1017 = vmax.xlane.f32.xlu0 %v1016_v11 }
 0x160   : > { %1038 = vmax.xlane.f32.xlu1 %v1037_v14 }
 0x162   : > { %1029 = vmax.xlane.f32.xlu0 %v1028_v15 }
 0x164   : > { %1020 = vmax.xlane.f32.xlu1 %v1019_v16  ;;  %v3148_v16 = vld [vmem:[#allocation2 + $0x70] sm:$0xff] }
 0x166   : > { %1035 = vmax.xlane.f32.xlu0 %v1034_v17 }
 0x168   : > { %1032 = vmax.xlane.f32.xlu1 %v1031_v18 }
 0x1d7   : > { %v1000_v20 = vpop.xlane.xlu0 %999 }
 0x1d8   : > { %v3075_v22 = vmax.f32 %v3070_v19, %v1000_v20  ;;  %v1006_v23 = vpop.xlane.xlu1 %1005 }
 0x1d9   : > { %v3082_v25 = vmax.f32 %v3072_v21, %v1006_v23  ;;  %v3153_v23 = vld [vmem:[#allocation2 + $0x68] sm:$0xff] }
 0x1da   : > { %1767 = vst.msk [vmem:[#allocation2 + $0x10] sm:$0xff] %vm1328_vm3, %v3075_v22  ;;  %1116 = vperm.xlu1 %2540, %v3075_v22  }
 0x1db   : > { %v1012_v26 = vpop.xlane.xlu0 %1011  ;;  %1769 = vst.msk [vmem:[#allocation2 + $0x20] sm:$0xff] %vm1328_vm3, %v3082_v25 }
 0x1dc   : > { %v3090_v28 = vmax.f32 %v3077_v24, %v1012_v26  ;;  %v1003_v29 = vpop.xlane.xlu1 %1002 }
 0x1dd   : > { %v1043_v31 = vmax.f32 %v3085_v27, %v1003_v29 }
 0x1de   : > { %1771 = vst.msk [vmem:[#allocation2 + $0x30] sm:$0xff] %vm1328_vm3, %v3090_v28  ;;  %1136 = vperm.xlu1 %2540, %v3090_v28  }
 0x1df   : > { %v994_v32 = vpop.xlane.xlu0 %993  ;;  %1768 = vst.msk [vmem:[#allocation2 + $0x18] sm:$0xff] %vm1328_vm3, %v1043_v31  ;;  %v1059_v11 = vsub.f32 %v3085_v27, %v1043_v31 }
 0x1e0   : > { %v1040_v34 = vmax.f32 %v976_v30, %v994_v32  ;;  %v1015_v35 = vpop.xlane.xlu1 %1014 }
 0x1e1   : > { %v3101_v37 = vmax.f32 %v3096_v33, %v1015_v35  ;;  %v1078_v27 = vmul.f32 1.442695, %v1059_v11 }
 0x1e2   : > { %1765 = vst.msk [vmem:[#allocation2] sm:$0xff] %vm1328_vm3, %v1040_v34  ;;  %1106 = vperm.xlu0 %2541, %v1040_v34   ;;  %1126 = vperm.xlu1 %2540, %v3082_v25   ;;  %v1056_v61 = vsub.f32 %v976_v30, %v1040_v34  ;;  %v1058_v34 = vsub.f32 %v3070_v19, %v3075_v22  ;;  %v2559_v19 = vld [vmem:[%s2913_s26 + $0x8] sm:$0xff]   ;;  %v2560_v22 = vld [vmem:[%s2913_s26 + $0x10] sm:$0xff]  }
 0x1e3   : > { %v997_v38 = vpop.xlane.xlu0 %996  ;;  %1772 = vst.msk [vmem:[#allocation2 + $0x38] sm:$0xff] %vm1328_vm3, %v3101_v37  ;;  %2416 = vmatprep.subr.bf16.mxu1 %v2560_v22 }
 0x1e4   : > { %v1041_v40 = vmax.f32 %v977_v36, %v997_v38  ;;  %v1009_v41 = vpop.xlane.xlu1 %1008  ;;  %v1072_v14 = vmul.f32 1.442695, %v1056_v61  ;;  %v1063_v38 = vsub.f32 %v3096_v33, %v3101_v37  ;;  %2417 = vmatpush3.bf16.msra.mxu1 %v2560_v22 }
 0x1e5   : > { %v1045_v43 = vmax.f32 %v981_v39, %v1009_v41  ;;  %v1060_v41 = vsub.f32 %v3072_v21, %v3082_v25  ;;  %v1062_v25 = vsub.f32 %v3077_v24, %v3090_v28  ;;  %v3193_v24 = vld [vmem:[%s2913_s26 + $0x20] sm:$0xff]  }
 0x1e6   : > { %1766 = vst.msk [vmem:[#allocation2 + $0x8] sm:$0xff] %vm1328_vm3, %v1041_v40  ;;  %1121 = vperm.xlu1 %2540, %v1043_v31   ;;  %v1057_v18 = vsub.f32 %v977_v36, %v1041_v40  ;;  %2566 = vpow2.f32 %v1072_v14  ;;  %v2558_v36 = vld [vmem:[%s2913_s26] sm:$0xff]  }
 0x1e7   : > { %v1024_v44 = vpop.xlane.xlu0 %1023  ;;  %1770 = vst.msk [vmem:[#allocation2 + $0x28] sm:$0xff] %vm1328_vm3, %v1045_v43  ;;  %v1061_v29 = vsub.f32 %v981_v39, %v1045_v43  ;;  %2568 = vpow2.f32 %v1078_v27  ;;  %2408 = vmatprep.subr.bf16.mxu0 %v2558_v36  ;;  %v1080_v21 = vmul.f32 1.442695, %v1060_v41 }
 0x1e8   : > { %v3113_v46 = vmax.f32 %v3106_v42, %v1024_v44  ;;  %v1074_v35 = vmul.f32 1.442695, %v1057_v18  ;;  %2409 = vmatpush3.bf16.msra.mxu0 %v2558_v36  ;;  %v2561_v44 = vld [vmem:[%s2913_s26 + $0x18] sm:$0xff]  }
 0x1e9   : > { %v1027_v47 = vpop.xlane.xlu1 %1026  ;;  %v1082_v39 = vmul.f32 1.442695, %v1061_v29  ;;  %2410 = vmatprep.subr.bf16.mxu0 %v2559_v19  ;;  %2418 = vmatprep.subr.bf16.mxu1 %v2561_v44 }
 0x1ea   : > { %1775 = vst.msk [vmem:[#allocation2 + $0x50] sm:$0xff] %vm1328_vm3, %v3113_v46  ;;  %v3120_v49 = vmax.f32 %v3109_v45, %v1027_v47  ;;  %1141 = vperm.xlu1 %2540, %v3101_v37   ;;  %2570 = vpow2.f32 %v1074_v35  ;;  %v1066_v61 = vsub.f32 %v3106_v42, %v3113_v46  ;;  %2419 = vmatpush3.bf16.msra.mxu1 %v2561_v44 }
 0x1eb   : > { %v1018_v53 = vpop.xlane.xlu0 %1017  ;;  %2572 = vpow2.f32 %v1082_v39 }
 0x1ec   : > { %1776 = vst.msk [vmem:[#allocation2 + $0x58] sm:$0xff] %vm1328_vm3, %v3120_v49  ;;  %v3128_v59 = vmax.f32 %v3115_v48, %v1018_v53  ;;  %1161 = vperm.xlu0 %2541, %v3120_v49   ;;  %v1067_v33 = vsub.f32 %v3109_v45, %v3120_v49  ;;  %2411 = vmatpush3.bf16.msra.mxu0 %v2559_v19  ;;  %v1084_v53 = vmul.f32 1.442695, %v1062_v25  ;;  %v1092_v42 = vmul.f32 1.442695, %v1066_v61 }
 0x1ed   : > { %v1039_v62 = vpop.xlane.xlu1 %1038  ;;  %2424 = vmatprep.subr.bf16.mxu0 %v3193_v24 }
 0x1ee   : > { %1773 = vst.msk [vmem:[#allocation2 + $0x40] sm:$0xff] %vm1328_vm3, %v3128_v59  ;;  %v3136_v0 = vmax.f32 %v3123_v56, %v1039_v62  ;;  %1111 = vperm.xlu1 %2540, %v1041_v40   ;;  %v1076_v40 = vmul.f32 1.442695, %v1058_v34  ;;  %v1094_v47 = vmul.f32 1.442695, %v1067_v33 }
 0x1ef   : > { %v1030_v1 = vpop.xlane.xlu0 %1029 }
 0x1f0   : > { %v1071_v8 = vsub.f32 %v3123_v56, %v3136_v0  ;;  %1780 = vst.msk [vmem:[#allocation2 + $0x78] sm:$0xff] %vm1328_vm3, %v3136_v0  ;;  %v3145_v9 = vmax.f32 %v3131_v63, %v1030_v1  ;;  %v3180_v37 = vpop.eup %2566  ;;  %2574 = vpow2.f32 %v1076_v40 }
 0x1f1   : > { %v1021_v15 = vpop.xlane.xlu1 %1020  ;;  %v3188_v49 = vpop.eup %2568 }
 0x1f2   : > { %1777 = vst.msk [vmem:[#allocation2 + $0x60] sm:$0xff] %vm1328_vm3, %v3145_v9  ;;  %v1049_v17 = vmax.f32 %v3138_v4, %v1021_v15  ;;  %1131 = vperm.xlu1 %2540, %v1045_v43   ;;  %v1086_v43 = vmul.f32 1.442695, %v1063_v38  ;;  %v3210_v15 = vld [vmem:[%s2913_s26 + $0x30] sm:$0xff]  }
 0x1f3   : > { %v1036_v20 = vpop.xlane.xlu0 %1035  ;;  %2432 = vmatprep.subr.bf16.mxu1 %v3210_v15 }
 0x1f4   : > { %1774 = vst.msk [vmem:[#allocation2 + $0x48] sm:$0xff] %vm1328_vm3, %v1049_v17  ;;  %v3157_v26 = vmax.f32 %v3148_v16, %v1036_v20  ;;  %1151 = vperm.xlu0 %2541, %v1049_v17   ;;  %2576 = vpow2.f32 %v1086_v43  ;;  %v1065_v45 = vsub.f32 %v3138_v4, %v1049_v17  ;;  %v3196_v28 = vpop.eup %2570  ;;  %v1068_v20 = vsub.f32 %v3131_v63, %v3145_v9 }
 0x1f5   : > { %v1033_v30 = vpop.xlane.xlu1 %1032  ;;  %2578 = vpow2.f32 %v1080_v21  ;;  %v3201_v4 = vpop.eup %2572 }
 0x1f6   : > { %v1070_v31 = vsub.f32 %v3148_v16, %v3157_v26  ;;  %1779 = vst.msk [vmem:[#allocation2 + $0x70] sm:$0xff] %vm1328_vm3, %v3157_v26  ;;  %v1053_v32 = vmax.f32 %v3153_v23, %v1033_v30  ;;  %1156 = vperm.xlu1 %2540, %v3113_v46   ;;  %2580 = vpow2.f32 %v1094_v47  ;;  %v1090_v62 = vmul.f32 1.442695, %v1065_v45 }
 0x1f7   : > { %2582 = vpow2.f32 %v1084_v53  ;;  %v1064_v46 = vsub.f32 %v3115_v48, %v3128_v59 }
 0x1f8   : > { %1778 = vst.msk [vmem:[#allocation2 + $0x68] sm:$0xff] %vm1328_vm3, %v1053_v32  ;;  %1171 = vperm.xlu0 %2541, %v1053_v32   ;;  %v1069_v1 = vsub.f32 %v3153_v23, %v1053_v32  ;;  %2584 = vpow2.f32 %v1090_v62  ;;  %v1096_v23 = vmul.f32 1.442695, %v1068_v20 }
 0x1f9   : > { %2586 = vpow2.f32 %v1092_v42  ;;  %v1088_v18 = vmul.f32 1.442695, %v1064_v46 }
 0x1fa   : > { %1146 = vperm.xlu1 %2540, %v3128_v59   ;;  %v3206_v11 = vpop.eup %2574  ;;  %v1098_v14 = vmul.f32 1.442695, %v1069_v1 }
 0x1fc   : > { %1181 = vperm.xlu0 %2541, %v3136_v0   ;;  %2588 = vpow2.f32 %v1098_v14 }
 0x1fd   : > { %2590 = vpow2.f32 %v1088_v18 }
 0x1fe   : > { %1166 = vperm.xlu1 %2540, %v3145_v9   ;;  %v3212_v17 = vpop.eup %2576  ;;  %2592 = vpow2.f32 %v1096_v23 }
 0x1ff   : > { %v3218_v48 = vpop.eup %2578 }
 0x200   : > { %1363 = vperm.xlu0 %2541, %v3180_v37   ;;  %v3221_v59 = vpop.eup %2580 }
 0x201   : > { %v3224_v27 = vpop.eup %2582 }
 0x202   : > { %1176 = vperm.xlu1 %2540, %v3157_v26   ;;  %v3227_v63 = vpop.eup %2584 }
 0x203   : > { %v3230_v9 = vpop.eup %2586 }
 0x204   : > { %1378 = vperm.xlu0 %2541, %v3188_v49  }
 0x206   : > { %1368 = vperm.xlu1 %2540, %v3196_v28   ;;  %v3233_v29 = vpop.eup %2588 }
 0x207   : > { %v3236_v30 = vpop.eup %2590 }
 0x208   : > { %1388 = vperm.xlu0 %2541, %v3201_v4   ;;  %v3239_v32 = vpop.eup %2592 }
 0x20a   : > { %1373 = vperm.xlu1 %2540, %v3206_v11  }
 0x20c   : > { %1398 = vperm.xlu0 %2541, %v3212_v17  }
 0x20e   : > { %1383 = vperm.xlu1 %2540, %v3218_v48  }
 0x210   : > { %1418 = vperm.xlu0 %2541, %v3221_v59  }
 0x212   : > { %1393 = vperm.xlu1 %2540, %v3224_v27  }
 0x214   : > { %1408 = vperm.xlu0 %2541, %v3227_v63  }
 0x216   : > { %1413 = vperm.xlu1 %2540, %v3230_v9  }
 0x218   : > { %1428 = vperm.xlu0 %2541, %v3233_v29  }
 0x21a   : > { %1403 = vperm.xlu1 %2540, %v3236_v30  }
 0x21e   : > { %1423 = vperm.xlu1 %2540, %v3239_v32  }
 0x259   : > { %v1117_v34 = vpop.permute.xlu1 %1116 }
 0x25a   : > { %v1186_v35 = vsub.f32 %v3006_v50, %v1117_v34 }
 0x25c   : > { %v1204_v36 = vmul.f32 1.442695, %v1186_v35 }
 0x25d   : > { %v1137_v38 = vpop.permute.xlu1 %1136 }
 0x25e   : > { %2594 = vpow2.f32 %v1204_v36  ;;  %v1190_v39 = vsub.f32 %v3008_v51, %v1137_v38 }
 0x260   : > { %v1212_v40 = vmul.f32 1.442695, %v1190_v39 }
 0x261   : > { %v1107_v41 = vpop.permute.xlu0 %1106  ;;  %v1127_v19 = vpop.permute.xlu1 %1126 }
 0x262   : > { %2596 = vpow2.f32 %v1212_v40  ;;  %v1184_v22 = vsub.f32 %v3010_v52, %v1107_v41  ;;  %v1188_v43 = vsub.f32 %v3014_v54, %v1127_v19 }
 0x264   : > { %v1200_v33 = vmul.f32 1.442695, %v1184_v22  ;;  %v1208_v21 = vmul.f32 1.442695, %v1188_v43 }
 0x265   : > { %v1122_v25 = vpop.permute.xlu1 %1121 }
 0x266   : > { %2598 = vpow2.f32 %v1200_v33  ;;  %v1187_v44 = vsub.f32 %v3016_v55, %v1122_v25 }
 0x267   : > { %2600 = vpow2.f32 %v1208_v21 }
 0x268   : > { %v3247_v50 = vpop.eup %2594  ;;  %v1206_v47 = vmul.f32 1.442695, %v1187_v44 }
 0x269   : > { %v1142_v45 = vpop.permute.xlu1 %1141  ;;  %v1270_v51 = vsel %vm671_vm2, %v3247_v50, 0.0 }
 0x26a   : > { %2602 = vpow2.f32 %v1206_v47  ;;  %v1191_v53 = vsub.f32 %v3022_v58, %v1142_v45  ;;  %1271 = vadd.xlane.f32.xlu0 %v1270_v51 }
 0x26b   : > { %v1162_v61 = vpop.permute.xlu0 %1161 }
 0x26c   : > { %v3252_v52 = vpop.eup %2596  ;;  %v1214_v54 = vmul.f32 1.442695, %v1191_v53  ;;  %v1195_v46 = vsub.f32 %v3046_v6, %v1162_v61 }
 0x26d   : > { %v1112_v62 = vpop.permute.xlu1 %1111  ;;  %v1282_v55 = vsel %vm671_vm2, %v3252_v52, 0.0 }
 0x26e   : > { %2604 = vpow2.f32 %v1214_v54  ;;  %v1185_v1 = vsub.f32 %v3020_v57, %v1112_v62  ;;  %1283 = vadd.xlane.f32.xlu0 %v1282_v55  ;;  %v1222_v38 = vmul.f32 1.442695, %v1195_v46  ;;  %v2563_v55 = vld [vmem:[%s2913_s26 + $0x28] sm:$0xff]  }
 0x270   : > { %v2599_v42 = vpop.eup %2598  ;;  %v1202_v14 = vmul.f32 1.442695, %v1185_v1 }
 0x271   : > { %v2601_v18 = vpop.eup %2600  ;;  %v1132_v20 = vpop.permute.xlu1 %1131  ;;  %v1264_v58 = vsel %vm671_vm2, %v2599_v42, 0.0 }
 0x272   : > { %2606 = vpow2.f32 %v1202_v14  ;;  %v1189_v23 = vsub.f32 %v3026_v60, %v1132_v20  ;;  %1265 = vadd.xlane.f32.xlu1 %v1264_v58  ;;  %v1276_v34 = vsel %vm671_vm2, %v2601_v18, 0.0  ;;  %v2565_v20 = vld [vmem:[%s2913_s26 + $0x38] sm:$0xff]  }
 0x273   : > { %1277 = vadd.xlane.f32.xlu0 %v1276_v34  ;;  %v1152_v35 = vpop.permute.xlu0 %1151 }
 0x274   : > { %v2603_v36 = vpop.eup %2602  ;;  %v1210_v57 = vmul.f32 1.442695, %v1189_v23  ;;  %v1193_v39 = vsub.f32 %v3056_v12, %v1152_v35 }
 0x275   : > { %v1157_v40 = vpop.permute.xlu1 %1156  ;;  %v1273_v6 = vsel %vm671_vm2, %v2603_v36, 0.0  ;;  %v1458_v41 = vpack.c.bf16 %v2603_v36, %v3247_v50 }
 0x276   : > { %2608 = vpow2.f32 %v1210_v57  ;;  %v1194_v19 = vsub.f32 %v3038_v2, %v1157_v40  ;;  %1274 = vadd.xlane.f32.xlu1 %v1273_v6  ;;  %v1218_v33 = vmul.f32 1.442695, %v1193_v39 }
 0x277   : > { %v1172_v60 = vpop.permute.xlu0 %1171  ;;  %2610 = vpow2.f32 %v1222_v38 }
 0x278   : > { %v2605_v22 = vpop.eup %2604  ;;  %v1220_v43 = vmul.f32 1.442695, %v1194_v19  ;;  %v1197_v21 = vsub.f32 %v3058_v13, %v1172_v60 }
 0x279   : > { %v1147_v25 = vpop.permute.xlu1 %1146  ;;  %v1285_v44 = vsel %vm671_vm2, %v2605_v22, 0.0  ;;  %v1460_v12 = vpack.c.bf16 %v2605_v22, %v3252_v52 }
 0x27a   : > { %2612 = vpow2.f32 %v1220_v43  ;;  %v1192_v50 = vsub.f32 %v3040_v3, %v1147_v25  ;;  %1286 = vadd.xlane.f32.xlu1 %v1285_v44  ;;  %v1226_v53 = vmul.f32 1.442695, %v1197_v21  ;;  %v1102_v25 = vmul.f32 1.442695, %v1071_v8 }
 0x27b   : > { %v1182_v47 = vpop.permute.xlu0 %1181  ;;  %2614 = vpow2.f32 %v1218_v33  ;;  %v1100_v33 = vmul.f32 1.442695, %v1070_v31 }
 0x27c   : > { %v2607_v2 = vpop.eup %2606  ;;  %v1216_v45 = vmul.f32 1.442695, %v1192_v50  ;;  %v1199_v51 = vsub.f32 %v3052_v10, %v1182_v47 }
 0x27d   : > { %v1167_v54 = vpop.permute.xlu1 %1166  ;;  %v1267_v13 = vsel %vm671_vm2, %v2607_v2, 0.0  ;;  %v1457_v61 = vpack.c.bf16 %v2607_v2, %v2599_v42 }
 0x27e   : > { %2616 = vpow2.f32 %v1216_v45  ;;  %v1230_v62 = vmul.f32 1.442695, %v1199_v51  ;;  %v1196_v52 = vsub.f32 %v3048_v7, %v1167_v54  ;;  %1268 = vadd.xlane.f32.xlu0 %v1267_v13  ;;  %v1234_v54 = vld [vmem:[#allocation3 + $0x10] sm:$0xff] }
 0x27f   : > { %2412 = vmatprep.mubr.msk.bf16.mxu0 %vm671_vm2, %v1457_v61  ;;  %v3306_v16 = vpop.permute.xlu0 %1363  ;;  %v1250_v61 = vmul.f32 %v3206_v11, %v1234_v54 }
 0x280   : > { %v2609_v3 = vpop.eup %2608  ;;  %2618 = vpow2.f32 %v1230_v62  ;;  %v1224_v1 = vmul.f32 1.442695, %v1196_v52  ;;  %2413 = vmatmul.mubr.msk.bf16.vlgmr.msra.gmra.mrb[8].mxu0 %vm671_vm2, %v1458_v41  ;;  %v1238_v52 = vld [vmem:[#allocation3 + $0x30] sm:$0xff] }
 0x281   : > { %2620 = vpow2.f32 %v1226_v53  ;;  %v1177_v10 = vpop.permute.xlu1 %1176  ;;  %v1279_v46 = vsel %vm671_vm2, %v2609_v3, 0.0  ;;  %v1459_v14 = vpack.c.bf16 %v2609_v3, %v2601_v18  ;;  %2425 = vmatpush3.bf16.msra.mxu0 %v3193_v24  ;;  %v2611_v42 = vpop.eup %2610  ;;  %v1254_v3 = vmul.f32 %v3224_v27, %v1238_v52  ;;  %v1246_v52 = vld [vmem:[#allocation3 + $0x70] sm:$0xff] }
 0x282   : > { %2622 = vpow2.f32 %v1224_v1  ;;  %v1198_v7 = vsub.f32 %v3044_v5, %v1177_v10  ;;  %1280 = vadd.xlane.f32.xlu1 %v1279_v46  ;;  %2426 = vmatprep.subr.bf16.mxu0 %v2563_v55  ;;  %v1297_v34 = vsel %vm671_vm2, %v2611_v42, 0.0  ;;  %v1232_v46 = vld [vmem:[#allocation3] sm:$0xff] }
 0x283   : > { %2420 = vmatprep.mubr.msk.bf16.mxu1 %vm671_vm2, %v1459_v14  ;;  %v3308_v26 = vpop.permute.xlu0 %1378 }
 0x284   : > { %v2613_v58 = vpop.eup %2612  ;;  %v1228_v23 = vmul.f32 1.442695, %v1198_v7  ;;  %2421 = vmatmul.mubr.msk.bf16.vlgmr.msra.gmra.mrb[8].mxu1 %vm671_vm2, %v1460_v12  ;;  %v1248_v7 = vmul.f32 %v3180_v37, %v1232_v46 }
 0x285   : > { %v1294_v35 = vsel %vm671_vm2, %v2613_v58, 0.0  ;;  %2427 = vmatpush3.bf16.msra.mxu0 %v2563_v55  ;;  %2433 = vmatpush3.bf16.msra.mxu1 %v3210_v15  ;;  %v1462_v24 = vpack.c.bf16 %v2611_v42, %v2613_v58  ;;  %v2615_v5 = vpop.eup %2614  ;;  %v3310_v31 = vpop.permute.xlu1 %1368  ;;  %v1236_v42 = vld [vmem:[#allocation3 + $0x20] sm:$0xff]  ;;  %v1235_v58 = vld [vmem:[#allocation3 + $0x18] sm:$0xff] }
 0x286   : > { %2624 = vpow2.f32 %v1228_v23  ;;  %1298 = vadd.xlane.f32.xlu1 %v1297_v34  ;;  %1295 = vadd.xlane.f32.xlu0 %v1294_v35  ;;  %v1291_v6 = vsel %vm671_vm2, %v2615_v5, 0.0  ;;  %v1251_v27 = vmul.f32 %v3188_v49, %v1235_v58 }
 0x287   : > { %2434 = vmatprep.subr.bf16.mxu1 %v2565_v20  ;;  %2626 = vpow2.f32 %v1100_v33  ;;  %v3312_v50 = vpop.permute.xlu0 %1388 }
 0x288   : > { %v2617_v18 = vpop.eup %2616  ;;  %2628 = vpow2.f32 %v1102_v25  ;;  %v1247_v25 = vld [vmem:[#allocation3 + $0x78] sm:$0xff] }
 0x289   : > { %v1461_v36 = vpack.c.bf16 %v2615_v5, %v2617_v18  ;;  %2435 = vmatpush3.bf16.msra.mxu1 %v2565_v20  ;;  %v1288_v43 = vsel %vm671_vm2, %v2617_v18, 0.0  ;;  %v3314_v47 = vpop.permute.xlu1 %1373  ;;  %v1252_v20 = vmul.f32 %v3218_v48, %v1236_v42  ;;  %v1239_v5 = vld [vmem:[#allocation3 + $0x38] sm:$0xff]  ;;  %v1233_v48 = vld [vmem:[#allocation3 + $0x8] sm:$0xff] }
 0x28a   : > { %v2619_v38 = vpop.eup %2618  ;;  %v1255_v37 = vmul.f32 %v3212_v17, %v1239_v5  ;;  %v1346_v5 = vld [vmem:[#allocation4 + $0x8] sm:$0xff] }
 0x28b   : > { %v2621_v57 = vpop.eup %2620  ;;  %2428 = vmatprep.mubr.msk.bf16.mxu0 %vm671_vm2, %v1461_v36  ;;  %v1309_v39 = vsel %vm671_vm2, %v2619_v38, 0.0  ;;  %v3316_v56 = vpop.permute.xlu0 %1398 }
 0x28c   : > { %v2623_v40 = vpop.eup %2622  ;;  %1310 = vadd.xlane.f32.xlu1 %v1309_v39  ;;  %2429 = vmatmul.mubr.msk.bf16.vlgmr.msra.gmra.mrb[12].mxu0 %vm671_vm2, %v1462_v24  ;;  %v1303_v22 = vsel %vm671_vm2, %v2621_v57, 0.0 }
 0x28d   : > { %v1463_v15 = vpack.c.bf16 %v2621_v57, %v2623_v40  ;;  %v1300_v21 = vsel %vm671_vm2, %v2623_v40, 0.0  ;;  %v3318_v0 = vpop.permute.xlu1 %1383  ;;  %v1249_v57 = vmul.f32 %v3196_v28, %v1233_v48  ;;  %v1237_v40 = vld [vmem:[#allocation3 + $0x28] sm:$0xff] }
 0x28e   : > { %v1253_v49 = vmul.f32 %v3201_v4, %v1237_v40  ;;  %v1352_v40 = vld [vmem:[#allocation4 + $0x38] sm:$0xff] }
 0x28f   : > { %2436 = vmatprep.mubr.msk.bf16.mxu1 %vm671_vm2, %v1463_v15  ;;  %v3320_v8 = vpop.permute.xlu0 %1418 }
 0x290   : > { %v2625_v41 = vpop.eup %2624  ;;  %1292 = vadd.xlane.f32.xlu1 %v1291_v6 }
 0x291   : > { %v1306_v19 = vsel %vm671_vm2, %v2625_v41, 0.0  ;;  %v1464_v60 = vpack.c.bf16 %v2619_v38, %v2625_v41  ;;  %v3300_v44 = vpop.eup %2626  ;;  %v3322_v2 = vpop.permute.xlu1 %1393  ;;  %v1242_v41 = vld [vmem:[#allocation3 + $0x50] sm:$0xff] }
 0x292   : > { %1307 = vadd.xlane.f32.xlu0 %v1306_v19  ;;  %v3303_v12 = vpop.eup %2628  ;;  %v1243_v19 = vld [vmem:[#allocation3 + $0x58] sm:$0xff]  ;;  %v1258_v17 = vmul.f32 %v3230_v9, %v1242_v41 }
 0x293   : > { %2437 = vmatmul.mubr.msk.bf16.vlgmr.msra.gmra.mrb[12].mxu1 %vm671_vm2, %v1464_v60  ;;  %v3324_v45 = vpop.permute.xlu0 %1408  ;;  %v1263_v4 = vmul.f32 %v3303_v12, %v1247_v25 }
 0x294   : > { %1304 = vadd.xlane.f32.xlu1 %v1303_v22  ;;  %v1259_v22 = vmul.f32 %v3221_v59, %v1243_v19 }
 0x295   : > { %v3326_v51 = vpop.permute.xlu1 %1413 }
 0x296   : > { %1289 = vadd.xlane.f32.xlu0 %v1288_v43 }
 0x297   : > { %v3328_v53 = vpop.permute.xlu0 %1428 }
 0x299   : > { %v3330_v13 = vpop.permute.xlu1 %1403 }
 0x29a   : > { %1301 = vadd.xlane.f32.xlu0 %v1300_v21 }
 0x29d   : > { %v3335_v1 = vpop.permute.xlu1 %1423 }
 0x2a5   : > { %1433 = vperm.xlu1 %2540, %v3300_v44  }
 0x2b0   : > { %1438 = vperm.xlu0 %2541, %v3303_v12  }
 0x2f7   : > { %v1272_v62 = vpop.xlane.xlu0 %1271 }
 0x2f8   : > { %v1314_v55 = vadd.f32 %v1272_v62, %v1250_v61  ;;  %v1241_v61 = vld [vmem:[#allocation3 + $0x48] sm:$0xff] }
 0x2f9   : > { %v1257_v9 = vmul.f32 %v3227_v63, %v1241_v61  ;;  %v1244_v63 = vld [vmem:[#allocation3 + $0x60] sm:$0xff] }
 0x2fa   : > { %1331 = vst.msk [vmem:[#allocation3 + $0x10] sm:$0xff] %vm1328_vm3, %v1314_v55  ;;  %v1245_v55 = vld [vmem:[#allocation3 + $0x68] sm:$0xff] }
 0x2fb   : > { %v1284_v10 = vpop.xlane.xlu0 %1283  ;;  %v1261_v12 = vmul.f32 %v3233_v29, %v1245_v55  ;;  %v1347_v29 = vld [vmem:[#allocation4 + $0x10] sm:$0xff] }
 0x2fc   : > { %v1318_v14 = vadd.f32 %v1284_v10, %v1254_v3  ;;  %v1262_v10 = vmul.f32 %v3300_v44, %v1246_v52  ;;  %v1260_v44 = vmul.f32 %v3239_v32, %v1244_v63  ;;  %v1442_v32 = vmul.f32 %v3310_v31, %v1346_v5 }
 0x2fe   : > { %1335 = vst.msk [vmem:[#allocation3 + $0x30] sm:$0xff] %vm1328_vm3, %v1318_v14  ;;  %v1240_v14 = vld [vmem:[#allocation3 + $0x40] sm:$0xff] }
 0x2ff   : > { %v1266_v11 = vpop.xlane.xlu1 %1265 }
 0x300   : > { %v1278_v23 = vpop.xlane.xlu0 %1277  ;;  %v1312_v34 = vadd.f32 %v1266_v11, %v1248_v7  ;;  %v1256_v11 = vmul.f32 %v3236_v30, %v1240_v14 }
 0x301   : > { %v1316_v35 = vadd.f32 %v1278_v23, %v1252_v20 }
 0x302   : > { %1329 = vst.msk [vmem:[#allocation3] sm:$0xff] %vm1328_vm3, %v1312_v34 }
 0x303   : > { %1333 = vst.msk [vmem:[#allocation3 + $0x20] sm:$0xff] %vm1328_vm3, %v1316_v35  ;;  %v1275_v24 = vpop.xlane.xlu1 %1274 }
 0x304   : > { %v1315_v18 = vadd.f32 %v1275_v24, %v1251_v27  ;;  %v1345_v27 = vld [vmem:[#allocation4] sm:$0xff]  ;;  %v1348_v24 = vld [vmem:[#allocation4 + $0x18] sm:$0xff] }
 0x305   : > { %v1441_v30 = vmul.f32 %v3306_v16, %v1345_v27  ;;  %v1444_v48 = vmul.f32 %v3308_v26, %v1348_v24 }
 0x306   : > { %1332 = vst.msk [vmem:[#allocation3 + $0x18] sm:$0xff] %vm1328_vm3, %v1315_v18  ;;  %v1443_v18 = vmul.f32 %v3314_v47, %v1347_v29 }
 0x307   : > { %v1287_v36 = vpop.xlane.xlu1 %1286 }
 0x308   : > { %v1319_v38 = vadd.f32 %v1287_v36, %v1255_v37  ;;  %v1351_v37 = vld [vmem:[#allocation4 + $0x30] sm:$0xff] }
 0x309   : > { %v1447_v41 = vmul.f32 %v3322_v2, %v1351_v37 }
 0x30a   : > { %1336 = vst.msk [vmem:[#allocation3 + $0x38] sm:$0xff] %vm1328_vm3, %v1319_v38  ;;  %v1349_v38 = vld [vmem:[#allocation4 + $0x20] sm:$0xff] }
 0x30b   : > { %v1269_v39 = vpop.xlane.xlu0 %1268  ;;  %v1445_v16 = vmul.f32 %v3318_v0, %v1349_v38 }
 0x30c   : > { %v1313_v15 = vadd.f32 %v1269_v39, %v1249_v57 }
 0x30e   : > { %1330 = vst.msk [vmem:[#allocation3 + $0x8] sm:$0xff] %vm1328_vm3, %v1313_v15 }
 0x30f   : > { %v1281_v6 = vpop.xlane.xlu1 %1280 }
 0x310   : > { %v1317_v60 = vadd.f32 %v1281_v6, %v1253_v49  ;;  %v1350_v6 = vld [vmem:[#allocation4 + $0x28] sm:$0xff] }
 0x311   : > { %v1792_v38 = vld [vmem:[#allocation3 + $0x38] sm:$0xff] (!%p2305_p3) }
 0x312   : > { %1334 = vst.msk [vmem:[#allocation3 + $0x28] sm:$0xff] %vm1328_vm3, %v1317_v60 }
 0x313   : > { %v1296_v43 = vpop.xlane.xlu0 %1295  ;;  %v1299_v33 = vpop.xlane.xlu1 %1298 }
 0x314   : > { %v1322_v28 = vadd.f32 %v1296_v43, %v1258_v17  ;;  %v1323_v21 = vadd.f32 %v1299_v33, %v1259_v22  ;;  %v1448_v17 = vmul.f32 %v3316_v56, %v1352_v40  ;;  %v1446_v43 = vmul.f32 %v3312_v50, %v1350_v6  ;;  %v1356_v56 = vld [vmem:[#allocation4 + $0x58] sm:$0xff] }
 0x315   : > { %v1452_v52 = vmul.f32 %v3320_v8, %v1356_v56  ;;  %v1358_v8 = vld [vmem:[#allocation4 + $0x68] sm:$0xff] }
 0x316   : > { %1339 = vst.msk [vmem:[#allocation3 + $0x50] sm:$0xff] %vm1328_vm3, %v1322_v28  ;;  %1340 = vst.msk [vmem:[#allocation3 + $0x58] sm:$0xff] %vm1328_vm3, %v1323_v21  ;;  %v1355_v21 = vld [vmem:[#allocation4 + $0x50] sm:$0xff]  ;;  %v1786_v37 = vld [vmem:[#allocation3 + $0x8] sm:$0xff] (!%p2305_p3) }
 0x317   : > { %v1451_v50 = vmul.f32 %v3326_v51, %v1355_v21 }
 0x319   : > { %v1311_v54 = vpop.xlane.xlu1 %1310 }
 0x31a   : > { %v1327_v62 = vadd.f32 %v1311_v54, %v1263_v4  ;;  %v1353_v4 = vld [vmem:[#allocation4 + $0x40] sm:$0xff]  ;;  %v1354_v54 = vld [vmem:[#allocation4 + $0x48] sm:$0xff] }
 0x31b   : > { %v1449_v61 = vmul.f32 %v3330_v13, %v1353_v4  ;;  %v1450_v55 = vmul.f32 %v3324_v45, %v1354_v54  ;;  %v1360_v13 = vld [vmem:[#allocation4 + $0x78] sm:$0xff] }
 0x31c   : > { %1344 = vst.msk [vmem:[#allocation3 + $0x78] sm:$0xff] %vm1328_vm3, %v1327_v62 }
 0x31d   : > { %v1293_v59 = vpop.xlane.xlu1 %1292 }
 0x31e   : > { %v1321_v3 = vadd.f32 %v1293_v59, %v1257_v9 }
 0x31f   : > { %v1308_v46 = vpop.xlane.xlu0 %1307 }
 0x320   : > { %1338 = vst.msk [vmem:[#allocation3 + $0x48] sm:$0xff] %vm1328_vm3, %v1321_v3  ;;  %v1326_v42 = vadd.f32 %v1308_v46, %v1262_v10  ;;  %v1359_v46 = vld [vmem:[#allocation4 + $0x70] sm:$0xff] }
 0x321   : > { %v1305_v7 = vpop.xlane.xlu1 %1304 }
 0x322   : > { %1343 = vst.msk [vmem:[#allocation3 + $0x70] sm:$0xff] %vm1328_vm3, %v1326_v42  ;;  %v1325_v20 = vadd.f32 %v1305_v7, %v1261_v12  ;;  %v1357_v7 = vld [vmem:[#allocation4 + $0x60] sm:$0xff] }
 0x323   : > { %v1290_v58 = vpop.xlane.xlu0 %1289  ;;  %v1453_v45 = vmul.f32 %v3335_v1, %v1357_v7  ;;  %v1787_v1 = vld [vmem:[#allocation3 + $0x10] sm:$0xff] (!%p2305_p3) }
 0x324   : > { %1342 = vst.msk [vmem:[#allocation3 + $0x68] sm:$0xff] %vm1328_vm3, %v1325_v20  ;;  %v1320_v23 = vadd.f32 %v1290_v58, %v1256_v11  ;;  %2632 = vrcp.f32 (!%p2305_p3), %v1787_v1 }
 0x325   : > { %v1434_v14 = vpop.permute.xlu1 %1433 }
 0x326   : > { %1337 = vst.msk [vmem:[#allocation3 + $0x40] sm:$0xff] %vm1328_vm3, %v1320_v23  ;;  %v1455_v11 = vmul.f32 %v1434_v14, %v1359_v46 }
 0x327   : > { %v1302_v34 = vpop.xlane.xlu0 %1301  ;;  %v1794_v40 = vld [vmem:[#allocation3 + $0x48] sm:$0xff] (!%p2305_p3) }
 0x328   : > { %v1324_v35 = vadd.f32 %v1302_v34, %v1260_v44  ;;  %v1454_v34 = vmul.f32 %v3328_v53, %v1358_v8  ;;  %v2755_v53 = vmov (!%p2305_p3), 0  }
 0x329   : > { %2631 = vset.pattern.permute.xlu1 (!%p2305_p3), %v2755_v53  ;;  %2630 = vset.pattern.permute.xlu0 (!%p2305_p3), %v2755_v53 }
 0x32a   : > { %1341 = vst.msk [vmem:[#allocation3 + $0x60] sm:$0xff] %vm1328_vm3, %v1324_v35 }
 0x32f   : > { %v1439_v20 = vpop.permute.xlu0 %1438 }
 0x330   : > { %v1456_v63 = vmul.f32 %v1439_v20, %v1360_v13 }
 0x353   : > { %v2414_v36 = vpop.f32.mrb[8].mxu0 }
 0x354   : > { %v1735_v57 = vadd.f32 %v2414_v36, %v1443_v18  ;;  %v1517_v39 = vpop.f32.mrb[9].mxu0  ;;  %v1785_v18 = vld [vmem:[#allocation3] sm:$0xff] (!%p2305_p3)  ;;  %v1790_v36 = vld [vmem:[#allocation3 + $0x28] sm:$0xff] (!%p2305_p3) }
 0x355   : > { %v1733_v15 = vadd.f32 %v1517_v39, %v1441_v30  ;;  %v2415_v49 = vpop.f32.mrb[10].mxu0  ;;  %v1788_v30 = vld [vmem:[#allocation3 + $0x18] sm:$0xff] (!%p2305_p3)  ;;  %2634 = vrcp.f32 (!%p2305_p3), %v1785_v18  ;;  %v2633_v39 = vpop.eup (!%p2305_p3), %2632 }
 0x356   : > { %1751 = vst.msk [vmem:[#allocation4 + $0x10] sm:$0xff] %vm671_vm2, %v1735_v57  ;;  %v1736_v47 = vadd.f32 %v2415_v49, %v1444_v48  ;;  %v1520_v19 = vpop.f32.mrb[11].mxu0  ;;  %2636 = vrcp.f32 (!%p2305_p3), %v1788_v30  ;;  %v1789_v48 = vld [vmem:[#allocation3 + $0x20] sm:$0xff] (!%p2305_p3)  ;;  %v1791_v57 = vld [vmem:[#allocation3 + $0x30] sm:$0xff] (!%p2305_p3)  ;;  %1845 = vperm.xlu1 (!%p2305_p3), %2631, %v2633_v39  }
 0x357   : > { %1749 = vst.msk [vmem:[#allocation4] sm:$0xff] %vm671_vm2, %v1733_v15  ;;  %v1734_v26 = vadd.f32 %v1520_v19, %v1442_v32  ;;  %v2422_v60 = vpop.f32.mrb[8].mxu1  ;;  %2638 = vrcp.f32 (!%p2305_p3), %v1786_v37  ;;  %v1793_v49 = vld [vmem:[#allocation3 + $0x40] sm:$0xff] (!%p2305_p3)  ;;  %v1795_v19 = vld [vmem:[#allocation3 + $0x50] sm:$0xff] (!%p2305_p3) }
 0x358   : > { %1752 = vst.msk [vmem:[#allocation4 + $0x18] sm:$0xff] %vm671_vm2, %v1736_v47  ;;  %v1739_v31 = vadd.f32 %v2422_v60, %v1447_v41  ;;  %v1584_v22 = vpop.f32.mrb[9].mxu1  ;;  %2640 = vrcp.f32 (!%p2305_p3), %v1790_v36  ;;  %v1796_v41 = vld [vmem:[#allocation3 + $0x58] sm:$0xff] (!%p2305_p3) }
 0x359   : > { %1750 = vst.msk [vmem:[#allocation4 + $0x8] sm:$0xff] %vm671_vm2, %v1734_v26  ;;  %v1737_v2 = vadd.f32 %v1584_v22, %v1445_v16  ;;  %v2423_v33 = vpop.f32.mrb[10].mxu1  ;;  %2642 = vrcp.f32 (!%p2305_p3), %v1789_v48  ;;  %v1798_v26 = vld [vmem:[#allocation3 + $0x68] sm:$0xff] (!%p2305_p3)  ;;  %v1800_v22 = vld [vmem:[#allocation3 + $0x78] sm:$0xff] (!%p2305_p3) }
 0x35a   : > { %1755 = vst.msk [vmem:[#allocation4 + $0x30] sm:$0xff] %vm671_vm2, %v1739_v31  ;;  %v1740_v28 = vadd.f32 %v2423_v33, %v1448_v17  ;;  %v1587_v0 = vpop.f32.mrb[11].mxu1  ;;  %2644 = vrcp.f32 (!%p2305_p3), %v1792_v38  ;;  %v1797_v17 = vld [vmem:[#allocation3 + $0x60] sm:$0xff] (!%p2305_p3) }
 0x35b   : > { %1753 = vst.msk [vmem:[#allocation4 + $0x20] sm:$0xff] %vm671_vm2, %v1737_v2  ;;  %v1738_v25 = vadd.f32 %v1587_v0, %v1446_v43  ;;  %2646 = vrcp.f32 (!%p2305_p3), %v1791_v57  ;;  %v1799_v2 = vld [vmem:[#allocation3 + $0x70] sm:$0xff] (!%p2305_p3) }
 0x35c   : > { %1756 = vst.msk [vmem:[#allocation4 + $0x38] sm:$0xff] %vm671_vm2, %v1740_v28  ;;  %2648 = vrcp.f32 (!%p2305_p3), %v1794_v40 }
 0x35d   : > { %1754 = vst.msk [vmem:[#allocation4 + $0x28] sm:$0xff] %vm671_vm2, %v1738_v25  ;;  %2650 = vrcp.f32 (!%p2305_p3), %v1793_v49  ;;  %v1819_v54 = vld [vmem:[#allocation4 + $0x10] sm:$0xff] (!%p2305_p3) }
 0x35e   : > { %2652 = vrcp.f32 (!%p2305_p3), %v1796_v41 }
 0x35f   : > { %v2430_v62 = vpop.f32.mrb[12].mxu0  ;;  %v2635_v32 = vpop.eup (!%p2305_p3), %2634  ;;  %2654 = vrcp.f32 (!%p2305_p3), %v1795_v19 }
 0x360   : > { %v1743_v9 = vadd.f32 %v2430_v62, %v1451_v50  ;;  %v1651_v59 = vpop.f32.mrb[13].mxu0  ;;  %v2637_v15 = vpop.eup (!%p2305_p3), %2636  ;;  %1835 = vperm.xlu0 (!%p2305_p3), %2630, %v2635_v32   ;;  %2656 = vrcp.f32 (!%p2305_p3), %v1798_v26  ;;  %v1817_v50 = vld [vmem:[#allocation4] sm:$0xff] (!%p2305_p3) }
 0x361   : > { %v1741_v3 = vadd.f32 %v1651_v59, %v1449_v61  ;;  %v2431_v10 = vpop.f32.mrb[14].mxu0  ;;  %v2639_v6 = vpop.eup (!%p2305_p3), %2638  ;;  %1850 = vperm.xlu1 (!%p2305_p3), %2631, %v2637_v15   ;;  %2658 = vrcp.f32 (!%p2305_p3), %v1797_v17  ;;  %v1820_v59 = vld [vmem:[#allocation4 + $0x18] sm:$0xff] (!%p2305_p3) }
 0x362   : > { %1759 = vst.msk [vmem:[#allocation4 + $0x50] sm:$0xff] %vm671_vm2, %v1743_v9  ;;  %v1744_v42 = vadd.f32 %v2431_v10, %v1452_v52  ;;  %v1654_v12 = vpop.f32.mrb[15].mxu0  ;;  %v2641_v47 = vpop.eup (!%p2305_p3), %2640  ;;  %2660 = vrcp.f32 (!%p2305_p3), %v1800_v22  ;;  %v1821_v13 = vld [vmem:[#allocation4 + $0x20] sm:$0xff] (!%p2305_p3) }
 0x363   : > { %1757 = vst.msk [vmem:[#allocation4 + $0x40] sm:$0xff] %vm671_vm2, %v1741_v3  ;;  %v1742_v51 = vadd.f32 %v1654_v12, %v1450_v55  ;;  %v2643_v16 = vpop.eup (!%p2305_p3), %2642  ;;  %2662 = vrcp.f32 (!%p2305_p3), %v1799_v2  ;;  %v1818_v3 = vld [vmem:[#allocation4 + $0x8] sm:$0xff] (!%p2305_p3) }
 0x364   : > { %1760 = vst.msk [vmem:[#allocation4 + $0x58] sm:$0xff] %vm671_vm2, %v1744_v42  ;;  %1840 = vperm.xlu0 (!%p2305_p3), %2630, %v2639_v6   ;;  %v2645_v60 = vpop.eup (!%p2305_p3), %2644  ;;  %v1822_v7 = vld [vmem:[#allocation4 + $0x28] sm:$0xff] (!%p2305_p3) }
 0x365   : > { %1758 = vst.msk [vmem:[#allocation4 + $0x48] sm:$0xff] %vm671_vm2, %v1742_v51  ;;  %1860 = vperm.xlu1 (!%p2305_p3), %2631, %v2641_v47   ;;  %v2647_v31 = vpop.eup (!%p2305_p3), %2646 }
 0x366   : > { %v2438_v58 = vpop.f32.mrb[12].mxu1  ;;  %1784 = sbr.rel (%p2305_p3) target bundleno = 1025 (0x401), region = 163  ;;  %v2649_v43 = vpop.eup (!%p2305_p3), %2648 }
 0x367   : > { %v1747_v23 = vadd.f32 %v2438_v58, %v1455_v11  ;;  %v1718_v44 = vpop.f32.mrb[13].mxu1  ;;  %v2651_v33 = vpop.eup (!%p2305_p3), %2650 }
 0x368   : > { %v1745_v35 = vadd.f32 %v1718_v44, %v1453_v45  ;;  %v2439_v29 = vpop.f32.mrb[14].mxu1  ;;  %1855 = vperm.xlu0 (!%p2305_p3), %2630, %v2643_v16   ;;  %v2653_v28 = vpop.eup (!%p2305_p3), %2652  ;;  %v1823_v44 = vld [vmem:[#allocation4 + $0x30] sm:$0xff] (!%p2305_p3) }
 0x369   : > { %1763 = vst.msk [vmem:[#allocation4 + $0x70] sm:$0xff] %vm671_vm2, %v1747_v23  ;;  %v1748_v27 = vadd.f32 %v2439_v29, %v1456_v63  ;;  %v1721_v24 = vpop.f32.mrb[15].mxu1  ;;  %1870 = vperm.xlu1 (!%p2305_p3), %2631, %v2645_v60   ;;  %v2655_v0 = vpop.eup (!%p2305_p3), %2654  ;;  %v1824_v63 = vld [vmem:[#allocation4 + $0x38] sm:$0xff] (!%p2305_p3)  ;;  %v1827_v39 = vld [vmem:[#allocation4 + $0x50] sm:$0xff] (!%p2305_p3) }
 0x36a   : > { %1761 = vst.msk [vmem:[#allocation4 + $0x60] sm:$0xff] %vm671_vm2, %v1745_v35  ;;  %v1746_v5 = vadd.f32 %v1721_v24, %v1454_v34  ;;  %v2657_v21 = vpop.eup (!%p2305_p3), %2656  ;;  %v1825_v18 = vld [vmem:[#allocation4 + $0x40] sm:$0xff] (!%p2305_p3) }
 0x36b   : > { %1764 = vst.msk [vmem:[#allocation4 + $0x78] sm:$0xff] %vm671_vm2, %v1748_v27  ;;  %v2659_v25 = vpop.eup (!%p2305_p3), %2658  ;;  %v1828_v38 = vld [vmem:[#allocation4 + $0x58] sm:$0xff] (!%p2305_p3) }
 0x36c   : > { %1762 = vst.msk [vmem:[#allocation4 + $0x68] sm:$0xff] %vm671_vm2, %v1746_v5  ;;  %1865 = vperm.xlu0 (!%p2305_p3), %2630, %v2647_v31   ;;  %v2661_v4 = vpop.eup (!%p2305_p3), %2660  ;;  %v1826_v5 = vld [vmem:[#allocation4 + $0x48] sm:$0xff] (!%p2305_p3) }
 0x36d   : > { %1880 = vperm.xlu1 %2631, %v2649_v43   ;;  %v2663_v56 = vpop.eup %2662 }
 0x370   : > { %1875 = vperm.xlu0 %2630, %v2651_v33   ;;  %v1831_v2 = vld [vmem:[#allocation4 + $0x70] sm:$0xff] }
 0x371   : > { %1890 = vperm.xlu1 %2631, %v2653_v28   ;;  %v1829_v19 = vld [vmem:[#allocation4 + $0x60] sm:$0xff] }
 0x372   : > { %v1832_v22 = vld [vmem:[#allocation4 + $0x78] sm:$0xff] }
 0x373   : > { %v1830_v41 = vld [vmem:[#allocation4 + $0x68] sm:$0xff] }
 0x374   : > { %1885 = vperm.xlu0 %2630, %v2655_v0  }
 0x375   : > { %1900 = vperm.xlu1 %2631, %v2657_v21  }
 0x378   : > { %1895 = vperm.xlu0 %2630, %v2659_v25  }
 0x379   : > { %1910 = vperm.xlu1 %2631, %v2661_v4  }
 0x37c   : > { %1905 = vperm.xlu0 %2630, %v2663_v56  }
 0x3d5   : > { %v1846_v61 = vpop.permute.xlu1 %1845 }
 0x3d6   : > { %v1915_v62 = vmul.f32 %v1846_v61, %v1819_v54 }
 0x3d8   : > { %v2330_v55 = vpack.c.bf16 %v1915_v62, %v1915_v62 }
 0x3da   : > { %1996 = vst.msk [vmem:[%s2915_s29 + $0x8] sm:$0xf] %vm1993_vm4, %v2330_v55 }
 0x3df   : > { %v1836_v52 = vpop.permute.xlu0 %1835 }
 0x3e0   : > { %v1913_v9 = vmul.f32 %v1836_v52, %v1817_v50  ;;  %v1851_v46 = vpop.permute.xlu1 %1850 }
 0x3e1   : > { %v1916_v14 = vmul.f32 %v1851_v46, %v1820_v59 }
 0x3e2   : > { %v2328_v10 = vpack.c.bf16 %v1913_v9, %v1913_v9 }
 0x3e3   : > { %v1841_v42 = vpop.permute.xlu0 %1840  ;;  %v2331_v51 = vpack.c.bf16 %v1916_v14, %v1916_v14 }
 0x3e4   : > { %1994 = vst.msk [vmem:[%s2915_s29] sm:$0xf] %vm1993_vm4, %v2328_v10  ;;  %v1914_v12 = vmul.f32 %v1841_v42, %v1818_v3  ;;  %v1861_v8 = vpop.permute.xlu1 %1860 }
 0x3e5   : > { %1997 = vst.msk [vmem:[%s2915_s29 + $0xc] sm:$0xf] %vm1993_vm4, %v2331_v51  ;;  %v1918_v11 = vmul.f32 %v1861_v8, %v1822_v7 }
 0x3e6   : > { %v2329_v20 = vpack.c.bf16 %v1914_v12, %v1914_v12 }
 0x3e7   : > { %v1856_v45 = vpop.permute.xlu0 %1855  ;;  %v2333_v23 = vpack.c.bf16 %v1918_v11, %v1918_v11 }
 0x3e8   : > { %1995 = vst.msk [vmem:[%s2915_s29 + $0x4] sm:$0xf] %vm1993_vm4, %v2329_v20  ;;  %v1917_v58 = vmul.f32 %v1856_v45, %v1821_v13  ;;  %v1871_v35 = vpop.permute.xlu1 %1870 }
 0x3e9   : > { %1999 = vst.msk [vmem:[%s2915_s29 + $0x14] sm:$0xf] %vm1993_vm4, %v2333_v23  ;;  %v1920_v29 = vmul.f32 %v1871_v35, %v1824_v63 }
 0x3ea   : > { %v2332_v34 = vpack.c.bf16 %v1917_v58, %v1917_v58 }
 0x3eb   : > { %v1866_v27 = vpop.permute.xlu0 %1865  ;;  %v2335_v1 = vpack.c.bf16 %v1920_v29, %v1920_v29 }
 0x3ec   : > { %1998 = vst.msk [vmem:[%s2915_s29 + $0x10] sm:$0xf] %vm1993_vm4, %v2332_v34  ;;  %v1919_v24 = vmul.f32 %v1866_v27, %v1823_v44  ;;  %v1881_v53 = vpop.permute.xlu1 %1880 }
 0x3ed   : > { %2001 = vst.msk [vmem:[%s2915_s29 + $0x1c] sm:$0xf] %vm1993_vm4, %v2335_v1  ;;  %v1922_v37 = vmul.f32 %v1881_v53, %v1826_v5 }
 0x3ee   : > { %v2334_v30 = vpack.c.bf16 %v1919_v24, %v1919_v24 }
 0x3ef   : > { %v1876_v36 = vpop.permute.xlu0 %1875  ;;  %v2337_v57 = vpack.c.bf16 %v1922_v37, %v1922_v37 }
 0x3f0   : > { %2000 = vst.msk [vmem:[%s2915_s29 + $0x18] sm:$0xf] %vm1993_vm4, %v2334_v30  ;;  %v1921_v48 = vmul.f32 %v1876_v36, %v1825_v18  ;;  %v1891_v40 = vpop.permute.xlu1 %1890 }
 0x3f1   : > { %2003 = vst.msk [vmem:[%s2915_s29 + $0x24] sm:$0xf] %vm1993_vm4, %v2337_v57  ;;  %v1924_v15 = vmul.f32 %v1891_v40, %v1828_v38 }
 0x3f2   : > { %v2336_v32 = vpack.c.bf16 %v1921_v48, %v1921_v48 }
 0x3f3   : > { %v1886_v49 = vpop.permute.xlu0 %1885  ;;  %v2339_v47 = vpack.c.bf16 %v1924_v15, %v1924_v15 }
 0x3f4   : > { %2002 = vst.msk [vmem:[%s2915_s29 + $0x20] sm:$0xf] %vm1993_vm4, %v2336_v32  ;;  %v1923_v6 = vmul.f32 %v1886_v49, %v1827_v39  ;;  %v1901_v26 = vpop.permute.xlu1 %1900 }
 0x3f5   : > { %2005 = vst.msk [vmem:[%s2915_s29 + $0x2c] sm:$0xf] %vm1993_vm4, %v2339_v47  ;;  %v1926_v60 = vmul.f32 %v1901_v26, %v1830_v41 }
 0x3f6   : > { %v2338_v16 = vpack.c.bf16 %v1923_v6, %v1923_v6 }
 0x3f7   : > { %v1896_v17 = vpop.permute.xlu0 %1895  ;;  %v2341_v43 = vpack.c.bf16 %v1926_v60, %v1926_v60 }
 0x3f8   : > { %2004 = vst.msk [vmem:[%s2915_s29 + $0x28] sm:$0xf] %vm1993_vm4, %v2338_v16  ;;  %v1925_v31 = vmul.f32 %v1896_v17, %v1829_v19  ;;  %v1911_v28 = vpop.permute.xlu1 %1910 }
 0x3f9   : > { %2007 = vst.msk [vmem:[%s2915_s29 + $0x34] sm:$0xf] %vm1993_vm4, %v2341_v43  ;;  %v1928_v0 = vmul.f32 %v1911_v28, %v1832_v22 }
 0x3fa   : > { %v2340_v33 = vpack.c.bf16 %v1925_v31, %v1925_v31 }
 0x3fb   : > { %v1906_v21 = vpop.permute.xlu0 %1905  ;;  %v2343_v4 = vpack.c.bf16 %v1928_v0, %v1928_v0 }
 0x3fc   : > { %2006 = vst.msk [vmem:[%s2915_s29 + $0x30] sm:$0xf] %vm1993_vm4, %v2340_v33  ;;  %v1927_v25 = vmul.f32 %v1906_v21, %v1831_v2 }
 0x3fd   : > { %2009 = vst.msk [vmem:[%s2915_s29 + $0x3c] sm:$0xf] %vm1993_vm4, %v2343_v4 }
 0x3fe   : > { %v2342_v56 = vpack.c.bf16 %v1927_v25, %v1927_v25 }
 0x400   : > { %2008 = vst.msk [vmem:[%s2915_s29 + $0x38] sm:$0xf] %vm1993_vm4, %v2342_v56 }
 0x401 PF: > { %2016 = sbr.rel (!%p2867_p9) target bundleno = 1034 (0x40a), region = 167  ;;  %s2323_s12 = sshll.u32 (%p2867_p9), %s2730_s17, 2  ;;  %v2037_v54 = vld [vmem:[%s2915_s29] sm:$0xff] (%p2867_p9)   ;;  %v2041_v50 = vld [vmem:[%s2915_s29 + $0x8] sm:$0xff] (%p2867_p9)   ;;  %v2045_v61 = vld [vmem:[%s2915_s29 + $0x10] sm:$0xff] (%p2867_p9)  }
 0x402   : > { %s2324_s14 = sshll.u32 (%p2867_p9), %s2734_s18, 5  ;;  %v2049_v62 = vld [vmem:[%s2915_s29 + $0x18] sm:$0xff] (%p2867_p9)   ;;  %v2053_v52 = vld [vmem:[%s2915_s29 + $0x20] sm:$0xff] (%p2867_p9)   ;;  %v2057_v9 = vld [vmem:[%s2915_s29 + $0x28] sm:$0xff] (%p2867_p9)  }
 0x403   : > { %s2019_s16 = sadd.s32 (%p2867_p9), %s2324_s14, %s2323_s12  ;;  %v2061_v59 = vld [vmem:[%s2915_s29 + $0x30] sm:$0xff] (%p2867_p9)  }
 0x404   : > { %s2325_s5 = sshll.u32 (%p2867_p9), %s2019_s16, 2 }
 0x405   : > { %s2021_s8 = scalar_lea.vmem (%p2867_p9), %s3480_s3, %s2325_s5 }
 0x406   : > { %2038 = vst [vmem:[%s2021_s8] sm:$0xff] (%p2867_p9), %v2037_v54   ;;  %2042 = vst [vmem:[%s2021_s8 + $0x8] sm:$0xff] (%p2867_p9), %v2041_v50  }
 0x407   : > { %v2065_v55 = vld [vmem:[%s2915_s29 + $0x38] sm:$0xff] (%p2867_p9)   ;;  %2046 = vst [vmem:[%s2021_s8 + $0x20] sm:$0xff] (%p2867_p9), %v2045_v61   ;;  %2050 = vst [vmem:[%s2021_s8 + $0x28] sm:$0xff] (%p2867_p9), %v2049_v62  }
 0x408   : > { %2054 = vst [vmem:[%s2021_s8 + $0x40] sm:$0xff] %v2053_v52   ;;  %2058 = vst [vmem:[%s2021_s8 + $0x48] sm:$0xff] %v2057_v9  }
 0x409   : > { %2062 = vst [vmem:[%s2021_s8 + $0x60] sm:$0xff] %v2061_v59   ;;  %2066 = vst [vmem:[%s2021_s8 + $0x68] sm:$0xff] %v2065_v55  }
 0x40a PF: > { %s13_s22 = sadd.s32 1, %s2750_s22   ;;  %s3488_s4 = sld [smem:[#allocation9_spill]] }
 0x40b   : > { %p10_p4 = scmp.ge.s32.totalorder %s13_s22, 10   ;;  %s3489_s30 = sld [smem:[#allocation10_spill]] }
 0x40c   : > { %s3490_s12 = smov %s2714_s13  ;;  %s3491_s13 = smov %s2878_s11 }
 0x40d   : > { %s3492_s14 = smov %s2722_s15  ;;  %s3493_s15 = smov %s2875_s10 }
 0x40e   : > { %s3494_s16 = smov %s2738_s19  ;;  %s3495_s17 = smov %s2742_s20 }
 0x40f   : > { %s3496_s18 = smov %s2746_s21  ;;  %s3497_s19 = smov %s3501_s23 }
 0x410   : > { %s3498_s20 = smov %s3488_s4  ;;  %12 = sbr.rel (!%p10_p4) target bundleno = 6 (0x6), region = 255 }
 0x411   : > { %s3499_s21 = smov %s3489_s30 }

// kernel: audio_encoder_forward.13
= control target key start
LH: loop header
LB: loop body
LE: loop exit
PB: predicated region body
PF: predicated region fallthrough
CT: control target
= control target key end

     0   :  { %s2042_s0 = inlined_call_operand.vmem [shape: f32[2,64,128], index: 0, kind: input, shape index: {}]   ;;  %s2043_s1 = inlined_call_operand.vmem [shape: bf16[2,64,128], index: 1, kind: input, shape index: {}]   ;;  %s2044_s2 = inlined_call_operand.vmem [shape: bf16[128,128], index: 2, kind: input, shape index: {}]   ;;  %s2045_s3 = inlined_call_operand.vmem [shape: f32[1,128], index: 3, kind: input, shape index: {}]   ;;  %s2046_s4 = inlined_call_operand.vmem [shape: f32[1,128], index: 4, kind: input, shape index: {}]   ;;  %s2047_s5 = inlined_call_operand.vmem [shape: f32[1,128], index: 5, kind: input, shape index: {}]   ;;  %s2048_s6 = inlined_call_operand.vmem [shape: bf16[128,512], index: 6, kind: input, shape index: {}]   ;;  %s2049_s7 = inlined_call_operand.vmem [shape: f32[1,512], index: 7, kind: input, shape index: {}]   ;;  %s2050_s8 = inlined_call_operand.vmem [shape: bf16[512,128], index: 8, kind: input, shape index: {}]   ;;  %s2051_s9 = inlined_call_operand.vmem [shape: f32[1,128], index: 9, kind: input, shape index: {}]   ;;  %s2052_s10 = inlined_call_operand.vmem [shape: f32[2,64,128], index: 10, kind: output, shape index: {}]  }
   0x1   :  { %2056 = sst [smem:[#allocation10_spill]] %s2042_s0 }
   0x2   :  { %2057 = sst [smem:[#allocation11_spill]] %s2048_s6 }
   0x3   :  { %s1805_s13 = smov 0   ;;  %s1807_s14 = smov 0  }
   0x4   :  { %s1809_s15 = smov 0   ;;  %s1811_s16 = smov 0  }
   0x5   :  { %s1813_s17 = smov 0   ;;  %s1815_s18 = smov 0  }
   0x6   :  { %s1817_s19 = smov 0   ;;  %s1819_s20 = smov 0  }
   0x7   :  { %s1821_s21 = smov 0  }
   0x8 LB: > { %2058 = sst [smem:[#allocation5_spill]] %s1739_s19  ;;  %s32_s22 = sadd.s32 1, %s1735_s18  ;;  %s1747_s21 = sphi %s1821_s21, %s20_s21   ;;  %s1743_s20 = sphi %s1819_s20, %s2069_s20   ;;  %s1739_s19 = sphi %s1817_s19, %s2068_s19   ;;  %s1735_s18 = sphi %s1815_s18, %s2073_s18   ;;  %s1731_s17 = sphi %s1813_s17, %s2066_s17   ;;  %s1727_s16 = sphi %s1811_s16, %s2065_s16   ;;  %s1723_s15 = sphi %s1809_s15, %s2072_s15   ;;  %s1719_s14 = sphi %s1807_s14, %s2071_s14   ;;  %s1715_s13 = sphi %s1805_s13, %s2070_s13  }
   0x9   : > { %2059 = sst [smem:[#allocation6_spill]] %s1743_s20  ;;  %p33_p0 = scmp.ge.s32.totalorder %s32_s22, 2 }
   0xa   : > { %s35_s23 = sadd.s32 1, %s1739_s19  ;;  %s39_s24 = sadd.s32 1, %s1743_s20 }
   0xb   : > { %p193_p1 = scmp.ne.s32.totalorder %s1719_s14, %s1715_s13  ;;  %s2075_s22 = smov (%p33_p0, %s32_s22), 0 }
   0xc   : > { %2060 = sst [smem:[#allocation7_spill]] %s2075_s22  ;;  %s2077_s23 = smov (!%p33_p0, %s35_s23), %s1739_s19 }
   0xd   : > { %s183_s25 = ssub.s32 %s1735_s18, %s2075_s22  ;;  %p194_p2 = scmp.eq.s32.totalorder %s1747_s21, 0 }
   0xe   : > { %p37_p3 = scmp.ge.s32.totalorder %s2077_s23, 2  ;;  %p184_p4 = scmp.eq.s32.totalorder %s183_s25, 0 }
   0xf   : > { %s186_s26 = sadd.s32 1, %s1719_s14  ;;  %p195_p5 = por %p194_p2, %p193_p1 }
  0x10   : > { %s2079_s23 = smov (%p37_p3, %s2077_s23), 0  ;;  %s2081_s24 = smov (!%p37_p3, %s39_s24), %s1743_s20 }
  0x11   : > { %2061 = sst [smem:[#allocation8_spill]] %s2079_s23  ;;  %p41_p6 = scmp.ge.s32.totalorder %s2081_s24, 2 }
  0x12   : > { %s1866_s27 = scalar_select %p184_p4, %s1719_s14, %s186_s26  }
  0x13   : > { %s2083_s24 = smov (%p41_p6, %s2081_s24), 0  ;;  %p1403_p7 = scmp.ge.s32.totalorder %s1747_s21, 8 }
  0x14   : > { %2062 = sst [smem:[#allocation9_spill]] %s2083_s24 }
  0x15   : > { %335 = sbr.rel (%p1403_p7) target bundleno = 46 (0x2e), region = 36 }
  0x1c   : > { %364 = sbr.rel (!%p195_p5) target bundleno = 46 (0x2e), region = 48  ;;  %s366_s28 = sand.u32 (%p195_p5), 1, %s1719_s14  }
  0x1d   : > { %s1471_s29 = sshll.u32 (%p195_p5), %s1735_s18, 3  ;;  %s1404_s30 = sshll.u32 (%p195_p5), %s366_s28, 7 }
  0x1e   : > { %s2063_s6 = sld [smem:[#allocation11_spill]] (%p195_p5)  ;;  %s368_s26 = scalar_lea.vmem (%p195_p5), [#allocation4], %s1404_s30 }
  0x24   : > { %s1876_s25 = scalar_lea.vmem %s2063_s6, %s1471_s29 }
  0x25   : > { %v429_v0 = vld [vmem:[%s1876_s25] sm:$0xff]  ;;  %v431_v1 = vld [vmem:[%s1876_s25 + $0x10] sm:$0xff] }
  0x26   : > { %v433_v2 = vld [vmem:[%s1876_s25 + $0x20] sm:$0xff]  ;;  %430 = vst [vmem:[%s368_s26] sm:$0xff] %v429_v0  ;;  %432 = vst [vmem:[%s368_s26 + $0x8] sm:$0xff] %v431_v1  ;;  %v435_v3 = vld [vmem:[%s1876_s25 + $0x30] sm:$0xff] }
  0x27   : > { %434 = vst [vmem:[%s368_s26 + $0x10] sm:$0xff] %v433_v2  ;;  %v437_v4 = vld [vmem:[%s1876_s25 + $0x40] sm:$0xff]  ;;  %v439_v5 = vld [vmem:[%s1876_s25 + $0x50] sm:$0xff]  ;;  %436 = vst [vmem:[%s368_s26 + $0x18] sm:$0xff] %v435_v3 }
  0x28   : > { %438 = vst [vmem:[%s368_s26 + $0x20] sm:$0xff] %v437_v4  ;;  %440 = vst [vmem:[%s368_s26 + $0x28] sm:$0xff] %v439_v5  ;;  %v441_v6 = vld [vmem:[%s1876_s25 + $0x60] sm:$0xff]  ;;  %v443_v7 = vld [vmem:[%s1876_s25 + $0x70] sm:$0xff] }
  0x29   : > { %v445_v8 = vld [vmem:[%s1876_s25 + $0x80] sm:$0xff]  ;;  %442 = vst [vmem:[%s368_s26 + $0x30] sm:$0xff] %v441_v6  ;;  %444 = vst [vmem:[%s368_s26 + $0x38] sm:$0xff] %v443_v7  ;;  %v447_v9 = vld [vmem:[%s1876_s25 + $0x90] sm:$0xff] }
  0x2a   : > { %446 = vst [vmem:[%s368_s26 + $0x40] sm:$0xff] %v445_v8  ;;  %v449_v10 = vld [vmem:[%s1876_s25 + $0xa0] sm:$0xff]  ;;  %v451_v11 = vld [vmem:[%s1876_s25 + $0xb0] sm:$0xff]  ;;  %448 = vst [vmem:[%s368_s26 + $0x48] sm:$0xff] %v447_v9 }
  0x2b   : > { %450 = vst [vmem:[%s368_s26 + $0x50] sm:$0xff] %v449_v10  ;;  %452 = vst [vmem:[%s368_s26 + $0x58] sm:$0xff] %v451_v11  ;;  %v453_v12 = vld [vmem:[%s1876_s25 + $0xc0] sm:$0xff]  ;;  %v455_v13 = vld [vmem:[%s1876_s25 + $0xd0] sm:$0xff] }
  0x2c   : > { %v457_v14 = vld [vmem:[%s1876_s25 + $0xe0] sm:$0xff]  ;;  %454 = vst [vmem:[%s368_s26 + $0x60] sm:$0xff] %v453_v12  ;;  %456 = vst [vmem:[%s368_s26 + $0x68] sm:$0xff] %v455_v13  ;;  %v459_v15 = vld [vmem:[%s1876_s25 + $0xf0] sm:$0xff] }
  0x2d   : > { %458 = vst [vmem:[%s368_s26 + $0x70] sm:$0xff] %v457_v14  ;;  %460 = vst [vmem:[%s368_s26 + $0x78] sm:$0xff] %v459_v15 }
  0x2e PF: > { %p1407_p8 = scmp.ge.s32.totalorder %s1747_s21, 1  ;;  %p482_p9 = scmp.lt.s32.totalorder %s1747_s21, 9 }
  0x30   : > { %p483_p10 = pnand %p1407_p8, %p482_p9 }
  0x31   : > { %s489_s28 = sand.u32 (!%p483_p10), 1, %s1715_s13   ;;  %s1409_s29 = sshll.u32 (!%p483_p10), %s1727_s16, 2 }
  0x32   : > { %486 = sbr.rel (%p483_p10) target bundleno = 1136 (0x470), region = 94  ;;  %s1408_s30 = sshll.u32 (!%p483_p10), %s489_s28, 7 }
  0x33   : > { %p558_p11 = scmp.lt.s32.totalorder (!%p483_p10), %s1731_s17, 1  ;;  %p560_p12 = scmp.lt.s32.totalorder (!%p483_p10), %s1409_s29, 7 }
  0x34   : > { %s1415_s12 = sshll.u32 (!%p483_p10), %s1723_s15, 1  ;;  %s2064_s0 = sld [smem:[#allocation10_spill]] (!%p483_p10) }
  0x35   : > { %p579_p13 = scmp.lt.s32.totalorder (!%p483_p10), %s1415_s12, 3  ;;  %s1416_s28 = sshll.u32 (!%p483_p10), %s1723_s15, 5 }
  0x36   : > { %p584_p0 = scmp.lt.s32.totalorder (!%p483_p10), %s1416_s28, 63  ;;  %s1928_s13 = scalar_lea.vmem (!%p483_p10), [#allocation4], %s1408_s30 }
  0x37   : > { %p1421_p1 = scmp.ne.s32.totalorder (!%p483_p10), %s1723_s15, 0 }
  0x39   : > { %s2085_s17 = smov (!%p558_p11, %s1731_s17), 1  ;;  %s2087_s29 = smov (!%p560_p12, %s1409_s29), 7 }
  0x3a   : > { %s1410_s11 = sshll.u32 %s2085_s17, 3  ;;  %s2089_s12 = smov (!%p579_p13, %s1415_s12), 3  ;;  %v1603_v16 = vld [vmem:[%s2044_s2] sm:$0xff] (!%p1421_p1)   ;;  %v1604_v17 = vld [vmem:[%s2044_s2 + $0x8] sm:$0xff] (!%p1421_p1)   ;;  %v1605_v18 = vld [vmem:[%s2044_s2 + $0x10] sm:$0xff] (!%p1421_p1)  }
  0x3b   : > { %s563_s25 = sadd.s32 %s1410_s11, %s2087_s29  ;;  %s581_s23 = scalar_lea.vmem %s2049_s7, %s2089_s12  ;;  %1510 = vmatprep.subr.bf16.mxu0 (!%p1421_p1), %v1603_v16  ;;  %v1606_v19 = vld [vmem:[%s2044_s2 + $0x18] sm:$0xff] (!%p1421_p1)   ;;  %v1607_v21 = vld [vmem:[%s2044_s2 + $0x20] sm:$0xff] (!%p1421_p1)   ;;  %v1608_v22 = vld [vmem:[%s2044_s2 + $0x28] sm:$0xff] (!%p1421_p1)  }
  0x3c   : > { %s1411_s26 = sshll.u32 %s563_s25, 3  ;;  %s1414_s6 = sshll.u32 %s563_s25, 2  ;;  %1511 = vmatpush3.bf16.msra.mxu0 (!%p1421_p1), %v1603_v16  ;;  %v1609_v23 = vld [vmem:[%s2044_s2 + $0x30] sm:$0xff] (!%p1421_p1)   ;;  %v1610_v24 = vld [vmem:[%s2044_s2 + $0x38] sm:$0xff] (!%p1421_p1)   ;;  %v1432_v30 = vld [vmem:[%s2045_s3] ss:$0 sm:$0xff] (!%p1421_p1) }
  0x3d   : > { %s1904_s22 = scalar_lea.vmem %s2064_s0, %s1411_s26  ;;  %s1909_s16 = scalar_lea.vmem %s2043_s1, %s1414_s6  ;;  %1512 = vmatprep.subr.bf16.mxu0 (!%p1421_p1), %v1604_v17  ;;  %v1433_v8 = vld [vmem:[%s2046_s4] ss:$0 sm:$0xff] (!%p1421_p1) }
  0x3e   : > { %s1917_s29 = scalar_lea.vmem %s2052_s10, %s1411_s26  ;;  %s2091_s28 = smov (!%p584_p0, %s1416_s28), 63  ;;  %v1611_v20 = vld [vmem:[%s1909_s16] sm:$0xff] (!%p1421_p1)   ;;  %v1612_v25 = vld [vmem:[%s1909_s16 + $0x8] sm:$0xff] (!%p1421_p1)   ;;  %v735_v26 = vld [vmem:[%s1904_s22 + $0x10] sm:$0xff] (!%p1421_p1) }
  0x3f   : > { %s1417_s24 = sshll.u32 %s2091_s28, 2  ;;  %603 = sbr.rel (%p1421_p1) target bundleno = 630 (0x276), region = 102  ;;  %1526 = vmatprep.mubr.bf16.mxu0 (!%p1421_p1), %v1611_v20  ;;  %v733_v27 = vld [vmem:[%s1904_s22] sm:$0xff] (!%p1421_p1)  ;;  %v736_v29 = vld [vmem:[%s1904_s22 + $0x18] sm:$0xff] (!%p1421_p1)  ;;  %v734_v33 = vld [vmem:[%s1904_s22 + $0x8] sm:$0xff] (!%p1421_p1) }
  0x40   : > { %s1926_s6 = scalar_lea.vmem %s2050_s8, %s1417_s24  ;;  %1513 = vmatpush3.bf16.msra.mxu0 (!%p1421_p1), %v1604_v17  ;;  %v1434_v10 = vld [vmem:[%s2047_s5] ss:$0 sm:$0xff] (!%p1421_p1) }
  0x41   : > { %1514 = vmatprep.subr.bf16.mxu0 (!%p1421_p1), %v1605_v18  ;;  %v1435_v13 = vld [vmem:[%s2051_s9] ss:$0 sm:$0xff] (!%p1421_p1) }
  0x44   : > { %1515 = vmatpush3.bf16.msra.mxu0 (!%p1421_p1), %v1605_v18 }
  0x45   : > { %1516 = vmatprep.subr.bf16.mxu0 (!%p1421_p1), %v1606_v19 }
  0x48   : > { %1517 = vmatpush3.bf16.msra.mxu0 %v1606_v19 }
  0x49   : > { %1518 = vmatprep.subr.bf16.mxu0 %v1607_v21 }
  0x4c   : > { %1519 = vmatpush3.bf16.msra.mxu0 %v1607_v21 }
  0x4d   : > { %1520 = vmatprep.subr.bf16.mxu0 %v1608_v22 }
  0x50   : > { %1521 = vmatpush3.bf16.msra.mxu0 %v1608_v22 }
  0x51   : > { %1522 = vmatprep.subr.bf16.mxu0 %v1609_v23 }
  0x54   : > { %1523 = vmatpush3.bf16.msra.mxu0 %v1609_v23 }
  0x55   : > { %1524 = vmatprep.subr.bf16.mxu0 %v1610_v24 }
  0x58   : > { %1525 = vmatpush3.bf16.msra.mxu0 %v1610_v24 }
  0x5b   : > { %1527 = vmatmul.mubr.bf16.vlgmr.msra.gmra.mrb[0].mxu0 %v1612_v25 }
 0x12e   : > { %v1528_v28 = vpop.f32.mrb[0].mxu0 }
 0x12f   : > { %v739_v31 = vadd.f32 %v1528_v28, %v735_v26  ;;  %v718_v32 = vpop.f32.mrb[1].mxu0 }
 0x130   : > { %v737_v34 = vadd.f32 %v733_v27, %v718_v32  ;;  %v1529_v35 = vpop.f32.mrb[2].mxu0 }
 0x131   : > { %v740_v36 = vadd.f32 %v1529_v35, %v736_v29  ;;  %v721_v37 = vpop.f32.mrb[3].mxu0  ;;  %v750_v38 = vadd.f32 %v1432_v30, %v739_v31 }
 0x132   : > { %v738_v39 = vadd.f32 %v734_v33, %v721_v37  ;;  %v748_v40 = vadd.f32 %v1432_v30, %v737_v34 }
 0x133   : > { %758 = vadd.xlane.f32.xlu1 %v750_v38  ;;  %v751_v41 = vadd.f32 %v1432_v30, %v740_v36 }
 0x134   : > { %754 = vadd.xlane.f32.xlu0 %v748_v40  ;;  %v749_v42 = vadd.f32 %v1432_v30, %v738_v39 }
 0x137   : > { %760 = vadd.xlane.f32.xlu1 %v751_v41 }
 0x138   : > { %756 = vadd.xlane.f32.xlu0 %v749_v42 }
 0x1c0   : > { %v759_v43 = vpop.xlane.xlu1 %758 }
 0x1c1   : > { %v755_v44 = vpop.xlane.xlu0 %754  ;;  %v765_v45 = vmul.f32 0.0078125, %v759_v43 }
 0x1c2   : > { %v763_v46 = vmul.f32 0.0078125, %v755_v44 }
 0x1c3   : > { %v769_v50 = vsub.f32 %v750_v38, %v765_v45 }
 0x1c4   : > { %v767_v47 = vsub.f32 %v748_v40, %v763_v46  ;;  %v761_v48 = vpop.xlane.xlu1 %760 }
 0x1c5   : > { %v757_v49 = vpop.xlane.xlu0 %756  ;;  %v766_v51 = vmul.f32 0.0078125, %v761_v48  ;;  %v773_v56 = vmul.f32 %v769_v50, %v769_v50 }
 0x1c6   : > { %v764_v52 = vmul.f32 0.0078125, %v757_v49  ;;  %v771_v53 = vmul.f32 %v767_v47, %v767_v47 }
 0x1c7   : > { %v770_v55 = vsub.f32 %v751_v41, %v766_v51 }
 0x1c8   : > { %v768_v54 = vsub.f32 %v749_v42, %v764_v52  ;;  %775 = vadd.xlane.f32.xlu0 %v771_v53 }
 0x1c9   : > { %v774_v58 = vmul.f32 %v770_v55, %v770_v55 }
 0x1ca   : > { %v772_v57 = vmul.f32 %v768_v54, %v768_v54 }
 0x1cc   : > { %779 = vadd.xlane.f32.xlu0 %v773_v56  ;;  %777 = vadd.xlane.f32.xlu1 %v772_v57 }
 0x1d0   : > { %781 = vadd.xlane.f32.xlu1 %v774_v58 }
 0x255   : > { %v776_v59 = vpop.xlane.xlu0 %775 }
 0x256   : > { %v783_v60 = vmul.f32 0.0078125, %v776_v59 }
 0x258   : > { %v787_v61 = vadd.f32 1e-05, %v783_v60 }
 0x259   : > { %v778_v62 = vpop.xlane.xlu1 %777  ;;  %v780_v63 = vpop.xlane.xlu0 %779 }
 0x25a   : > { %1613 = vrsqrt.f32 %v787_v61  ;;  %v784_v0 = vmul.f32 0.0078125, %v778_v62  ;;  %v785_v1 = vmul.f32 0.0078125, %v780_v63 }
 0x25c   : > { %v788_v2 = vadd.f32 1e-05, %v784_v0  ;;  %v789_v3 = vadd.f32 1e-05, %v785_v1 }
 0x25d   : > { %v782_v4 = vpop.xlane.xlu1 %781 }
 0x25e   : > { %1615 = vrsqrt.f32 %v788_v2  ;;  %v786_v5 = vmul.f32 0.0078125, %v782_v4 }
 0x25f   : > { %1617 = vrsqrt.f32 %v789_v3 }
 0x260   : > { %v790_v6 = vadd.f32 1e-05, %v786_v5 }
 0x262   : > { %1619 = vrsqrt.f32 %v790_v6 }
 0x264   : > { %v1614_v7 = vpop.eup %1613 }
 0x265   : > { %v795_v9 = vmul.f32 %v1614_v7, %v767_v47 }
 0x267   : > { %v805_v11 = vmul.f32 %v1433_v8, %v795_v9 }
 0x268   : > { %v1616_v12 = vpop.eup %1615 }
 0x269   : > { %v1618_v14 = vpop.eup %1617  ;;  %v815_v15 = vadd.f32 %v1434_v10, %v805_v11  ;;  %v796_v16 = vmul.f32 %v1616_v12, %v768_v54 }
 0x26a   : > { %v797_v17 = vmul.f32 %v1618_v14, %v769_v50 }
 0x26b   : > { %v826_v18 = vadd.f32 %v1435_v13, %v815_v15  ;;  %v806_v19 = vmul.f32 %v1433_v8, %v796_v16 }
 0x26c   : > { %v1620_v20 = vpop.eup %1619  ;;  %v807_v21 = vmul.f32 %v1433_v8, %v797_v17 }
 0x26d   : > { %830 = vst [vmem:[#allocation2] sm:$0xff] %v826_v18  ;;  %v816_v22 = vadd.f32 %v1434_v10, %v806_v19  ;;  %v798_v23 = vmul.f32 %v1620_v20, %v770_v55 }
 0x26e   : > { %v817_v24 = vadd.f32 %v1434_v10, %v807_v21 }
 0x26f   : > { %v827_v25 = vadd.f32 %v1435_v13, %v816_v22  ;;  %v834_v26 = vpack.c.bf16 %v816_v22, %v815_v15  ;;  %v808_v27 = vmul.f32 %v1433_v8, %v798_v23 }
 0x270   : > { %v828_v28 = vadd.f32 %v1435_v13, %v817_v24 }
 0x271   : > { %831 = vst [vmem:[#allocation2 + $0x8] sm:$0xff] %v827_v25  ;;  %836 = vst [vmem:[#allocation3] sm:$0xff] %v834_v26  ;;  %v818_v29 = vadd.f32 %v1434_v10, %v808_v27 }
 0x272   : > { %832 = vst [vmem:[#allocation2 + $0x10] sm:$0xff] %v828_v28 }
 0x273   : > { %v829_v30 = vadd.f32 %v1435_v13, %v818_v29  ;;  %v835_v31 = vpack.c.bf16 %v818_v29, %v817_v24 }
 0x275   : > { %833 = vst [vmem:[#allocation2 + $0x18] sm:$0xff] %v829_v30  ;;  %837 = vst [vmem:[#allocation3 + $0x8] sm:$0xff] %v835_v31 }
 0x276 PF: > { %v1621_v32 = vld [vmem:[%s1928_s13 + $0x4] ss:$8 sps:$4 sm:$0xff]   ;;  %v1623_v33 = vld [vmem:[%s1928_s13] ss:$8 sps:$4 sm:$0xff]   ;;  %v1749_v34 = vmov 0   ;;  %v1645_v42 = vld [vmem:[%s1926_s6 + $0x40] sm:$0xff]   ;;  %v858_v3 = vlaneseq }
 0x277   : > { %980 = vmatprep.mubr.bf16.mxu0 %v1749_v34  ;;  %948 = vmatprep.subr.bf16.mxu0 %v1621_v32  ;;  %v1624_v35 = vld [vmem:[%s1928_s13 + $0x14] ss:$8 sps:$4 sm:$0xff]   ;;  %v1626_v36 = vld [vmem:[%s1928_s13 + $0x10] ss:$8 sps:$4 sm:$0xff]   ;;  %v1627_v37 = vld [vmem:[%s1928_s13 + $0x24] ss:$8 sps:$4 sm:$0xff]  }
 0x278   : > { %949 = vmatpush1.bf16.msra.mxu0 %v1623_v33  ;;  %v1629_v38 = vld [vmem:[%s1928_s13 + $0x20] ss:$8 sps:$4 sm:$0xff]   ;;  %v1630_v39 = vld [vmem:[%s1928_s13 + $0x34] ss:$8 sps:$4 sm:$0xff]   ;;  %v1632_v40 = vld [vmem:[%s1928_s13 + $0x30] ss:$8 sps:$4 sm:$0xff]   ;;  %1482 = vmatprep.subr.bf16.mxu1 %v1645_v42 }
 0x279   : > { %950 = vmatprep.subr.bf16.mxu0 %v1624_v35  ;;  %v1633_v41 = vld [vmem:[%s1928_s13 + $0x44] ss:$8 sps:$4 sm:$0xff]   ;;  %v1635_v43 = vld [vmem:[%s1928_s13 + $0x40] ss:$8 sps:$4 sm:$0xff]   ;;  %v1646_v44 = vld [vmem:[%s1926_s6] sm:$0xff]   ;;  %v859_v4 = vshrl.u32 %v858_v3, 7 }
 0x27a   : > { %v1647_v45 = vld [vmem:[%s1926_s6 + $0x48] sm:$0xff]   ;;  %1483 = vmatpush3.bf16.msra.mxu1 %v1646_v44  ;;  %v1639_v49 = vld [vmem:[%s1928_s13 + $0x64] ss:$8 sps:$4 sm:$0xff]   ;;  %v1641_v50 = vld [vmem:[%s1928_s13 + $0x60] ss:$8 sps:$4 sm:$0xff]   ;;  %p1468_p2 = scmp.ne.s32.totalorder %s1723_s15, 1 }
 0x27b   : > { %v1636_v46 = vld [vmem:[%s1928_s13 + $0x54] ss:$8 sps:$4 sm:$0xff]   ;;  %1484 = vmatprep.subr.bf16.mxu1 %v1647_v45  ;;  %v1638_v48 = vld [vmem:[%s1928_s13 + $0x50] ss:$8 sps:$4 sm:$0xff]   ;;  %v1649_v55 = vld [vmem:[%s1926_s6 + $0x50] sm:$0xff]   ;;  %v860_v5 = vsub.s32 0, %v859_v4 }
 0x27c   : > { %951 = vmatpush1.bf16.msra.mxu0 %v1626_v36  ;;  %v1648_v47 = vld [vmem:[%s1926_s6 + $0x8] sm:$0xff]   ;;  %v838_v53 = vld [vmem:[#allocation3] sm:$0xff]  ;;  %v1650_v56 = vld [vmem:[%s1926_s6 + $0x10] sm:$0xff]   ;;  %v864_v7 = vsub.s32 1, %v859_v4 }
 0x27d   : > { %952 = vmatprep.subr.bf16.mxu0 %v1627_v37  ;;  %v1642_v51 = vld [vmem:[%s1928_s13 + $0x74] ss:$8 sps:$4 sm:$0xff]   ;;  %v1644_v52 = vld [vmem:[%s1928_s13 + $0x70] ss:$8 sps:$4 sm:$0xff]   ;;  %v1651_v57 = vld [vmem:[%s1926_s6 + $0x58] sm:$0xff]  }
 0x27e   : > { %1485 = vmatpush3.bf16.msra.mxu1 %v1648_v47  ;;  %v839_v54 = vld [vmem:[#allocation3 + $0x8] sm:$0xff]  ;;  %v1652_v58 = vld [vmem:[%s1926_s6 + $0x18] sm:$0xff]   ;;  %v1653_v59 = vld [vmem:[%s1926_s6 + $0x60] sm:$0xff]  }
 0x27f   : > { %1486 = vmatprep.subr.bf16.mxu1 %v1649_v55  ;;  %v1654_v60 = vld [vmem:[%s1926_s6 + $0x20] sm:$0xff]   ;;  %v1655_v61 = vld [vmem:[%s1926_s6 + $0x68] sm:$0xff]   ;;  %v1657_v63 = vld [vmem:[%s1926_s6 + $0x70] sm:$0xff]  }
 0x280   : > { %953 = vmatpush1.bf16.msra.mxu0 %v1629_v38  ;;  %v1656_v62 = vld [vmem:[%s1926_s6 + $0x28] sm:$0xff]   ;;  %v1658_v0 = vld [vmem:[%s1926_s6 + $0x30] sm:$0xff]   ;;  %v1659_v1 = vld [vmem:[%s1926_s6 + $0x78] sm:$0xff]  }
 0x281   : > { %954 = vmatprep.subr.bf16.mxu0 %v1630_v39  ;;  %v1660_v2 = vld [vmem:[%s1926_s6 + $0x38] sm:$0xff]   ;;  %v856_v6 = vld [vmem:[%s581_s23] sm:$0x3] }
 0x282   : > { %1487 = vmatpush3.bf16.msra.mxu1 %v1650_v56  ;;  %v861_v8 = vrot.slane %v856_v6, %v860_v5  ;;  %v865_v9 = vrot.slane %v856_v6, %v864_v7  ;;  %v1042_v7 = vld [vmem:[#allocation2] sm:$0xff] }
 0x283   : > { %1488 = vmatprep.subr.bf16.mxu1 %v1651_v57 }
 0x284   : > { %955 = vmatpush1.bf16.msra.mxu0 %v1632_v40 }
 0x285   : > { %956 = vmatprep.subr.bf16.mxu0 %v1633_v41 }
 0x286   : > { %1489 = vmatpush3.bf16.msra.mxu1 %v1652_v58 }
 0x287   : > { %1490 = vmatprep.subr.bf16.mxu1 %v1653_v59 }
 0x288   : > { %957 = vmatpush1.bf16.msra.mxu0 %v1635_v43 }
 0x289   : > { %958 = vmatprep.subr.bf16.mxu0 %v1636_v46 }
 0x28a   : > { %1491 = vmatpush3.bf16.msra.mxu1 %v1654_v60 }
 0x28b   : > { %1492 = vmatprep.subr.bf16.mxu1 %v1655_v61 }
 0x28c   : > { %959 = vmatpush1.bf16.msra.mxu0 %v1638_v48 }
 0x28d   : > { %960 = vmatprep.subr.bf16.mxu0 %v1639_v49 }
 0x28e   : > { %1493 = vmatpush3.bf16.msra.mxu1 %v1656_v62 }
 0x28f   : > { %1494 = vmatprep.subr.bf16.mxu1 %v1657_v63 }
 0x290   : > { %961 = vmatpush1.bf16.msra.mxu0 %v1641_v50 }
 0x291   : > { %962 = vmatprep.subr.bf16.mxu0 %v1642_v51 }
 0x292   : > { %1495 = vmatpush3.bf16.msra.mxu1 %v1658_v0 }
 0x293   : > { %1496 = vmatprep.subr.bf16.mxu1 %v1659_v1 }
 0x294   : > { %963 = vmatpush1.bf16.msra.mxu0 %v1644_v52 }
 0x296   : > { %1497 = vmatpush3.bf16.msra.mxu1 %v1660_v2 }
 0x297   : > { %981 = vmatmul.mubr.bf16.vlgmr.msra.gmra.mrb[0].mxu0 %v838_v53 }
 0x298   : > { %990 = vmatprep.mubr.bf16.mxu0 %v1749_v34 }
 0x29f   : > { %991 = vmatmul.mubr.bf16.gmra.mrb[4].mxu0 %v839_v54 }
 0x36a   : > { %v982_v10 = vpop.f32.mrb[0].mxu0 }
 0x36b   : > { %v983_v11 = vadd.f32 %v982_v10, %v861_v8  ;;  %v984_v12 = vpop.f32.mrb[1].mxu0 }
 0x36c   : > { %v985_v13 = vadd.f32 %v984_v12, %v865_v9  ;;  %v986_v14 = vpop.f32.mrb[2].mxu0 }
 0x36d   : > { %v1010_v15 = vmul.f32 0.70710677, %v983_v11  ;;  %v987_v16 = vadd.f32 %v986_v14, %v861_v8  ;;  %v988_v17 = vpop.f32.mrb[3].mxu0  ;;  %v1001_v40 = vmul.f32 0.5, %v983_v11  ;;  %v1043_v11 = vld [vmem:[#allocation2 + $0x8] sm:$0xff] }
 0x36e   : > { %v1011_v18 = vmul.f32 0.70710677, %v985_v13  ;;  %v989_v19 = vadd.f32 %v988_v17, %v865_v9  ;;  %v1002_v43 = vmul.f32 0.5, %v985_v13  ;;  %v1044_v17 = vld [vmem:[#allocation2 + $0x10] sm:$0xff] }
 0x36f   : > { %1661 = verf.f32 %v1010_v15  ;;  %v1012_v20 = vmul.f32 0.70710677, %v987_v16  ;;  %v1003_v41 = vmul.f32 0.5, %v987_v16 }
 0x370   : > { %1663 = verf.f32 %v1011_v18  ;;  %v1013_v21 = vmul.f32 0.70710677, %v989_v19  ;;  %v1004_v44 = vmul.f32 0.5, %v989_v19 }
 0x371   : > { %1665 = verf.f32 %v1012_v20 }
 0x372   : > { %1667 = verf.f32 %v1013_v21  ;;  %v992_v22 = vpop.f32.mrb[4].mxu0  ;;  %v1045_v21 = vld [vmem:[#allocation2 + $0x18] sm:$0xff] }
 0x373   : > { %v993_v23 = vadd.f32 %v992_v22, %v861_v8  ;;  %v994_v24 = vpop.f32.mrb[5].mxu0 }
 0x374   : > { %v995_v25 = vadd.f32 %v994_v24, %v865_v9  ;;  %v996_v26 = vpop.f32.mrb[6].mxu0 }
 0x375   : > { %v1014_v27 = vmul.f32 0.70710677, %v993_v23  ;;  %v997_v28 = vadd.f32 %v996_v26, %v861_v8  ;;  %v998_v29 = vpop.f32.mrb[7].mxu0  ;;  %v1005_v58 = vmul.f32 0.5, %v993_v23 }
 0x376   : > { %v1015_v30 = vmul.f32 0.70710677, %v995_v25  ;;  %v999_v31 = vadd.f32 %v998_v29, %v865_v9  ;;  %v1006_v61 = vmul.f32 0.5, %v995_v25 }
 0x377   : > { %1669 = verf.f32 %v1014_v27  ;;  %v1016_v32 = vmul.f32 0.70710677, %v997_v28  ;;  %v1007_v59 = vmul.f32 0.5, %v997_v28 }
 0x378   : > { %1671 = verf.f32 %v1015_v30  ;;  %v1017_v33 = vmul.f32 0.70710677, %v999_v31  ;;  %v1008_v62 = vmul.f32 0.5, %v999_v31 }
 0x379   : > { %v1662_v34 = vpop.eup %1661  ;;  %1673 = verf.f32 %v1016_v32 }
 0x37a   : > { %v1664_v35 = vpop.eup %1663  ;;  %v1026_v36 = vadd.f32 1.0, %v1662_v34  ;;  %1675 = verf.f32 %v1017_v33 }
 0x37b   : > { %v1666_v37 = vpop.eup %1665  ;;  %v1027_v38 = vadd.f32 1.0, %v1664_v35 }
 0x37c   : > { %v1668_v39 = vpop.eup %1667  ;;  %v1028_v42 = vadd.f32 1.0, %v1666_v37  ;;  %v1034_v46 = vmul.f32 %v1026_v36, %v1001_v40 }
 0x37d   : > { %v1029_v45 = vadd.f32 1.0, %v1668_v39  ;;  %v1035_v48 = vmul.f32 %v1027_v38, %v1002_v43 }
 0x37e   : > { %v1036_v47 = vmul.f32 %v1028_v42, %v1003_v41 }
 0x37f   : > { %v1037_v49 = vmul.f32 %v1029_v45, %v1004_v44 }
 0x380   : > { %v1046_v50 = vpack.c.bf16 %v1036_v47, %v1034_v46 }
 0x381   : > { %v1670_v51 = vpop.eup %1669  ;;  %v1047_v52 = vpack.c.bf16 %v1037_v49, %v1035_v48 }
 0x382   : > { %v1672_v53 = vpop.eup %1671  ;;  %v1030_v54 = vadd.f32 1.0, %v1670_v51 }
 0x383   : > { %v1674_v55 = vpop.eup %1673  ;;  %v1031_v56 = vadd.f32 1.0, %v1672_v53  ;;  %1210 = vmatprep.mubr.bf16.mxu1 %v1047_v52 }
 0x384   : > { %v1676_v57 = vpop.eup %1675  ;;  %v1032_v60 = vadd.f32 1.0, %v1674_v55  ;;  %1211 = vmatmul.mubr.bf16.vlgmr.msra.gmra.mrb[0].mxu1 %v1046_v50  ;;  %v1038_v0 = vmul.f32 %v1030_v54, %v1005_v58 }
 0x385   : > { %v1033_v63 = vadd.f32 1.0, %v1676_v57  ;;  %v1039_v2 = vmul.f32 %v1031_v56, %v1006_v61 }
 0x386   : > { %v1040_v1 = vmul.f32 %v1032_v60, %v1007_v59 }
 0x387   : > { %v1041_v3 = vmul.f32 %v1033_v63, %v1008_v62 }
 0x388   : > { %v1048_v4 = vpack.c.bf16 %v1040_v1, %v1038_v0 }
 0x389   : > { %v1049_v5 = vpack.c.bf16 %v1041_v3, %v1039_v2 }
 0x38b   : > { %1218 = vmatprep.mubr.bf16.mxu1 %v1049_v5 }
 0x38c   : > { %1219 = vmatmul.mubr.bf16.gmra.mrb[4].mxu1 %v1048_v4 }
 0x457   : > { %v1498_v6 = vpop.f32.mrb[0].mxu1 }
 0x458   : > { %v1499_v8 = vpop.f32.mrb[1].mxu1 }
 0x459   : > { %v1500_v9 = vadd.f32 %v1499_v8, %v1498_v6  ;;  %v1501_v10 = vpop.f32.mrb[2].mxu1 }
 0x45a   : > { %v1502_v12 = vpop.f32.mrb[3].mxu1 }
 0x45b   : > { %v1227_v13 = vadd.f32 %v1500_v9, %v1042_v7  ;;  %v1503_v14 = vadd.f32 %v1502_v12, %v1501_v10 }
 0x45d   : > { %1231 = vst [vmem:[#allocation2] sm:$0xff] %v1227_v13  ;;  %v1228_v15 = vadd.f32 %v1503_v14, %v1043_v11 }
 0x45f   : > { %1232 = vst [vmem:[#allocation2 + $0x8] sm:$0xff] %v1228_v15  ;;  %v1504_v16 = vpop.f32.mrb[4].mxu1 }
 0x460   : > { %v1505_v18 = vpop.f32.mrb[5].mxu1 }
 0x461   : > { %v1506_v19 = vadd.f32 %v1505_v18, %v1504_v16  ;;  %v1507_v20 = vpop.f32.mrb[6].mxu1  ;;  %1238 = sbr.rel (%p1468_p2) target bundleno = 1136 (0x470), region = 106 }
 0x462   : > { %v1508_v22 = vpop.f32.mrb[7].mxu1 }
 0x463   : > { %v1229_v23 = vadd.f32 %v1506_v19, %v1044_v17  ;;  %v1509_v24 = vadd.f32 %v1508_v22, %v1507_v20 }
 0x464   : > { %v1239_v26 = vld [vmem:[#allocation2] sm:$0xff] (!%p1468_p2) }
 0x465   : > { %1233 = vst [vmem:[#allocation2 + $0x10] sm:$0xff] %v1229_v23  ;;  %v1230_v25 = vadd.f32 %v1509_v24, %v1045_v21  ;;  %1243 = vst [vmem:[%s1917_s29] sm:$0xff] (!%p1468_p2), %v1239_v26 }
 0x466   : > { %v1240_v27 = vld [vmem:[#allocation2 + $0x8] sm:$0xff] (!%p1468_p2) }
 0x467   : > { %1234 = vst [vmem:[#allocation2 + $0x18] sm:$0xff] %v1230_v25  ;;  %1244 = vst [vmem:[%s1917_s29 + $0x8] sm:$0xff] (!%p1468_p2), %v1240_v27 }
 0x46c   : > { %v1241_v28 = vld [vmem:[#allocation2 + $0x10] sm:$0xff] }
 0x46d   : > { %1245 = vst [vmem:[%s1917_s29 + $0x10] sm:$0xff] %v1241_v28 }
 0x46e   : > { %v1242_v29 = vld [vmem:[#allocation2 + $0x18] sm:$0xff] }
 0x46f   : > { %1246 = vst [vmem:[%s1917_s29 + $0x18] sm:$0xff] %v1242_v29 }
 0x470 PF: > { %s20_s21 = sadd.s32 1, %s1747_s21   ;;  %s2065_s16 = sld [smem:[#allocation5_spill]] }
 0x471   : > { %p17_p3 = scmp.ge.s32.totalorder %s20_s21, 10   ;;  %s2066_s17 = sld [smem:[#allocation6_spill]] }
 0x472   : > { %s2067_s12 = sld [smem:[#allocation7_spill]]  ;;  %s2068_s19 = sld [smem:[#allocation8_spill]] }
 0x473   : > { %s2069_s20 = sld [smem:[#allocation9_spill]]  ;;  %s2070_s13 = smov %s1719_s14 }
 0x474   : > { %s2071_s14 = smov %s1866_s27  ;;  %s2072_s15 = smov %s1735_s18 }
 0x475   :  { %19 = sbr.rel (!%p17_p3) target bundleno = 8 (0x8), region = 153 }
 0x478   : > { %s2073_s18 = smov %s2067_s12 }

</bundles_post_ra>
